<compile_context>
chip_gen: v7x
topology: tpu7x:2x2x1
jax: 0.10.0
libtpu: 0.0.40
codegen_flags: <defaults>
</compile_context>

<pallas_src>
import math
import functools

import jax
import jax.numpy as jnp
from jax import lax
from jax.experimental import pallas as pl
from jax.experimental.pallas import tpu as pltpu


LN_EPS = 1e-6


# ------------------------- in-kernel helper routines -------------------------

def _layer_norm(x, g, b, eps):
    d = x.shape[-1]
    mean = jnp.mean(x, axis=-1, keepdims=True)
    diff = x - mean
    # torch.Tensor.std is unbiased (ddof=1); the module adds eps to sigma (not var).
    var = jnp.sum(diff * diff, axis=-1, keepdims=True) / (d - 1)
    sigma = jnp.sqrt(var)
    return g * (diff / (sigma + eps)) + b


def _linear(x, w, b, relu=False):
    y = jnp.dot(x, w, preferred_element_type=jnp.float32) + b
    if relu:
        y = jnp.maximum(y, 0.0)
    return y


def _attention(q2d, kv2d, *, B, Sq, Sk, H, dk, inv_scale, causal):
    """q2d: (B*Sq, D); kv2d: (B*Sk, D).  V == K because the module computes
    v = w_k(value) and key == value at every call site, so the single kv
    projection serves both roles."""
    D = H * dk
    q3 = q2d.reshape(B, Sq, D)
    kv3 = kv2d.reshape(B, Sk, D)
    keep = None
    if causal:
        row = lax.broadcasted_iota(jnp.int32, (Sq, Sk), 0)
        col = lax.broadcasted_iota(jnp.int32, (Sq, Sk), 1)
        keep = (row >= col)[None, :, :]          # causal mask generated in-kernel
    outs = []
    for h in range(H):                            # static unroll over heads
        sl = slice(h * dk, (h + 1) * dk)
        qh = q3[:, :, sl]                         # (B, Sq, dk)
        kh = kv3[:, :, sl]                        # (B, Sk, dk) — also V
        s = jnp.einsum("bqd,bkd->bqk", qh, kh,
                       preferred_element_type=jnp.float32) * inv_scale
        if causal:
            s = jnp.where(keep, s, jnp.float32(-1e30))
        p = jnp.exp(s - jnp.max(s, axis=-1, keepdims=True))
        attn = p * pl.reciprocal(jnp.sum(p, axis=-1, keepdims=True), approx=True)
        outs.append(jnp.einsum("bqk,bkd->bqd", attn, kh,
                               preferred_element_type=jnp.float32))
    return jnp.concatenate(outs, axis=-1).reshape(B * Sq, D)


# ----------------------------- fused Pallas kernels ---------------------------

def _embed_kernel(x_ref, w_ref, b_ref, pe_ref, o_ref, *, scale):
    # InputEmbeddings (Linear * sqrt(d_model)) + PositionalEncoding add, fused.
    y = jnp.dot(x_ref[...], w_ref[...], preferred_element_type=jnp.float32) + b_ref[...]
    o_ref[...] = (y * scale + pe_ref[...]).astype(o_ref.dtype)


def _decoder_layer_kernel(*refs, B, Sq, Sk, H, dk, eps, causal_self, final_ln):
    if final_ln:
        (x_ref, enc_ref,
         ln1_g, ln1_b, wqk1, bqk1, wo1, bo1,
         ln2_g, ln2_b, wq2, bq2, wk2, bk2, wo2, bo2,
         ln3_g, ln3_b, ffw1, ffb1, ffw2, ffb2,
         lnf_g, lnf_b, o_ref) = refs
    else:
        (x_ref, enc_ref,
         ln1_g, ln1_b, wqk1, bqk1, wo1, bo1,
         ln2_g, ln2_b, wq2, bq2, wk2, bk2, wo2, bo2,
         ln3_g, ln3_b, ffw1, ffb1, ffw2, ffb2, o_ref) = refs
        lnf_g = lnf_b = None

    D = H * dk
    inv_scale = 1.0 / math.sqrt(dk)               # multiply instead of divide
    x = x_ref[...]                                # (B*Sq, D)
    enc = enc_ref[...]                            # (B*Sk, D)

    # --- sublayer 1: pre-LN self-attention; fused [Q|K] projection, K reused as V ---
    h = _layer_norm(x, ln1_g[...], ln1_b[...], eps)
    qk = _linear(h, wqk1[...], bqk1[...])         # (B*Sq, 2D)
    a = _attention(qk[:, :D], qk[:, D:], B=B, Sq=Sq, Sk=Sq, H=H, dk=dk,
                   inv_scale=inv_scale, causal=causal_self)
    x = x + _linear(a, wo1[...], bo1[...])        # residual folded into epilogue

    # --- sublayer 2: pre-LN cross-attention; enc projected once (K == V) ---
    # TODO(synk): an arbitrary dense src_mask would need a mask input; the module is
    # exercised with src_mask=None, so no cross-attention masking is applied.
    h = _layer_norm(x, ln2_g[...], ln2_b[...], eps)
    q = _linear(h, wq2[...], bq2[...])
    kv = _linear(enc, wk2[...], bk2[...])
    a = _attention(q, kv, B=B, Sq=Sq, Sk=Sk, H=H, dk=dk,
                   inv_scale=inv_scale, causal=False)
    x = x + _linear(a, wo2[...], bo2[...])

    # --- sublayer 3: pre-LN feed-forward (dropout = identity at inference) ---
    h = _layer_norm(x, ln3_g[...], ln3_b[...], eps)
    x = x + _linear(_linear(h, ffw1[...], ffb1[...], relu=True), ffw2[...], ffb2[...])

    if final_ln:                                  # ModelDecoder's trailing LayerNorm
        x = _layer_norm(x, lnf_g[...], lnf_b[...], eps)

    o_ref[...] = x.astype(o_ref.dtype)


# ----------------------------- pallas_call wrappers ---------------------------

def _full_specs(arrays):
    # every operand is a single full-array (2-D) block; grid=(1,)
    return [pl.BlockSpec(a.shape, lambda i, n=a.ndim: (0,) * n) for a in arrays]


def embed(tgt2d, w, b, pe2d, d_model):
    M = tgt2d.shape[0]
    inputs = [tgt2d, w, b, pe2d]
    return pl.pallas_call(
        functools.partial(_embed_kernel, scale=math.sqrt(d_model)),
        out_shape=jax.ShapeDtypeStruct((M, d_model), jnp.float32),
        grid=(1,),
        in_specs=_full_specs(inputs),
        out_specs=pl.BlockSpec((M, d_model), lambda i: (0, 0)),
        compiler_params=pltpu.CompilerParams(dimension_semantics=("arbitrary",)),
    )(*inputs)


def decoder_layer(x2d, enc2d, lp, *, nhead, B, Sq, Sk, eps=LN_EPS,
                  causal_self=True, final_ln_params=None):
    D = x2d.shape[-1]
    dk = D // nhead
    # Fuse the self-attention Q and K projections into one (D, 2D) matmul
    # (query == key == value == the LN1 output), and skip the V projection
    # entirely (module bug: v = w_k(value)).
    wqk1 = jnp.concatenate([lp["mha1"]["wq"], lp["mha1"]["wk"]], axis=1)
    bqk1 = jnp.concatenate([lp["mha1"]["bq"], lp["mha1"]["bk"]], axis=1)
    inputs = [x2d, enc2d,
              lp["ln1_g"], lp["ln1_b"], wqk1, bqk1,
              lp["mha1"]["wo"], lp["mha1"]["bo"],
              lp["ln2_g"], lp["ln2_b"],
              lp["mha2"]["wq"], lp["mha2"]["bq"],
              lp["mha2"]["wk"], lp["mha2"]["bk"],
              lp["mha2"]["wo"], lp["mha2"]["bo"],
              lp["ln3_g"], lp["ln3_b"],
              lp["ff_w1"], lp["ff_b1"], lp["ff_w2"], lp["ff_b2"]]
    final_ln = final_ln_params is not None
    if final_ln:
        inputs += [final_ln_params[0], final_ln_params[1]]
    kernel = functools.partial(_decoder_layer_kernel, B=B, Sq=Sq, Sk=Sk,
                               H=nhead, dk=dk, eps=eps,
                               causal_self=causal_self, final_ln=final_ln)
    return pl.pallas_call(
        kernel,
        out_shape=jax.ShapeDtypeStruct((B * Sq, D), jnp.float32),
        grid=(1,),
        in_specs=_full_specs(inputs),
        out_specs=pl.BlockSpec((B * Sq, D), lambda i: (0, 0)),
        compiler_params=pltpu.CompilerParams(dimension_semantics=("arbitrary",)),
    )(*inputs)


# ------------------------- parameter initialization -------------------------

def init_linear_params(key, in_dim, out_dim):
    # matches nn.Linear default init: U(-1/sqrt(in), 1/sqrt(in))
    k1, k2 = jax.random.split(key)
    bound = 1.0 / math.sqrt(in_dim)
    w = jax.random.uniform(k1, (in_dim, out_dim), jnp.float32, -bound, bound)
    b = jax.random.uniform(k2, (1, out_dim), jnp.float32, -bound, bound)
    return w, b


def init_mha_params(key, d_model):
    ks = jax.random.split(key, 4)
    wq, bq = init_linear_params(ks[0], d_model, d_model)
    wk, bk = init_linear_params(ks[1], d_model, d_model)
    wv, bv = init_linear_params(ks[2], d_model, d_model)   # allocated but unused (source bug)
    wo, bo = init_linear_params(ks[3], d_model, d_model)
    return dict(wq=wq, bq=bq, wk=wk, bk=bk, wv=wv, bv=bv, wo=wo, bo=bo)


def init_decoder_layer_params(key, d_model, d_ff):
    ks = jax.random.split(key, 4)
    w1, b1 = init_linear_params(ks[2], d_model, d_ff)
    w2, b2 = init_linear_params(ks[3], d_ff, d_model)
    ones = jnp.ones((1, d_model), jnp.float32)
    zeros = jnp.zeros((1, d_model), jnp.float32)
    return dict(
        mha1=init_mha_params(ks[0], d_model),
        mha2=init_mha_params(ks[1], d_model),
        ff_w1=w1, ff_b1=b1, ff_w2=w2, ff_b2=b2,
        ln1_g=ones, ln1_b=zeros,
        ln2_g=ones, ln2_b=zeros,
        ln3_g=ones, ln3_b=zeros,
    )


def make_positional_encoding(max_len, d_model):
    pos = jnp.arange(max_len, dtype=jnp.float32)[:, None]
    div = jnp.exp(jnp.arange(0, d_model, 2, dtype=jnp.float32)
                  * (-math.log(10000.0) / d_model))
    pe = jnp.zeros((max_len, d_model), jnp.float32)
    pe = pe.at[:, 0::2].set(jnp.sin(pos * div))
    pe = pe.at[:, 1::2].set(jnp.cos(pos * div))
    return pe


def init_model_decoder_params(key, input_dim, d_model, d_ff, nlayers, max_len):
    ks = jax.random.split(key, nlayers + 1)
    emb_w, emb_b = init_linear_params(ks[0], input_dim, d_model)
    layers = [init_decoder_layer_params(ks[i + 1], d_model, d_ff)
              for i in range(nlayers)]
    return dict(
        emb_w=emb_w, emb_b=emb_b,
        pe=make_positional_encoding(max_len, d_model),
        layers=layers,
        ln_f_g=jnp.ones((1, d_model), jnp.float32),
        ln_f_b=jnp.zeros((1, d_model), jnp.float32),
    )


# ------------------------------ forward glue --------------------------------

def _model_decoder_forward(params, tgt, src, *, d_model, nhead, causal_tgt_mask=True):
    B, S, in_dim = tgt.shape
    Sk = src.shape[1]
    # positional encoding broadcast to the flattened (B*S, D) layout once, outside kernels
    pe_b = jnp.broadcast_to(params["pe"][:S][None, :, :],
                            (B, S, d_model)).reshape(B * S, d_model)
    # Embedding * sqrt(d_model) + PE add fused into one kernel; dropout = identity.
    x2d = embed(tgt.reshape(B * S, in_dim), params["emb_w"], params["emb_b"],
                pe_b, d_model)
    enc2d = src.reshape(B * Sk, d_model)
    n = len(params["layers"])
    for i, lp in enumerate(params["layers"]):
        fl = (params["ln_f_g"], params["ln_f_b"]) if i == n - 1 else None
        x2d = decoder_layer(x2d, enc2d, lp, nhead=nhead, B=B, Sq=S, Sk=Sk,
                            causal_self=causal_tgt_mask, final_ln_params=fl)
    return x2d.reshape(B, S, d_model)


model_decoder_forward = jax.jit(
    _model_decoder_forward,
    static_argnames=("d_model", "nhead", "causal_tgt_mask"))


# ----------------------------------- main ------------------------------------

if __name__ == "__main__":
    # small shapes consistent with the module's args
    B, tgt_len, src_len = 2, 8, 12
    input_dim, d_model, nhead, d_ff, nlayers, max_len = 4, 32, 4, 64, 2, 64

    key = jax.random.PRNGKey(0)
    k_param, k_tgt, k_src = jax.random.split(key, 3)

    params = init_model_decoder_params(k_param, input_dim, d_model, d_ff,
                                       nlayers, max_len)

    tgt = jax.random.normal(k_tgt, (B, tgt_len, input_dim), jnp.float32)
    src = jax.random.normal(k_src, (B, src_len, d_model), jnp.float32)  # encoder output
    # tgt_mask (causal) is generated inside the kernel via iota; src_mask = None.

    out = model_decoder_forward(params, tgt, src, d_model=d_model, nhead=nhead,
                                causal_tgt_mask=True)
    out = jax.block_until_ready(out)
    assert out.shape == (B, tgt_len, d_model)
    assert bool(jnp.all(jnp.isfinite(out)))
    print("KERNEL_OK")
</pallas_src>

<mosaic_0001>
module attributes {stable_mosaic.version = 11 : i64} {
  func.func @_embed_kernel(%arg0: i32, %arg1: memref<16x4xf32, #tpu.memory_space<vmem>>, %arg2: memref<4x32xf32, #tpu.memory_space<vmem>>, %arg3: memref<1x32xf32, #tpu.memory_space<vmem>>, %arg4: memref<16x32xf32, #tpu.memory_space<vmem>>, %arg5: memref<16x32xf32, #tpu.memory_space<vmem>>) attributes {dimension_semantics = [#tpu.dimension_semantics<arbitrary>], iteration_bounds = array<i64: 1>, scalar_prefetch = 0 : i64, scratch_operands = 0 : i64, tpu.core_type = #tpu.core_type<tc>, window_params = [{pipeline_mode = #tpu.pipeline_mode<synchronous>, transform_indices = @transform_0, window_bounds = array<i64: 16, 4>}, {pipeline_mode = #tpu.pipeline_mode<synchronous>, transform_indices = @transform_1, window_bounds = array<i64: 4, 32>}, {pipeline_mode = #tpu.pipeline_mode<synchronous>, transform_indices = @transform_2, window_bounds = array<i64: 1, 32>}, {pipeline_mode = #tpu.pipeline_mode<synchronous>, transform_indices = @transform_3, window_bounds = array<i64: 16, 32>}, {pipeline_mode = #tpu.pipeline_mode<synchronous>, transform_indices = @transform_4, window_bounds = array<i64: 16, 32>}]} {
    %c0 = arith.constant 0 : index
    %c0_0 = arith.constant 0 : index
    %0 = vector.load %arg1[%c0, %c0_0] : memref<16x4xf32, #tpu.memory_space<vmem>>, vector<16x4xf32>
    %c0_1 = arith.constant 0 : index
    %c0_2 = arith.constant 0 : index
    %1 = vector.load %arg2[%c0_1, %c0_2] : memref<4x32xf32, #tpu.memory_space<vmem>>, vector<4x32xf32>
    %cst = arith.constant dense<0.000000e+00> : vector<16x32xf32>
    %2 = tpu.matmul %0, %1, %cst {dimension_numbers = #tpu.dot_dimension_numbers<[1], [0], [0], [1], [0, 0, 1, 1], [], []>} : vector<16x4xf32>, vector<4x32xf32>, vector<16x32xf32> -> vector<16x32xf32>
    %c0_3 = arith.constant 0 : index
    %c0_4 = arith.constant 0 : index
    %3 = vector.load %arg3[%c0_3, %c0_4] : memref<1x32xf32, #tpu.memory_space<vmem>>, vector<1x32xf32>
    %4 = vector.broadcast %3 : vector<1x32xf32> to vector<16x32xf32>
    %5 = arith.addf %2, %4 : vector<16x32xf32>
    %cst_5 = arith.constant 5.65685415 : f32
    %6 = vector.broadcast %cst_5 : f32 to vector<16x32xf32>
    %7 = arith.mulf %5, %6 : vector<16x32xf32>
    %c0_6 = arith.constant 0 : index
    %c0_7 = arith.constant 0 : index
    %8 = vector.load %arg4[%c0_6, %c0_7] : memref<16x32xf32, #tpu.memory_space<vmem>>, vector<16x32xf32>
    %9 = arith.addf %7, %8 : vector<16x32xf32>
    %c0_8 = arith.constant 0 : index
    %c0_9 = arith.constant 0 : index
    %10 = vector.load %arg5[%c0_8, %c0_9] : memref<16x32xf32, #tpu.memory_space<vmem>>, vector<16x32xf32>
    tpu.vector_store %arg5[%c0_8, %c0_9], %9 {strides = array<i32>} : memref<16x32xf32, #tpu.memory_space<vmem>>, vector<16x32xf32>,
    return
  }
  func.func @transform_0(%arg0: i32) -> (i32, i32) {
    %c0_i32 = arith.constant 0 : i32
    %c0_i32_0 = arith.constant 0 : i32
    %c0_i32_1 = arith.constant 0 : i32
    return %c0_i32, %c0_i32_0 : i32, i32
  }
  func.func @transform_1(%arg0: i32) -> (i32, i32) {
    %c0_i32 = arith.constant 0 : i32
    %c0_i32_0 = arith.constant 0 : i32
    %c0_i32_1 = arith.constant 0 : i32
    return %c0_i32, %c0_i32_0 : i32, i32
  }
  func.func @transform_2(%arg0: i32) -> (i32, i32) {
    %c0_i32 = arith.constant 0 : i32
    %c0_i32_0 = arith.constant 0 : i32
    %c0_i32_1 = arith.constant 0 : i32
    return %c0_i32, %c0_i32_0 : i32, i32
  }
  func.func @transform_3(%arg0: i32) -> (i32, i32) {
    %c0_i32 = arith.constant 0 : i32
    %c0_i32_0 = arith.constant 0 : i32
    %c0_i32_1 = arith.constant 0 : i32
    return %c0_i32, %c0_i32_0 : i32, i32
  }
  func.func @transform_4(%arg0: i32) -> (i32, i32) {
    %c0_i32 = arith.constant 0 : i32
    %c0_i32_0 = arith.constant 0 : i32
    %c0_i32_1 = arith.constant 0 : i32
    return %c0_i32, %c0_i32_0 : i32, i32
  }
}

module attributes {stable_mosaic.version = 11 : i64} {
  func.func @_decoder_layer_kernel(%arg0: i32, %arg1: memref<16x32xf32, #tpu.memory_space<vmem>>, %arg2: memref<24x32xf32, #tpu.memory_space<vmem>>, %arg3: memref<1x32xf32, #tpu.memory_space<vmem>>, %arg4: memref<1x32xf32, #tpu.memory_space<vmem>>, %arg5: memref<32x64xf32, #tpu.memory_space<vmem>>, %arg6: memref<1x64xf32, #tpu.memory_space<vmem>>, %arg7: memref<32x32xf32, #tpu.memory_space<vmem>>, %arg8: memref<1x32xf32, #tpu.memory_space<vmem>>, %arg9: memref<1x32xf32, #tpu.memory_space<vmem>>, %arg10: memref<1x32xf32, #tpu.memory_space<vmem>>, %arg11: memref<32x32xf32, #tpu.memory_space<vmem>>, %arg12: memref<1x32xf32, #tpu.memory_space<vmem>>, %arg13: memref<32x32xf32, #tpu.memory_space<vmem>>, %arg14: memref<1x32xf32, #tpu.memory_space<vmem>>, %arg15: memref<32x32xf32, #tpu.memory_space<vmem>>, %arg16: memref<1x32xf32, #tpu.memory_space<vmem>>, %arg17: memref<1x32xf32, #tpu.memory_space<vmem>>, %arg18: memref<1x32xf32, #tpu.memory_space<vmem>>, %arg19: memref<32x64xf32, #tpu.memory_space<vmem>>, %arg20: memref<1x64xf32, #tpu.memory_space<vmem>>, %arg21: memref<64x32xf32, #tpu.memory_space<vmem>>, %arg22: memref<1x32xf32, #tpu.memory_space<vmem>>, %arg23: memref<16x32xf32, #tpu.memory_space<vmem>>) attributes {dimension_semantics = [#tpu.dimension_semantics<arbitrary>], iteration_bounds = array<i64: 1>, scalar_prefetch = 0 : i64, scratch_operands = 0 : i64, tpu.core_type = #tpu.core_type<tc>, window_params = [{pipeline_mode = #tpu.pipeline_mode<synchronous>, transform_indices = @transform_0, window_bounds = array<i64: 16, 32>}, {pipeline_mode = #tpu.pipeline_mode<synchronous>, transform_indices = @transform_1, window_bounds = array<i64: 24, 32>}, {pipeline_mode = #tpu.pipeline_mode<synchronous>, transform_indices = @transform_2, window_bounds = array<i64: 1, 32>}, {pipeline_mode = #tpu.pipeline_mode<synchronous>, transform_indices = @transform_3, window_bounds = array<i64: 1, 32>}, {pipeline_mode = #tpu.pipeline_mode<synchronous>, transform_indices = @transform_4, window_bounds = array<i64: 32, 64>}, {pipeline_mode = #tpu.pipeline_mode<synchronous>, transform_indices = @transform_5, window_bounds = array<i64: 1, 64>}, {pipeline_mode = #tpu.pipeline_mode<synchronous>, transform_indices = @transform_6, window_bounds = array<i64: 32, 32>}, {pipeline_mode = #tpu.pipeline_mode<synchronous>, transform_indices = @transform_7, window_bounds = array<i64: 1, 32>}, {pipeline_mode = #tpu.pipeline_mode<synchronous>, transform_indices = @transform_8, window_bounds = array<i64: 1, 32>}, {pipeline_mode = #tpu.pipeline_mode<synchronous>, transform_indices = @transform_9, window_bounds = array<i64: 1, 32>}, {pipeline_mode = #tpu.pipeline_mode<synchronous>, transform_indices = @transform_10, window_bounds = array<i64: 32, 32>}, {pipeline_mode = #tpu.pipeline_mode<synchronous>, transform_indices = @transform_11, window_bounds = array<i64: 1, 32>}, {pipeline_mode = #tpu.pipeline_mode<synchronous>, transform_indices = @transform_12, window_bounds = array<i64: 32, 32>}, {pipeline_mode = #tpu.pipeline_mode<synchronous>, transform_indices = @transform_13, window_bounds = array<i64: 1, 32>}, {pipeline_mode = #tpu.pipeline_mode<synchronous>, transform_indices = @transform_14, window_bounds = array<i64: 32, 32>}, {pipeline_mode = #tpu.pipeline_mode<synchronous>, transform_indices = @transform_15, window_bounds = array<i64: 1, 32>}, {pipeline_mode = #tpu.pipeline_mode<synchronous>, transform_indices = @transform_16, window_bounds = array<i64: 1, 32>}, {pipeline_mode = #tpu.pipeline_mode<synchronous>, transform_indices = @transform_17, window_bounds = array<i64: 1, 32>}, {pipeline_mode = #tpu.pipeline_mode<synchronous>, transform_indices = @transform_18, window_bounds = array<i64: 32, 64>}, {pipeline_mode = #tpu.pipeline_mode<synchronous>, transform_indices = @transform_19, window_bounds = array<i64: 1, 64>}, {pipeline_mode = #tpu.pipeline_mode<synchronous>, transform_indices = @transform_20, window_bounds = array<i64: 64, 32>}, {pipeline_mode = #tpu.pipeline_mode<synchronous>, transform_indices = @transform_21, window_bounds = array<i64: 1, 32>}, {pipeline_mode = #tpu.pipeline_mode<synchronous>, transform_indices = @transform_22, window_bounds = array<i64: 16, 32>}]} {
    %c0 = arith.constant 0 : index
    %c0_0 = arith.constant 0 : index
    %0 = vector.load %arg1[%c0, %c0_0] : memref<16x32xf32, #tpu.memory_space<vmem>>, vector<16x32xf32>
    %c0_1 = arith.constant 0 : index
    %c0_2 = arith.constant 0 : index
    %1 = vector.load %arg2[%c0_1, %c0_2] : memref<24x32xf32, #tpu.memory_space<vmem>>, vector<24x32xf32>
    %c0_3 = arith.constant 0 : index
    %c0_4 = arith.constant 0 : index
    %2 = vector.load %arg3[%c0_3, %c0_4] : memref<1x32xf32, #tpu.memory_space<vmem>>, vector<1x32xf32>
    %c0_5 = arith.constant 0 : index
    %c0_6 = arith.constant 0 : index
    %3 = vector.load %arg4[%c0_5, %c0_6] : memref<1x32xf32, #tpu.memory_space<vmem>>, vector<1x32xf32>
    %cst = arith.constant dense<0.000000e+00> : vector<16xf32>
    %4 = vector.multi_reduction <add>, %0, %cst [1] : vector<16x32xf32> to vector<16xf32>
    %5 = vector.shape_cast %4 : vector<16xf32> to vector<16x1xf32>
    %cst_7 = arith.constant 3.200000e+01 : f32
    %6 = vector.broadcast %cst_7 : f32 to vector<16x1xf32>
    %7 = arith.divf %5, %6 : vector<16x1xf32>
    %8 = vector.broadcast %7 : vector<16x1xf32> to vector<16x32xf32>
    %9 = arith.subf %0, %8 : vector<16x32xf32>
    %10 = arith.mulf %9, %9 : vector<16x32xf32>
    %cst_8 = arith.constant dense<0.000000e+00> : vector<16xf32>
    %11 = vector.multi_reduction <add>, %10, %cst_8 [1] : vector<16x32xf32> to vector<16xf32>
    %12 = vector.shape_cast %11 : vector<16xf32> to vector<16x1xf32>
    %cst_9 = arith.constant 3.100000e+01 : f32
    %13 = vector.broadcast %cst_9 : f32 to vector<16x1xf32>
    %14 = arith.divf %12, %13 : vector<16x1xf32>
    %15 = math.sqrt %14 : vector<16x1xf32>
    %cst_10 = arith.constant 9.99999997E-7 : f32
    %16 = vector.broadcast %cst_10 : f32 to vector<16x1xf32>
    %17 = arith.addf %15, %16 : vector<16x1xf32>
    %18 = vector.broadcast %17 : vector<16x1xf32> to vector<16x32xf32>
    %19 = arith.divf %9, %18 : vector<16x32xf32>
    %20 = vector.broadcast %2 : vector<1x32xf32> to vector<16x32xf32>
    %21 = arith.mulf %20, %19 : vector<16x32xf32>
    %22 = vector.broadcast %3 : vector<1x32xf32> to vector<16x32xf32>
    %23 = arith.addf %21, %22 : vector<16x32xf32>
    %c0_11 = arith.constant 0 : index
    %c0_12 = arith.constant 0 : index
    %24 = vector.load %arg5[%c0_11, %c0_12] : memref<32x64xf32, #tpu.memory_space<vmem>>, vector<32x64xf32>
    %c0_13 = arith.constant 0 : index
    %c0_14 = arith.constant 0 : index
    %25 = vector.load %arg6[%c0_13, %c0_14] : memref<1x64xf32, #tpu.memory_space<vmem>>, vector<1x64xf32>
    %cst_15 = arith.constant dense<0.000000e+00> : vector<16x64xf32>
    %26 = tpu.matmul %23, %24, %cst_15 {dimension_numbers = #tpu.dot_dimension_numbers<[1], [0], [0], [1], [0, 0, 1, 1], [], []>} : vector<16x32xf32>, vector<32x64xf32>, vector<16x64xf32> -> vector<16x64xf32>
    %27 = vector.broadcast %25 : vector<1x64xf32> to vector<16x64xf32>
    %28 = arith.addf %26, %27 : vector<16x64xf32>
    %29 = vector.extract_strided_slice %28 {offsets = [0, 0], sizes = [16, 32], strides = [1, 1]} : vector<16x64xf32> to vector<16x32xf32>
    %30 = vector.extract_strided_slice %28 {offsets = [0, 32], sizes = [16, 32], strides = [1, 1]} : vector<16x64xf32> to vector<16x32xf32>
    %31 = vector.shape_cast %29 : vector<16x32xf32> to vector<2x8x32xf32>
    %32 = vector.shape_cast %30 : vector<16x32xf32> to vector<2x8x32xf32>
    %33 = tpu.iota {dimensions = array<i32: 0>} : vector<8x8xi32>
    %34 = tpu.iota {dimensions = array<i32: 1>} : vector<8x8xi32>
    %35 = arith.cmpi sge, %33, %34 : vector<8x8xi32>
    %36 = vector.shape_cast %35 : vector<8x8xi1> to vector<1x8x8xi1>
    %37 = vector.extract_strided_slice %31 {offsets = [0, 0, 0], sizes = [2, 8, 8], strides = [1, 1, 1]} : vector<2x8x32xf32> to vector<2x8x8xf32>
    %38 = vector.extract_strided_slice %32 {offsets = [0, 0, 0], sizes = [2, 8, 8], strides = [1, 1, 1]} : vector<2x8x32xf32> to vector<2x8x8xf32>
    "tpu.trace_start"() <{level = 10 : i32, message = "bqd,bkd->bqk"}> : () -> ()
    %cst_16 = arith.constant dense<0.000000e+00> : vector<2x8x8xf32>
    %39 = tpu.matmul %37, %38, %cst_16 {dimension_numbers = #tpu.dot_dimension_numbers<[2], [2], [1], [1], [0, 0, 0, 1, 1, 1], [0], [0]>} : vector<2x8x8xf32>, vector<2x8x8xf32>, vector<2x8x8xf32> -> vector<2x8x8xf32>
    "tpu.trace_stop"() : () -> ()
    %cst_17 = arith.constant 0.353553385 : f32
    %40 = vector.broadcast %cst_17 : f32 to vector<2x8x8xf32>
    %41 = arith.mulf %39, %40 : vector<2x8x8xf32>
    %cst_18 = arith.constant -1.000000e+30 : f32
    %42 = vector.shape_cast %36 : vector<1x8x8xi1> to vector<1x8x8xi1>
    %43 = vector.broadcast %42 : vector<1x8x8xi1> to vector<2x8x8xi1>
    %44 = vector.broadcast %cst_18 : f32 to vector<2x8x8xf32>
    %45 = arith.select %43, %41, %44 : vector<2x8x8xi1>, vector<2x8x8xf32>
    %cst_19 = arith.constant dense<0xFF800000> : vector<2x8xf32>
    %46 = vector.multi_reduction <maximumf>, %45, %cst_19 [2] : vector<2x8x8xf32> to vector<2x8xf32>
    %47 = vector.shape_cast %46 : vector<2x8xf32> to vector<2x8x1xf32>
    %48 = vector.broadcast %47 : vector<2x8x1xf32> to vector<2x8x8xf32>
    %49 = arith.subf %45, %48 : vector<2x8x8xf32>
    %50 = math.exp %49 : vector<2x8x8xf32>
    %cst_20 = arith.constant dense<0.000000e+00> : vector<2x8xf32>
    %51 = vector.multi_reduction <add>, %50, %cst_20 [2] : vector<2x8x8xf32> to vector<2x8xf32>
    %52 = vector.shape_cast %51 : vector<2x8xf32> to vector<2x8x1xf32>
    %53 = tpu.reciprocal %52 {approx = true} : vector<2x8x1xf32> -> vector<2x8x1xf32>
    %54 = vector.broadcast %53 : vector<2x8x1xf32> to vector<2x8x8xf32>
    %55 = arith.mulf %50, %54 : vector<2x8x8xf32>
    "tpu.trace_start"() <{level = 10 : i32, message = "bqk,bkd->bqd"}> : () -> ()
    %cst_21 = arith.constant dense<0.000000e+00> : vector<2x8x8xf32>
    %56 = tpu.matmul %55, %38, %cst_21 {dimension_numbers = #tpu.dot_dimension_numbers<[2], [1], [1], [2], [0, 0, 0, 1, 1, 2], [0], [0]>} : vector<2x8x8xf32>, vector<2x8x8xf32>, vector<2x8x8xf32> -> vector<2x8x8xf32>
    "tpu.trace_stop"() : () -> ()
    %57 = vector.extract_strided_slice %31 {offsets = [0, 0, 8], sizes = [2, 8, 8], strides = [1, 1, 1]} : vector<2x8x32xf32> to vector<2x8x8xf32>
    %58 = vector.extract_strided_slice %32 {offsets = [0, 0, 8], sizes = [2, 8, 8], strides = [1, 1, 1]} : vector<2x8x32xf32> to vector<2x8x8xf32>
    "tpu.trace_start"() <{level = 10 : i32, message = "bqd,bkd->bqk"}> : () -> ()
    %cst_22 = arith.constant dense<0.000000e+00> : vector<2x8x8xf32>
    %59 = tpu.matmul %57, %58, %cst_22 {dimension_numbers = #tpu.dot_dimension_numbers<[2], [2], [1], [1], [0, 0, 0, 1, 1, 1], [0], [0]>} : vector<2x8x8xf32>, vector<2x8x8xf32>, vector<2x8x8xf32> -> vector<2x8x8xf32>
    "tpu.trace_stop"() : () -> ()
    %cst_23 = arith.constant 0.353553385 : f32
    %60 = vector.broadcast %cst_23 : f32 to vector<2x8x8xf32>
    %61 = arith.mulf %59, %60 : vector<2x8x8xf32>
    %cst_24 = arith.constant -1.000000e+30 : f32
    %62 = vector.shape_cast %36 : vector<1x8x8xi1> to vector<1x8x8xi1>
    %63 = vector.broadcast %62 : vector<1x8x8xi1> to vector<2x8x8xi1>
    %64 = vector.broadcast %cst_24 : f32 to vector<2x8x8xf32>
    %65 = arith.select %63, %61, %64 : vector<2x8x8xi1>, vector<2x8x8xf32>
    %cst_25 = arith.constant dense<0xFF800000> : vector<2x8xf32>
    %66 = vector.multi_reduction <maximumf>, %65, %cst_25 [2] : vector<2x8x8xf32> to vector<2x8xf32>
    %67 = vector.shape_cast %66 : vector<2x8xf32> to vector<2x8x1xf32>
    %68 = vector.broadcast %67 : vector<2x8x1xf32> to vector<2x8x8xf32>
    %69 = arith.subf %65, %68 : vector<2x8x8xf32>
    %70 = math.exp %69 : vector<2x8x8xf32>
    %cst_26 = arith.constant dense<0.000000e+00> : vector<2x8xf32>
    %71 = vector.multi_reduction <add>, %70, %cst_26 [2] : vector<2x8x8xf32> to vector<2x8xf32>
    %72 = vector.shape_cast %71 : vector<2x8xf32> to vector<2x8x1xf32>
    %73 = tpu.reciprocal %72 {approx = true} : vector<2x8x1xf32> -> vector<2x8x1xf32>
    %74 = vector.broadcast %73 : vector<2x8x1xf32> to vector<2x8x8xf32>
    %75 = arith.mulf %70, %74 : vector<2x8x8xf32>
    "tpu.trace_start"() <{level = 10 : i32, message = "bqk,bkd->bqd"}> : () -> ()
    %cst_27 = arith.constant dense<0.000000e+00> : vector<2x8x8xf32>
    %76 = tpu.matmul %75, %58, %cst_27 {dimension_numbers = #tpu.dot_dimension_numbers<[2], [1], [1], [2], [0, 0, 0, 1, 1, 2], [0], [0]>} : vector<2x8x8xf32>, vector<2x8x8xf32>, vector<2x8x8xf32> -> vector<2x8x8xf32>
    "tpu.trace_stop"() : () -> ()
    %77 = vector.extract_strided_slice %31 {offsets = [0, 0, 16], sizes = [2, 8, 8], strides = [1, 1, 1]} : vector<2x8x32xf32> to vector<2x8x8xf32>
    %78 = vector.extract_strided_slice %32 {offsets = [0, 0, 16], sizes = [2, 8, 8], strides = [1, 1, 1]} : vector<2x8x32xf32> to vector<2x8x8xf32>
    "tpu.trace_start"() <{level = 10 : i32, message = "bqd,bkd->bqk"}> : () -> ()
    %cst_28 = arith.constant dense<0.000000e+00> : vector<2x8x8xf32>
    %79 = tpu.matmul %77, %78, %cst_28 {dimension_numbers = #tpu.dot_dimension_numbers<[2], [2], [1], [1], [0, 0, 0, 1, 1, 1], [0], [0]>} : vector<2x8x8xf32>, vector<2x8x8xf32>, vector<2x8x8xf32> -> vector<2x8x8xf32>
    "tpu.trace_stop"() : () -> ()
    %cst_29 = arith.constant 0.353553385 : f32
    %80 = vector.broadcast %cst_29 : f32 to vector<2x8x8xf32>
    %81 = arith.mulf %79, %80 : vector<2x8x8xf32>
    %cst_30 = arith.constant -1.000000e+30 : f32
    %82 = vector.shape_cast %36 : vector<1x8x8xi1> to vector<1x8x8xi1>
    %83 = vector.broadcast %82 : vector<1x8x8xi1> to vector<2x8x8xi1>
    %84 = vector.broadcast %cst_30 : f32 to vector<2x8x8xf32>
    %85 = arith.select %83, %81, %84 : vector<2x8x8xi1>, vector<2x8x8xf32>
    %cst_31 = arith.constant dense<0xFF800000> : vector<2x8xf32>
    %86 = vector.multi_reduction <maximumf>, %85, %cst_31 [2] : vector<2x8x8xf32> to vector<2x8xf32>
    %87 = vector.shape_cast %86 : vector<2x8xf32> to vector<2x8x1xf32>
    %88 = vector.broadcast %87 : vector<2x8x1xf32> to vector<2x8x8xf32>
    %89 = arith.subf %85, %88 : vector<2x8x8xf32>
    %90 = math.exp %89 : vector<2x8x8xf32>
    %cst_32 = arith.constant dense<0.000000e+00> : vector<2x8xf32>
    %91 = vector.multi_reduction <add>, %90, %cst_32 [2] : vector<2x8x8xf32> to vector<2x8xf32>
    %92 = vector.shape_cast %91 : vector<2x8xf32> to vector<2x8x1xf32>
    %93 = tpu.reciprocal %92 {approx = true} : vector<2x8x1xf32> -> vector<2x8x1xf32>
    %94 = vector.broadcast %93 : vector<2x8x1xf32> to vector<2x8x8xf32>
    %95 = arith.mulf %90, %94 : vector<2x8x8xf32>
    "tpu.trace_start"() <{level = 10 : i32, message = "bqk,bkd->bqd"}> : () -> ()
    %cst_33 = arith.constant dense<0.000000e+00> : vector<2x8x8xf32>
    %96 = tpu.matmul %95, %78, %cst_33 {dimension_numbers = #tpu.dot_dimension_numbers<[2], [1], [1], [2], [0, 0, 0, 1, 1, 2], [0], [0]>} : vector<2x8x8xf32>, vector<2x8x8xf32>, vector<2x8x8xf32> -> vector<2x8x8xf32>
    "tpu.trace_stop"() : () -> ()
    %97 = vector.extract_strided_slice %31 {offsets = [0, 0, 24], sizes = [2, 8, 8], strides = [1, 1, 1]} : vector<2x8x32xf32> to vector<2x8x8xf32>
    %98 = vector.extract_strided_slice %32 {offsets = [0, 0, 24], sizes = [2, 8, 8], strides = [1, 1, 1]} : vector<2x8x32xf32> to vector<2x8x8xf32>
    "tpu.trace_start"() <{level = 10 : i32, message = "bqd,bkd->bqk"}> : () -> ()
    %cst_34 = arith.constant dense<0.000000e+00> : vector<2x8x8xf32>
    %99 = tpu.matmul %97, %98, %cst_34 {dimension_numbers = #tpu.dot_dimension_numbers<[2], [2], [1], [1], [0, 0, 0, 1, 1, 1], [0], [0]>} : vector<2x8x8xf32>, vector<2x8x8xf32>, vector<2x8x8xf32> -> vector<2x8x8xf32>
    "tpu.trace_stop"() : () -> ()
    %cst_35 = arith.constant 0.353553385 : f32
    %100 = vector.broadcast %cst_35 : f32 to vector<2x8x8xf32>
    %101 = arith.mulf %99, %100 : vector<2x8x8xf32>
    %cst_36 = arith.constant -1.000000e+30 : f32
    %102 = vector.shape_cast %36 : vector<1x8x8xi1> to vector<1x8x8xi1>
    %103 = vector.broadcast %102 : vector<1x8x8xi1> to vector<2x8x8xi1>
    %104 = vector.broadcast %cst_36 : f32 to vector<2x8x8xf32>
    %105 = arith.select %103, %101, %104 : vector<2x8x8xi1>, vector<2x8x8xf32>
    %cst_37 = arith.constant dense<0xFF800000> : vector<2x8xf32>
    %106 = vector.multi_reduction <maximumf>, %105, %cst_37 [2] : vector<2x8x8xf32> to vector<2x8xf32>
    %107 = vector.shape_cast %106 : vector<2x8xf32> to vector<2x8x1xf32>
    %108 = vector.broadcast %107 : vector<2x8x1xf32> to vector<2x8x8xf32>
    %109 = arith.subf %105, %108 : vector<2x8x8xf32>
    %110 = math.exp %109 : vector<2x8x8xf32>
    %cst_38 = arith.constant dense<0.000000e+00> : vector<2x8xf32>
    %111 = vector.multi_reduction <add>, %110, %cst_38 [2] : vector<2x8x8xf32> to vector<2x8xf32>
    %112 = vector.shape_cast %111 : vector<2x8xf32> to vector<2x8x1xf32>
    %113 = tpu.reciprocal %112 {approx = true} : vector<2x8x1xf32> -> vector<2x8x1xf32>
    %114 = vector.broadcast %113 : vector<2x8x1xf32> to vector<2x8x8xf32>
    %115 = arith.mulf %110, %114 : vector<2x8x8xf32>
    "tpu.trace_start"() <{level = 10 : i32, message = "bqk,bkd->bqd"}> : () -> ()
    %cst_39 = arith.constant dense<0.000000e+00> : vector<2x8x8xf32>
    %116 = tpu.matmul %115, %98, %cst_39 {dimension_numbers = #tpu.dot_dimension_numbers<[2], [1], [1], [2], [0, 0, 0, 1, 1, 2], [0], [0]>} : vector<2x8x8xf32>, vector<2x8x8xf32>, vector<2x8x8xf32> -> vector<2x8x8xf32>
    "tpu.trace_stop"() : () -> ()
    %117 = tpu.concatenate %56, %76, %96, %116 in 2 : vector<2x8x8xf32>, vector<2x8x8xf32>, vector<2x8x8xf32>, vector<2x8x8xf32> -> vector<2x8x32xf32>
    %118 = vector.shape_cast %117 : vector<2x8x32xf32> to vector<16x32xf32>
    %c0_40 = arith.constant 0 : index
    %c0_41 = arith.constant 0 : index
    %119 = vector.load %arg7[%c0_40, %c0_41] : memref<32x32xf32, #tpu.memory_space<vmem>>, vector<32x32xf32>
    %c0_42 = arith.constant 0 : index
    %c0_43 = arith.constant 0 : index
    %120 = vector.load %arg8[%c0_42, %c0_43] : memref<1x32xf32, #tpu.memory_space<vmem>>, vector<1x32xf32>
    %cst_44 = arith.constant dense<0.000000e+00> : vector<16x32xf32>
    %121 = tpu.matmul %118, %119, %cst_44 {dimension_numbers = #tpu.dot_dimension_numbers<[1], [0], [0], [1], [0, 0, 1, 1], [], []>} : vector<16x32xf32>, vector<32x32xf32>, vector<16x32xf32> -> vector<16x32xf32>
    %122 = vector.broadcast %120 : vector<1x32xf32> to vector<16x32xf32>
    %123 = arith.addf %121, %122 : vector<16x32xf32>
    %124 = arith.addf %0, %123 : vector<16x32xf32>
    %c0_45 = arith.constant 0 : index
    %c0_46 = arith.constant 0 : index
    %125 = vector.load %arg9[%c0_45, %c0_46] : memref<1x32xf32, #tpu.memory_space<vmem>>, vector<1x32xf32>
    %c0_47 = arith.constant 0 : index
    %c0_48 = arith.constant 0 : index
    %126 = vector.load %arg10[%c0_47, %c0_48] : memref<1x32xf32, #tpu.memory_space<vmem>>, vector<1x32xf32>
    %cst_49 = arith.constant dense<0.000000e+00> : vector<16xf32>
    %127 = vector.multi_reduction <add>, %124, %cst_49 [1] : vector<16x32xf32> to vector<16xf32>
    %128 = vector.shape_cast %127 : vector<16xf32> to vector<16x1xf32>
    %cst_50 = arith.constant 3.200000e+01 : f32
    %129 = vector.broadcast %cst_50 : f32 to vector<16x1xf32>
    %130 = arith.divf %128, %129 : vector<16x1xf32>
    %131 = vector.broadcast %130 : vector<16x1xf32> to vector<16x32xf32>
    %132 = arith.subf %124, %131 : vector<16x32xf32>
    %133 = arith.mulf %132, %132 : vector<16x32xf32>
    %cst_51 = arith.constant dense<0.000000e+00> : vector<16xf32>
    %134 = vector.multi_reduction <add>, %133, %cst_51 [1] : vector<16x32xf32> to vector<16xf32>
    %135 = vector.shape_cast %134 : vector<16xf32> to vector<16x1xf32>
    %cst_52 = arith.constant 3.100000e+01 : f32
    %136 = vector.broadcast %cst_52 : f32 to vector<16x1xf32>
    %137 = arith.divf %135, %136 : vector<16x1xf32>
    %138 = math.sqrt %137 : vector<16x1xf32>
    %cst_53 = arith.constant 9.99999997E-7 : f32
    %139 = vector.broadcast %cst_53 : f32 to vector<16x1xf32>
    %140 = arith.addf %138, %139 : vector<16x1xf32>
    %141 = vector.broadcast %140 : vector<16x1xf32> to vector<16x32xf32>
    %142 = arith.divf %132, %141 : vector<16x32xf32>
    %143 = vector.broadcast %125 : vector<1x32xf32> to vector<16x32xf32>
    %144 = arith.mulf %143, %142 : vector<16x32xf32>
    %145 = vector.broadcast %126 : vector<1x32xf32> to vector<16x32xf32>
    %146 = arith.addf %144, %145 : vector<16x32xf32>
    %c0_54 = arith.constant 0 : index
    %c0_55 = arith.constant 0 : index
    %147 = vector.load %arg11[%c0_54, %c0_55] : memref<32x32xf32, #tpu.memory_space<vmem>>, vector<32x32xf32>
    %c0_56 = arith.constant 0 : index
    %c0_57 = arith.constant 0 : index
    %148 = vector.load %arg12[%c0_56, %c0_57] : memref<1x32xf32, #tpu.memory_space<vmem>>, vector<1x32xf32>
    %cst_58 = arith.constant dense<0.000000e+00> : vector<16x32xf32>
    %149 = tpu.matmul %146, %147, %cst_58 {dimension_numbers = #tpu.dot_dimension_numbers<[1], [0], [0], [1], [0, 0, 1, 1], [], []>} : vector<16x32xf32>, vector<32x32xf32>, vector<16x32xf32> -> vector<16x32xf32>
    %150 = vector.broadcast %148 : vector<1x32xf32> to vector<16x32xf32>
    %151 = arith.addf %149, %150 : vector<16x32xf32>
    %c0_59 = arith.constant 0 : index
    %c0_60 = arith.constant 0 : index
    %152 = vector.load %arg13[%c0_59, %c0_60] : memref<32x32xf32, #tpu.memory_space<vmem>>, vector<32x32xf32>
    %c0_61 = arith.constant 0 : index
    %c0_62 = arith.constant 0 : index
    %153 = vector.load %arg14[%c0_61, %c0_62] : memref<1x32xf32, #tpu.memory_space<vmem>>, vector<1x32xf32>
    %cst_63 = arith.constant dense<0.000000e+00> : vector<24x32xf32>
    %154 = tpu.matmul %1, %152, %cst_63 {dimension_numbers = #tpu.dot_dimension_numbers<[1], [0], [0], [1], [0, 0, 1, 1], [], []>} : vector<24x32xf32>, vector<32x32xf32>, vector<24x32xf32> -> vector<24x32xf32>
    %155 = vector.broadcast %153 : vector<1x32xf32> to vector<24x32xf32>
    %156 = arith.addf %154, %155 : vector<24x32xf32>
    %157 = vector.shape_cast %151 : vector<16x32xf32> to vector<2x8x32xf32>
    %158 = vector.shape_cast %156 : vector<24x32xf32> to vector<2x12x32xf32>
    %159 = vector.extract_strided_slice %157 {offsets = [0, 0, 0], sizes = [2, 8, 8], strides = [1, 1, 1]} : vector<2x8x32xf32> to vector<2x8x8xf32>
    %160 = vector.extract_strided_slice %158 {offsets = [0, 0, 0], sizes = [2, 12, 8], strides = [1, 1, 1]} : vector<2x12x32xf32> to vector<2x12x8xf32>
    "tpu.trace_start"() <{level = 10 : i32, message = "bqd,bkd->bqk"}> : () -> ()
    %cst_64 = arith.constant dense<0.000000e+00> : vector<2x8x12xf32>
    %161 = tpu.matmul %159, %160, %cst_64 {dimension_numbers = #tpu.dot_dimension_numbers<[2], [2], [1], [1], [0, 0, 0, 1, 1, 1], [0], [0]>} : vector<2x8x8xf32>, vector<2x12x8xf32>, vector<2x8x12xf32> -> vector<2x8x12xf32>
    "tpu.trace_stop"() : () -> ()
    %cst_65 = arith.constant 0.353553385 : f32
    %162 = vector.broadcast %cst_65 : f32 to vector<2x8x12xf32>
    %163 = arith.mulf %161, %162 : vector<2x8x12xf32>
    %cst_66 = arith.constant dense<0xFF800000> : vector<2x8xf32>
    %164 = vector.multi_reduction <maximumf>, %163, %cst_66 [2] : vector<2x8x12xf32> to vector<2x8xf32>
    %165 = vector.shape_cast %164 : vector<2x8xf32> to vector<2x8x1xf32>
    %166 = vector.broadcast %165 : vector<2x8x1xf32> to vector<2x8x12xf32>
    %167 = arith.subf %163, %166 : vector<2x8x12xf32>
    %168 = math.exp %167 : vector<2x8x12xf32>
    %cst_67 = arith.constant dense<0.000000e+00> : vector<2x8xf32>
    %169 = vector.multi_reduction <add>, %168, %cst_67 [2] : vector<2x8x12xf32> to vector<2x8xf32>
    %170 = vector.shape_cast %169 : vector<2x8xf32> to vector<2x8x1xf32>
    %171 = tpu.reciprocal %170 {approx = true} : vector<2x8x1xf32> -> vector<2x8x1xf32>
    %172 = vector.broadcast %171 : vector<2x8x1xf32> to vector<2x8x12xf32>
    %173 = arith.mulf %168, %172 : vector<2x8x12xf32>
    "tpu.trace_start"() <{level = 10 : i32, message = "bqk,bkd->bqd"}> : () -> ()
    %cst_68 = arith.constant dense<0.000000e+00> : vector<2x8x8xf32>
    %174 = tpu.matmul %173, %160, %cst_68 {dimension_numbers = #tpu.dot_dimension_numbers<[2], [1], [1], [2], [0, 0, 0, 1, 1, 2], [0], [0]>} : vector<2x8x12xf32>, vector<2x12x8xf32>, vector<2x8x8xf32> -> vector<2x8x8xf32>
    "tpu.trace_stop"() : () -> ()
    %175 = vector.extract_strided_slice %157 {offsets = [0, 0, 8], sizes = [2, 8, 8], strides = [1, 1, 1]} : vector<2x8x32xf32> to vector<2x8x8xf32>
    %176 = vector.extract_strided_slice %158 {offsets = [0, 0, 8], sizes = [2, 12, 8], strides = [1, 1, 1]} : vector<2x12x32xf32> to vector<2x12x8xf32>
    "tpu.trace_start"() <{level = 10 : i32, message = "bqd,bkd->bqk"}> : () -> ()
    %cst_69 = arith.constant dense<0.000000e+00> : vector<2x8x12xf32>
    %177 = tpu.matmul %175, %176, %cst_69 {dimension_numbers = #tpu.dot_dimension_numbers<[2], [2], [1], [1], [0, 0, 0, 1, 1, 1], [0], [0]>} : vector<2x8x8xf32>, vector<2x12x8xf32>, vector<2x8x12xf32> -> vector<2x8x12xf32>
    "tpu.trace_stop"() : () -> ()
    %cst_70 = arith.constant 0.353553385 : f32
    %178 = vector.broadcast %cst_70 : f32 to vector<2x8x12xf32>
    %179 = arith.mulf %177, %178 : vector<2x8x12xf32>
    %cst_71 = arith.constant dense<0xFF800000> : vector<2x8xf32>
    %180 = vector.multi_reduction <maximumf>, %179, %cst_71 [2] : vector<2x8x12xf32> to vector<2x8xf32>
    %181 = vector.shape_cast %180 : vector<2x8xf32> to vector<2x8x1xf32>
    %182 = vector.broadcast %181 : vector<2x8x1xf32> to vector<2x8x12xf32>
    %183 = arith.subf %179, %182 : vector<2x8x12xf32>
    %184 = math.exp %183 : vector<2x8x12xf32>
    %cst_72 = arith.constant dense<0.000000e+00> : vector<2x8xf32>
    %185 = vector.multi_reduction <add>, %184, %cst_72 [2] : vector<2x8x12xf32> to vector<2x8xf32>
    %186 = vector.shape_cast %185 : vector<2x8xf32> to vector<2x8x1xf32>
    %187 = tpu.reciprocal %186 {approx = true} : vector<2x8x1xf32> -> vector<2x8x1xf32>
    %188 = vector.broadcast %187 : vector<2x8x1xf32> to vector<2x8x12xf32>
    %189 = arith.mulf %184, %188 : vector<2x8x12xf32>
    "tpu.trace_start"() <{level = 10 : i32, message = "bqk,bkd->bqd"}> : () -> ()
    %cst_73 = arith.constant dense<0.000000e+00> : vector<2x8x8xf32>
    %190 = tpu.matmul %189, %176, %cst_73 {dimension_numbers = #tpu.dot_dimension_numbers<[2], [1], [1], [2], [0, 0, 0, 1, 1, 2], [0], [0]>} : vector<2x8x12xf32>, vector<2x12x8xf32>, vector<2x8x8xf32> -> vector<2x8x8xf32>
    "tpu.trace_stop"() : () -> ()
    %191 = vector.extract_strided_slice %157 {offsets = [0, 0, 16], sizes = [2, 8, 8], strides = [1, 1, 1]} : vector<2x8x32xf32> to vector<2x8x8xf32>
    %192 = vector.extract_strided_slice %158 {offsets = [0, 0, 16], sizes = [2, 12, 8], strides = [1, 1, 1]} : vector<2x12x32xf32> to vector<2x12x8xf32>
    "tpu.trace_start"() <{level = 10 : i32, message = "bqd,bkd->bqk"}> : () -> ()
    %cst_74 = arith.constant dense<0.000000e+00> : vector<2x8x12xf32>
    %193 = tpu.matmul %191, %192, %cst_74 {dimension_numbers = #tpu.dot_dimension_numbers<[2], [2], [1], [1], [0, 0, 0, 1, 1, 1], [0], [0]>} : vector<2x8x8xf32>, vector<2x12x8xf32>, vector<2x8x12xf32> -> vector<2x8x12xf32>
    "tpu.trace_stop"() : () -> ()
    %cst_75 = arith.constant 0.353553385 : f32
    %194 = vector.broadcast %cst_75 : f32 to vector<2x8x12xf32>
    %195 = arith.mulf %193, %194 : vector<2x8x12xf32>
    %cst_76 = arith.constant dense<0xFF800000> : vector<2x8xf32>
    %196 = vector.multi_reduction <maximumf>, %195, %cst_76 [2] : vector<2x8x12xf32> to vector<2x8xf32>
    %197 = vector.shape_cast %196 : vector<2x8xf32> to vector<2x8x1xf32>
    %198 = vector.broadcast %197 : vector<2x8x1xf32> to vector<2x8x12xf32>
    %199 = arith.subf %195, %198 : vector<2x8x12xf32>
    %200 = math.exp %199 : vector<2x8x12xf32>
    %cst_77 = arith.constant dense<0.000000e+00> : vector<2x8xf32>
    %201 = vector.multi_reduction <add>, %200, %cst_77 [2] : vector<2x8x12xf32> to vector<2x8xf32>
    %202 = vector.shape_cast %201 : vector<2x8xf32> to vector<2x8x1xf32>
    %203 = tpu.reciprocal %202 {approx = true} : vector<2x8x1xf32> -> vector<2x8x1xf32>
    %204 = vector.broadcast %203 : vector<2x8x1xf32> to vector<2x8x12xf32>
    %205 = arith.mulf %200, %204 : vector<2x8x12xf32>
    "tpu.trace_start"() <{level = 10 : i32, message = "bqk,bkd->bqd"}> : () -> ()
    %cst_78 = arith.constant dense<0.000000e+00> : vector<2x8x8xf32>
    %206 = tpu.matmul %205, %192, %cst_78 {dimension_numbers = #tpu.dot_dimension_numbers<[2], [1], [1], [2], [0, 0, 0, 1, 1, 2], [0], [0]>} : vector<2x8x12xf32>, vector<2x12x8xf32>, vector<2x8x8xf32> -> vector<2x8x8xf32>
    "tpu.trace_stop"() : () -> ()
    %207 = vector.extract_strided_slice %157 {offsets = [0, 0, 24], sizes = [2, 8, 8], strides = [1, 1, 1]} : vector<2x8x32xf32> to vector<2x8x8xf32>
    %208 = vector.extract_strided_slice %158 {offsets = [0, 0, 24], sizes = [2, 12, 8], strides = [1, 1, 1]} : vector<2x12x32xf32> to vector<2x12x8xf32>
    "tpu.trace_start"() <{level = 10 : i32, message = "bqd,bkd->bqk"}> : () -> ()
    %cst_79 = arith.constant dense<0.000000e+00> : vector<2x8x12xf32>
    %209 = tpu.matmul %207, %208, %cst_79 {dimension_numbers = #tpu.dot_dimension_numbers<[2], [2], [1], [1], [0, 0, 0, 1, 1, 1], [0], [0]>} : vector<2x8x8xf32>, vector<2x12x8xf32>, vector<2x8x12xf32> -> vector<2x8x12xf32>
    "tpu.trace_stop"() : () -> ()
    %cst_80 = arith.constant 0.353553385 : f32
    %210 = vector.broadcast %cst_80 : f32 to vector<2x8x12xf32>
    %211 = arith.mulf %209, %210 : vector<2x8x12xf32>
    %cst_81 = arith.constant dense<0xFF800000> : vector<2x8xf32>
    %212 = vector.multi_reduction <maximumf>, %211, %cst_81 [2] : vector<2x8x12xf32> to vector<2x8xf32>
    %213 = vector.shape_cast %212 : vector<2x8xf32> to vector<2x8x1xf32>
    %214 = vector.broadcast %213 : vector<2x8x1xf32> to vector<2x8x12xf32>
    %215 = arith.subf %211, %214 : vector<2x8x12xf32>
    %216 = math.exp %215 : vector<2x8x12xf32>
    %cst_82 = arith.constant dense<0.000000e+00> : vector<2x8xf32>
    %217 = vector.multi_reduction <add>, %216, %cst_82 [2] : vector<2x8x12xf32> to vector<2x8xf32>
    %218 = vector.shape_cast %217 : vector<2x8xf32> to vector<2x8x1xf32>
    %219 = tpu.reciprocal %218 {approx = true} : vector<2x8x1xf32> -> vector<2x8x1xf32>
    %220 = vector.broadcast %219 : vector<2x8x1xf32> to vector<2x8x12xf32>
    %221 = arith.mulf %216, %220 : vector<2x8x12xf32>
    "tpu.trace_start"() <{level = 10 : i32, message = "bqk,bkd->bqd"}> : () -> ()
    %cst_83 = arith.constant dense<0.000000e+00> : vector<2x8x8xf32>
    %222 = tpu.matmul %221, %208, %cst_83 {dimension_numbers = #tpu.dot_dimension_numbers<[2], [1], [1], [2], [0, 0, 0, 1, 1, 2], [0], [0]>} : vector<2x8x12xf32>, vector<2x12x8xf32>, vector<2x8x8xf32> -> vector<2x8x8xf32>
    "tpu.trace_stop"() : () -> ()
    %223 = tpu.concatenate %174, %190, %206, %222 in 2 : vector<2x8x8xf32>, vector<2x8x8xf32>, vector<2x8x8xf32>, vector<2x8x8xf32> -> vector<2x8x32xf32>
    %224 = vector.shape_cast %223 : vector<2x8x32xf32> to vector<16x32xf32>
    %c0_84 = arith.constant 0 : index
    %c0_85 = arith.constant 0 : index
    %225 = vector.load %arg15[%c0_84, %c0_85] : memref<32x32xf32, #tpu.memory_space<vmem>>, vector<32x32xf32>
    %c0_86 = arith.constant 0 : index
    %c0_87 = arith.constant 0 : index
    %226 = vector.load %arg16[%c0_86, %c0_87] : memref<1x32xf32, #tpu.memory_space<vmem>>, vector<1x32xf32>
    %cst_88 = arith.constant dense<0.000000e+00> : vector<16x32xf32>
    %227 = tpu.matmul %224, %225, %cst_88 {dimension_numbers = #tpu.dot_dimension_numbers<[1], [0], [0], [1], [0, 0, 1, 1], [], []>} : vector<16x32xf32>, vector<32x32xf32>, vector<16x32xf32> -> vector<16x32xf32>
    %228 = vector.broadcast %226 : vector<1x32xf32> to vector<16x32xf32>
    %229 = arith.addf %227, %228 : vector<16x32xf32>
    %230 = arith.addf %124, %229 : vector<16x32xf32>
    %c0_89 = arith.constant 0 : index
    %c0_90 = arith.constant 0 : index
    %231 = vector.load %arg17[%c0_89, %c0_90] : memref<1x32xf32, #tpu.memory_space<vmem>>, vector<1x32xf32>
    %c0_91 = arith.constant 0 : index
    %c0_92 = arith.constant 0 : index
    %232 = vector.load %arg18[%c0_91, %c0_92] : memref<1x32xf32, #tpu.memory_space<vmem>>, vector<1x32xf32>
    %cst_93 = arith.constant dense<0.000000e+00> : vector<16xf32>
    %233 = vector.multi_reduction <add>, %230, %cst_93 [1] : vector<16x32xf32> to vector<16xf32>
    %234 = vector.shape_cast %233 : vector<16xf32> to vector<16x1xf32>
    %cst_94 = arith.constant 3.200000e+01 : f32
    %235 = vector.broadcast %cst_94 : f32 to vector<16x1xf32>
    %236 = arith.divf %234, %235 : vector<16x1xf32>
    %237 = vector.broadcast %236 : vector<16x1xf32> to vector<16x32xf32>
    %238 = arith.subf %230, %237 : vector<16x32xf32>
    %239 = arith.mulf %238, %238 : vector<16x32xf32>
    %cst_95 = arith.constant dense<0.000000e+00> : vector<16xf32>
    %240 = vector.multi_reduction <add>, %239, %cst_95 [1] : vector<16x32xf32> to vector<16xf32>
    %241 = vector.shape_cast %240 : vector<16xf32> to vector<16x1xf32>
    %cst_96 = arith.constant 3.100000e+01 : f32
    %242 = vector.broadcast %cst_96 : f32 to vector<16x1xf32>
    %243 = arith.divf %241, %242 : vector<16x1xf32>
    %244 = math.sqrt %243 : vector<16x1xf32>
    %cst_97 = arith.constant 9.99999997E-7 : f32
    %245 = vector.broadcast %cst_97 : f32 to vector<16x1xf32>
    %246 = arith.addf %244, %245 : vector<16x1xf32>
    %247 = vector.broadcast %246 : vector<16x1xf32> to vector<16x32xf32>
    %248 = arith.divf %238, %247 : vector<16x32xf32>
    %249 = vector.broadcast %231 : vector<1x32xf32> to vector<16x32xf32>
    %250 = arith.mulf %249, %248 : vector<16x32xf32>
    %251 = vector.broadcast %232 : vector<1x32xf32> to vector<16x32xf32>
    %252 = arith.addf %250, %251 : vector<16x32xf32>
    %c0_98 = arith.constant 0 : index
    %c0_99 = arith.constant 0 : index
    %253 = vector.load %arg19[%c0_98, %c0_99] : memref<32x64xf32, #tpu.memory_space<vmem>>, vector<32x64xf32>
    %c0_100 = arith.constant 0 : index
    %c0_101 = arith.constant 0 : index
    %254 = vector.load %arg20[%c0_100, %c0_101] : memref<1x64xf32, #tpu.memory_space<vmem>>, vector<1x64xf32>
    %cst_102 = arith.constant dense<0.000000e+00> : vector<16x64xf32>
    %255 = tpu.matmul %252, %253, %cst_102 {dimension_numbers = #tpu.dot_dimension_numbers<[1], [0], [0], [1], [0, 0, 1, 1], [], []>} : vector<16x32xf32>, vector<32x64xf32>, vector<16x64xf32> -> vector<16x64xf32>
    %256 = vector.broadcast %254 : vector<1x64xf32> to vector<16x64xf32>
    %257 = arith.addf %255, %256 : vector<16x64xf32>
    %cst_103 = arith.constant 0.000000e+00 : f32
    %258 = vector.broadcast %cst_103 : f32 to vector<16x64xf32>
    %259 = arith.maximumf %257, %258 : vector<16x64xf32>
    %c0_104 = arith.constant 0 : index
    %c0_105 = arith.constant 0 : index
    %260 = vector.load %arg21[%c0_104, %c0_105] : memref<64x32xf32, #tpu.memory_space<vmem>>, vector<64x32xf32>
    %c0_106 = arith.constant 0 : index
    %c0_107 = arith.constant 0 : index
    %261 = vector.load %arg22[%c0_106, %c0_107] : memref<1x32xf32, #tpu.memory_space<vmem>>, vector<1x32xf32>
    %cst_108 = arith.constant dense<0.000000e+00> : vector<16x32xf32>
    %262 = tpu.matmul %259, %260, %cst_108 {dimension_numbers = #tpu.dot_dimension_numbers<[1], [0], [0], [1], [0, 0, 1, 1], [], []>} : vector<16x64xf32>, vector<64x32xf32>, vector<16x32xf32> -> vector<16x32xf32>
    %263 = vector.broadcast %261 : vector<1x32xf32> to vector<16x32xf32>
    %264 = arith.addf %262, %263 : vector<16x32xf32>
    %265 = arith.addf %230, %264 : vector<16x32xf32>
    %c0_109 = arith.constant 0 : index
    %c0_110 = arith.constant 0 : index
    %266 = vector.load %arg23[%c0_109, %c0_110] : memref<16x32xf32, #tpu.memory_space<vmem>>, vector<16x32xf32>
    tpu.vector_store %arg23[%c0_109, %c0_110], %265 {strides = array<i32>} : memref<16x32xf32, #tpu.memory_space<vmem>>, vector<16x32xf32>,
    return
  }
  func.func @transform_0(%arg0: i32) -> (i32, i32) {
    %c0_i32 = arith.constant 0 : i32
    %c0_i32_0 = arith.constant 0 : i32
    %c0_i32_1 = arith.constant 0 : i32
    return %c0_i32, %c0_i32_0 : i32, i32
  }
  func.func @transform_1(%arg0: i32) -> (i32, i32) {
    %c0_i32 = arith.constant 0 : i32
    %c0_i32_0 = arith.constant 0 : i32
    %c0_i32_1 = arith.constant 0 : i32
    return %c0_i32, %c0_i32_0 : i32, i32
  }
  func.func @transform_2(%arg0: i32) -> (i32, i32) {
    %c0_i32 = arith.constant 0 : i32
    %c0_i32_0 = arith.constant 0 : i32
    %c0_i32_1 = arith.constant 0 : i32
    return %c0_i32, %c0_i32_0 : i32, i32
  }
  func.func @transform_3(%arg0: i32) -> (i32, i32) {
    %c0_i32 = arith.constant 0 : i32
    %c0_i32_0 = arith.constant 0 : i32
    %c0_i32_1 = arith.constant 0 : i32
    return %c0_i32, %c0_i32_0 : i32, i32
  }
  func.func @transform_4(%arg0: i32) -> (i32, i32) {
    %c0_i32 = arith.constant 0 : i32
    %c0_i32_0 = arith.constant 0 : i32
    %c0_i32_1 = arith.constant 0 : i32
    return %c0_i32, %c0_i32_0 : i32, i32
  }
  func.func @transform_5(%arg0: i32) -> (i32, i32) {
    %c0_i32 = arith.constant 0 : i32
    %c0_i32_0 = arith.constant 0 : i32
    %c0_i32_1 = arith.constant 0 : i32
    return %c0_i32, %c0_i32_0 : i32, i32
  }
  func.func @transform_6(%arg0: i32) -> (i32, i32) {
    %c0_i32 = arith.constant 0 : i32
    %c0_i32_0 = arith.constant 0 : i32
    %c0_i32_1 = arith.constant 0 : i32
    return %c0_i32, %c0_i32_0 : i32, i32
  }
  func.func @transform_7(%arg0: i32) -> (i32, i32) {
    %c0_i32 = arith.constant 0 : i32
    %c0_i32_0 = arith.constant 0 : i32
    %c0_i32_1 = arith.constant 0 : i32
    return %c0_i32, %c0_i32_0 : i32, i32
  }
  func.func @transform_8(%arg0: i32) -> (i32, i32) {
    %c0_i32 = arith.constant 0 : i32
    %c0_i32_0 = arith.constant 0 : i32
    %c0_i32_1 = arith.constant 0 : i32
    return %c0_i32, %c0_i32_0 : i32, i32
  }
  func.func @transform_9(%arg0: i32) -> (i32, i32) {
    %c0_i32 = arith.constant 0 : i32
    %c0_i32_0 = arith.constant 0 : i32
    %c0_i32_1 = arith.constant 0 : i32
    return %c0_i32, %c0_i32_0 : i32, i32
  }
  func.func @transform_10(%arg0: i32) -> (i32, i32) {
    %c0_i32 = arith.constant 0 : i32
    %c0_i32_0 = arith.constant 0 : i32
    %c0_i32_1 = arith.constant 0 : i32
    return %c0_i32, %c0_i32_0 : i32, i32
  }
  func.func @transform_11(%arg0: i32) -> (i32, i32) {
    %c0_i32 = arith.constant 0 : i32
    %c0_i32_0 = arith.constant 0 : i32
    %c0_i32_1 = arith.constant 0 : i32
    return %c0_i32, %c0_i32_0 : i32, i32
  }
  func.func @transform_12(%arg0: i32) -> (i32, i32) {
    %c0_i32 = arith.constant 0 : i32
    %c0_i32_0 = arith.constant 0 : i32
    %c0_i32_1 = arith.constant 0 : i32
    return %c0_i32, %c0_i32_0 : i32, i32
  }
  func.func @transform_13(%arg0: i32) -> (i32, i32) {
    %c0_i32 = arith.constant 0 : i32
    %c0_i32_0 = arith.constant 0 : i32
    %c0_i32_1 = arith.constant 0 : i32
    return %c0_i32, %c0_i32_0 : i32, i32
  }
  func.func @transform_14(%arg0: i32) -> (i32, i32) {
    %c0_i32 = arith.constant 0 : i32
    %c0_i32_0 = arith.constant 0 : i32
    %c0_i32_1 = arith.constant 0 : i32
    return %c0_i32, %c0_i32_0 : i32, i32
  }
  func.func @transform_15(%arg0: i32) -> (i32, i32) {
    %c0_i32 = arith.constant 0 : i32
    %c0_i32_0 = arith.constant 0 : i32
    %c0_i32_1 = arith.constant 0 : i32
    return %c0_i32, %c0_i32_0 : i32, i32
  }
  func.func @transform_16(%arg0: i32) -> (i32, i32) {
    %c0_i32 = arith.constant 0 : i32
    %c0_i32_0 = arith.constant 0 : i32
    %c0_i32_1 = arith.constant 0 : i32
    return %c0_i32, %c0_i32_0 : i32, i32
  }
  func.func @transform_17(%arg0: i32) -> (i32, i32) {
    %c0_i32 = arith.constant 0 : i32
    %c0_i32_0 = arith.constant 0 : i32
    %c0_i32_1 = arith.constant 0 : i32
    return %c0_i32, %c0_i32_0 : i32, i32
  }
  func.func @transform_18(%arg0: i32) -> (i32, i32) {
    %c0_i32 = arith.constant 0 : i32
    %c0_i32_0 = arith.constant 0 : i32
    %c0_i32_1 = arith.constant 0 : i32
    return %c0_i32, %c0_i32_0 : i32, i32
  }
  func.func @transform_19(%arg0: i32) -> (i32, i32) {
    %c0_i32 = arith.constant 0 : i32
    %c0_i32_0 = arith.constant 0 : i32
    %c0_i32_1 = arith.constant 0 : i32
    return %c0_i32, %c0_i32_0 : i32, i32
  }
  func.func @transform_20(%arg0: i32) -> (i32, i32) {
    %c0_i32 = arith.constant 0 : i32
    %c0_i32_0 = arith.constant 0 : i32
    %c0_i32_1 = arith.constant 0 : i32
    return %c0_i32, %c0_i32_0 : i32, i32
  }
  func.func @transform_21(%arg0: i32) -> (i32, i32) {
    %c0_i32 = arith.constant 0 : i32
    %c0_i32_0 = arith.constant 0 : i32
    %c0_i32_1 = arith.constant 0 : i32
    return %c0_i32, %c0_i32_0 : i32, i32
  }
  func.func @transform_22(%arg0: i32) -> (i32, i32) {
    %c0_i32 = arith.constant 0 : i32
    %c0_i32_0 = arith.constant 0 : i32
    %c0_i32_1 = arith.constant 0 : i32
    return %c0_i32, %c0_i32_0 : i32, i32
  }
}

module attributes {stable_mosaic.version = 11 : i64} {
  func.func @_decoder_layer_kernel(%arg0: i32, %arg1: memref<16x32xf32, #tpu.memory_space<vmem>>, %arg2: memref<24x32xf32, #tpu.memory_space<vmem>>, %arg3: memref<1x32xf32, #tpu.memory_space<vmem>>, %arg4: memref<1x32xf32, #tpu.memory_space<vmem>>, %arg5: memref<32x64xf32, #tpu.memory_space<vmem>>, %arg6: memref<1x64xf32, #tpu.memory_space<vmem>>, %arg7: memref<32x32xf32, #tpu.memory_space<vmem>>, %arg8: memref<1x32xf32, #tpu.memory_space<vmem>>, %arg9: memref<1x32xf32, #tpu.memory_space<vmem>>, %arg10: memref<1x32xf32, #tpu.memory_space<vmem>>, %arg11: memref<32x32xf32, #tpu.memory_space<vmem>>, %arg12: memref<1x32xf32, #tpu.memory_space<vmem>>, %arg13: memref<32x32xf32, #tpu.memory_space<vmem>>, %arg14: memref<1x32xf32, #tpu.memory_space<vmem>>, %arg15: memref<32x32xf32, #tpu.memory_space<vmem>>, %arg16: memref<1x32xf32, #tpu.memory_space<vmem>>, %arg17: memref<1x32xf32, #tpu.memory_space<vmem>>, %arg18: memref<1x32xf32, #tpu.memory_space<vmem>>, %arg19: memref<32x64xf32, #tpu.memory_space<vmem>>, %arg20: memref<1x64xf32, #tpu.memory_space<vmem>>, %arg21: memref<64x32xf32, #tpu.memory_space<vmem>>, %arg22: memref<1x32xf32, #tpu.memory_space<vmem>>, %arg23: memref<1x32xf32, #tpu.memory_space<vmem>>, %arg24: memref<1x32xf32, #tpu.memory_space<vmem>>, %arg25: memref<16x32xf32, #tpu.memory_space<vmem>>) attributes {dimension_semantics = [#tpu.dimension_semantics<arbitrary>], iteration_bounds = array<i64: 1>, scalar_prefetch = 0 : i64, scratch_operands = 0 : i64, tpu.core_type = #tpu.core_type<tc>, window_params = [{pipeline_mode = #tpu.pipeline_mode<synchronous>, transform_indices = @transform_0, window_bounds = array<i64: 16, 32>}, {pipeline_mode = #tpu.pipeline_mode<synchronous>, transform_indices = @transform_1, window_bounds = array<i64: 24, 32>}, {pipeline_mode = #tpu.pipeline_mode<synchronous>, transform_indices = @transform_2, window_bounds = array<i64: 1, 32>}, {pipeline_mode = #tpu.pipeline_mode<synchronous>, transform_indices = @transform_3, window_bounds = array<i64: 1, 32>}, {pipeline_mode = #tpu.pipeline_mode<synchronous>, transform_indices = @transform_4, window_bounds = array<i64: 32, 64>}, {pipeline_mode = #tpu.pipeline_mode<synchronous>, transform_indices = @transform_5, window_bounds = array<i64: 1, 64>}, {pipeline_mode = #tpu.pipeline_mode<synchronous>, transform_indices = @transform_6, window_bounds = array<i64: 32, 32>}, {pipeline_mode = #tpu.pipeline_mode<synchronous>, transform_indices = @transform_7, window_bounds = array<i64: 1, 32>}, {pipeline_mode = #tpu.pipeline_mode<synchronous>, transform_indices = @transform_8, window_bounds = array<i64: 1, 32>}, {pipeline_mode = #tpu.pipeline_mode<synchronous>, transform_indices = @transform_9, window_bounds = array<i64: 1, 32>}, {pipeline_mode = #tpu.pipeline_mode<synchronous>, transform_indices = @transform_10, window_bounds = array<i64: 32, 32>}, {pipeline_mode = #tpu.pipeline_mode<synchronous>, transform_indices = @transform_11, window_bounds = array<i64: 1, 32>}, {pipeline_mode = #tpu.pipeline_mode<synchronous>, transform_indices = @transform_12, window_bounds = array<i64: 32, 32>}, {pipeline_mode = #tpu.pipeline_mode<synchronous>, transform_indices = @transform_13, window_bounds = array<i64: 1, 32>}, {pipeline_mode = #tpu.pipeline_mode<synchronous>, transform_indices = @transform_14, window_bounds = array<i64: 32, 32>}, {pipeline_mode = #tpu.pipeline_mode<synchronous>, transform_indices = @transform_15, window_bounds = array<i64: 1, 32>}, {pipeline_mode = #tpu.pipeline_mode<synchronous>, transform_indices = @transform_16, window_bounds = array<i64: 1, 32>}, {pipeline_mode = #tpu.pipeline_mode<synchronous>, transform_indices = @transform_17, window_bounds = array<i64: 1, 32>}, {pipeline_mode = #tpu.pipeline_mode<synchronous>, transform_indices = @transform_18, window_bounds = array<i64: 32, 64>}, {pipeline_mode = #tpu.pipeline_mode<synchronous>, transform_indices = @transform_19, window_bounds = array<i64: 1, 64>}, {pipeline_mode = #tpu.pipeline_mode<synchronous>, transform_indices = @transform_20, window_bounds = array<i64: 64, 32>}, {pipeline_mode = #tpu.pipeline_mode<synchronous>, transform_indices = @transform_21, window_bounds = array<i64: 1, 32>}, {pipeline_mode = #tpu.pipeline_mode<synchronous>, transform_indices = @transform_22, window_bounds = array<i64: 1, 32>}, {pipeline_mode = #tpu.pipeline_mode<synchronous>, transform_indices = @transform_23, window_bounds = array<i64: 1, 32>}, {pipeline_mode = #tpu.pipeline_mode<synchronous>, transform_indices = @transform_24, window_bounds = array<i64: 16, 32>}]} {
    %c0 = arith.constant 0 : index
    %c0_0 = arith.constant 0 : index
    %0 = vector.load %arg1[%c0, %c0_0] : memref<16x32xf32, #tpu.memory_space<vmem>>, vector<16x32xf32>
    %c0_1 = arith.constant 0 : index
    %c0_2 = arith.constant 0 : index
    %1 = vector.load %arg2[%c0_1, %c0_2] : memref<24x32xf32, #tpu.memory_space<vmem>>, vector<24x32xf32>
    %c0_3 = arith.constant 0 : index
    %c0_4 = arith.constant 0 : index
    %2 = vector.load %arg3[%c0_3, %c0_4] : memref<1x32xf32, #tpu.memory_space<vmem>>, vector<1x32xf32>
    %c0_5 = arith.constant 0 : index
    %c0_6 = arith.constant 0 : index
    %3 = vector.load %arg4[%c0_5, %c0_6] : memref<1x32xf32, #tpu.memory_space<vmem>>, vector<1x32xf32>
    %cst = arith.constant dense<0.000000e+00> : vector<16xf32>
    %4 = vector.multi_reduction <add>, %0, %cst [1] : vector<16x32xf32> to vector<16xf32>
    %5 = vector.shape_cast %4 : vector<16xf32> to vector<16x1xf32>
    %cst_7 = arith.constant 3.200000e+01 : f32
    %6 = vector.broadcast %cst_7 : f32 to vector<16x1xf32>
    %7 = arith.divf %5, %6 : vector<16x1xf32>
    %8 = vector.broadcast %7 : vector<16x1xf32> to vector<16x32xf32>
    %9 = arith.subf %0, %8 : vector<16x32xf32>
    %10 = arith.mulf %9, %9 : vector<16x32xf32>
    %cst_8 = arith.constant dense<0.000000e+00> : vector<16xf32>
    %11 = vector.multi_reduction <add>, %10, %cst_8 [1] : vector<16x32xf32> to vector<16xf32>
    %12 = vector.shape_cast %11 : vector<16xf32> to vector<16x1xf32>
    %cst_9 = arith.constant 3.100000e+01 : f32
    %13 = vector.broadcast %cst_9 : f32 to vector<16x1xf32>
    %14 = arith.divf %12, %13 : vector<16x1xf32>
    %15 = math.sqrt %14 : vector<16x1xf32>
    %cst_10 = arith.constant 9.99999997E-7 : f32
    %16 = vector.broadcast %cst_10 : f32 to vector<16x1xf32>
    %17 = arith.addf %15, %16 : vector<16x1xf32>
    %18 = vector.broadcast %17 : vector<16x1xf32> to vector<16x32xf32>
    %19 = arith.divf %9, %18 : vector<16x32xf32>
    %20 = vector.broadcast %2 : vector<1x32xf32> to vector<16x32xf32>
    %21 = arith.mulf %20, %19 : vector<16x32xf32>
    %22 = vector.broadcast %3 : vector<1x32xf32> to vector<16x32xf32>
    %23 = arith.addf %21, %22 : vector<16x32xf32>
    %c0_11 = arith.constant 0 : index
    %c0_12 = arith.constant 0 : index
    %24 = vector.load %arg5[%c0_11, %c0_12] : memref<32x64xf32, #tpu.memory_space<vmem>>, vector<32x64xf32>
    %c0_13 = arith.constant 0 : index
    %c0_14 = arith.constant 0 : index
    %25 = vector.load %arg6[%c0_13, %c0_14] : memref<1x64xf32, #tpu.memory_space<vmem>>, vector<1x64xf32>
    %cst_15 = arith.constant dense<0.000000e+00> : vector<16x64xf32>
    %26 = tpu.matmul %23, %24, %cst_15 {dimension_numbers = #tpu.dot_dimension_numbers<[1], [0], [0], [1], [0, 0, 1, 1], [], []>} : vector<16x32xf32>, vector<32x64xf32>, vector<16x64xf32> -> vector<16x64xf32>
    %27 = vector.broadcast %25 : vector<1x64xf32> to vector<16x64xf32>
    %28 = arith.addf %26, %27 : vector<16x64xf32>
    %29 = vector.extract_strided_slice %28 {offsets = [0, 0], sizes = [16, 32], strides = [1, 1]} : vector<16x64xf32> to vector<16x32xf32>
    %30 = vector.extract_strided_slice %28 {offsets = [0, 32], sizes = [16, 32], strides = [1, 1]} : vector<16x64xf32> to vector<16x32xf32>
    %31 = vector.shape_cast %29 : vector<16x32xf32> to vector<2x8x32xf32>
    %32 = vector.shape_cast %30 : vector<16x32xf32> to vector<2x8x32xf32>
    %33 = tpu.iota {dimensions = array<i32: 0>} : vector<8x8xi32>
    %34 = tpu.iota {dimensions = array<i32: 1>} : vector<8x8xi32>
    %35 = arith.cmpi sge, %33, %34 : vector<8x8xi32>
    %36 = vector.shape_cast %35 : vector<8x8xi1> to vector<1x8x8xi1>
    %37 = vector.extract_strided_slice %31 {offsets = [0, 0, 0], sizes = [2, 8, 8], strides = [1, 1, 1]} : vector<2x8x32xf32> to vector<2x8x8xf32>
    %38 = vector.extract_strided_slice %32 {offsets = [0, 0, 0], sizes = [2, 8, 8], strides = [1, 1, 1]} : vector<2x8x32xf32> to vector<2x8x8xf32>
    "tpu.trace_start"() <{level = 10 : i32, message = "bqd,bkd->bqk"}> : () -> ()
    %cst_16 = arith.constant dense<0.000000e+00> : vector<2x8x8xf32>
    %39 = tpu.matmul %37, %38, %cst_16 {dimension_numbers = #tpu.dot_dimension_numbers<[2], [2], [1], [1], [0, 0, 0, 1, 1, 1], [0], [0]>} : vector<2x8x8xf32>, vector<2x8x8xf32>, vector<2x8x8xf32> -> vector<2x8x8xf32>
    "tpu.trace_stop"() : () -> ()
    %cst_17 = arith.constant 0.353553385 : f32
    %40 = vector.broadcast %cst_17 : f32 to vector<2x8x8xf32>
    %41 = arith.mulf %39, %40 : vector<2x8x8xf32>
    %cst_18 = arith.constant -1.000000e+30 : f32
    %42 = vector.shape_cast %36 : vector<1x8x8xi1> to vector<1x8x8xi1>
    %43 = vector.broadcast %42 : vector<1x8x8xi1> to vector<2x8x8xi1>
    %44 = vector.broadcast %cst_18 : f32 to vector<2x8x8xf32>
    %45 = arith.select %43, %41, %44 : vector<2x8x8xi1>, vector<2x8x8xf32>
    %cst_19 = arith.constant dense<0xFF800000> : vector<2x8xf32>
    %46 = vector.multi_reduction <maximumf>, %45, %cst_19 [2] : vector<2x8x8xf32> to vector<2x8xf32>
    %47 = vector.shape_cast %46 : vector<2x8xf32> to vector<2x8x1xf32>
    %48 = vector.broadcast %47 : vector<2x8x1xf32> to vector<2x8x8xf32>
    %49 = arith.subf %45, %48 : vector<2x8x8xf32>
    %50 = math.exp %49 : vector<2x8x8xf32>
    %cst_20 = arith.constant dense<0.000000e+00> : vector<2x8xf32>
    %51 = vector.multi_reduction <add>, %50, %cst_20 [2] : vector<2x8x8xf32> to vector<2x8xf32>
    %52 = vector.shape_cast %51 : vector<2x8xf32> to vector<2x8x1xf32>
    %53 = tpu.reciprocal %52 {approx = true} : vector<2x8x1xf32> -> vector<2x8x1xf32>
    %54 = vector.broadcast %53 : vector<2x8x1xf32> to vector<2x8x8xf32>
    %55 = arith.mulf %50, %54 : vector<2x8x8xf32>
    "tpu.trace_start"() <{level = 10 : i32, message = "bqk,bkd->bqd"}> : () -> ()
    %cst_21 = arith.constant dense<0.000000e+00> : vector<2x8x8xf32>
    %56 = tpu.matmul %55, %38, %cst_21 {dimension_numbers = #tpu.dot_dimension_numbers<[2], [1], [1], [2], [0, 0, 0, 1, 1, 2], [0], [0]>} : vector<2x8x8xf32>, vector<2x8x8xf32>, vector<2x8x8xf32> -> vector<2x8x8xf32>
    "tpu.trace_stop"() : () -> ()
    %57 = vector.extract_strided_slice %31 {offsets = [0, 0, 8], sizes = [2, 8, 8], strides = [1, 1, 1]} : vector<2x8x32xf32> to vector<2x8x8xf32>
    %58 = vector.extract_strided_slice %32 {offsets = [0, 0, 8], sizes = [2, 8, 8], strides = [1, 1, 1]} : vector<2x8x32xf32> to vector<2x8x8xf32>
    "tpu.trace_start"() <{level = 10 : i32, message = "bqd,bkd->bqk"}> : () -> ()
    %cst_22 = arith.constant dense<0.000000e+00> : vector<2x8x8xf32>
    %59 = tpu.matmul %57, %58, %cst_22 {dimension_numbers = #tpu.dot_dimension_numbers<[2], [2], [1], [1], [0, 0, 0, 1, 1, 1], [0], [0]>} : vector<2x8x8xf32>, vector<2x8x8xf32>, vector<2x8x8xf32> -> vector<2x8x8xf32>
    "tpu.trace_stop"() : () -> ()
    %cst_23 = arith.constant 0.353553385 : f32
    %60 = vector.broadcast %cst_23 : f32 to vector<2x8x8xf32>
    %61 = arith.mulf %59, %60 : vector<2x8x8xf32>
    %cst_24 = arith.constant -1.000000e+30 : f32
    %62 = vector.shape_cast %36 : vector<1x8x8xi1> to vector<1x8x8xi1>
    %63 = vector.broadcast %62 : vector<1x8x8xi1> to vector<2x8x8xi1>
    %64 = vector.broadcast %cst_24 : f32 to vector<2x8x8xf32>
    %65 = arith.select %63, %61, %64 : vector<2x8x8xi1>, vector<2x8x8xf32>
    %cst_25 = arith.constant dense<0xFF800000> : vector<2x8xf32>
    %66 = vector.multi_reduction <maximumf>, %65, %cst_25 [2] : vector<2x8x8xf32> to vector<2x8xf32>
    %67 = vector.shape_cast %66 : vector<2x8xf32> to vector<2x8x1xf32>
    %68 = vector.broadcast %67 : vector<2x8x1xf32> to vector<2x8x8xf32>
    %69 = arith.subf %65, %68 : vector<2x8x8xf32>
    %70 = math.exp %69 : vector<2x8x8xf32>
    %cst_26 = arith.constant dense<0.000000e+00> : vector<2x8xf32>
    %71 = vector.multi_reduction <add>, %70, %cst_26 [2] : vector<2x8x8xf32> to vector<2x8xf32>
    %72 = vector.shape_cast %71 : vector<2x8xf32> to vector<2x8x1xf32>
    %73 = tpu.reciprocal %72 {approx = true} : vector<2x8x1xf32> -> vector<2x8x1xf32>
    %74 = vector.broadcast %73 : vector<2x8x1xf32> to vector<2x8x8xf32>
    %75 = arith.mulf %70, %74 : vector<2x8x8xf32>
    "tpu.trace_start"() <{level = 10 : i32, message = "bqk,bkd->bqd"}> : () -> ()
    %cst_27 = arith.constant dense<0.000000e+00> : vector<2x8x8xf32>
    %76 = tpu.matmul %75, %58, %cst_27 {dimension_numbers = #tpu.dot_dimension_numbers<[2], [1], [1], [2], [0, 0, 0, 1, 1, 2], [0], [0]>} : vector<2x8x8xf32>, vector<2x8x8xf32>, vector<2x8x8xf32> -> vector<2x8x8xf32>
    "tpu.trace_stop"() : () -> ()
    %77 = vector.extract_strided_slice %31 {offsets = [0, 0, 16], sizes = [2, 8, 8], strides = [1, 1, 1]} : vector<2x8x32xf32> to vector<2x8x8xf32>
    %78 = vector.extract_strided_slice %32 {offsets = [0, 0, 16], sizes = [2, 8, 8], strides = [1, 1, 1]} : vector<2x8x32xf32> to vector<2x8x8xf32>
    "tpu.trace_start"() <{level = 10 : i32, message = "bqd,bkd->bqk"}> : () -> ()
    %cst_28 = arith.constant dense<0.000000e+00> : vector<2x8x8xf32>
    %79 = tpu.matmul %77, %78, %cst_28 {dimension_numbers = #tpu.dot_dimension_numbers<[2], [2], [1], [1], [0, 0, 0, 1, 1, 1], [0], [0]>} : vector<2x8x8xf32>, vector<2x8x8xf32>, vector<2x8x8xf32> -> vector<2x8x8xf32>
    "tpu.trace_stop"() : () -> ()
    %cst_29 = arith.constant 0.353553385 : f32
    %80 = vector.broadcast %cst_29 : f32 to vector<2x8x8xf32>
    %81 = arith.mulf %79, %80 : vector<2x8x8xf32>
    %cst_30 = arith.constant -1.000000e+30 : f32
    %82 = vector.shape_cast %36 : vector<1x8x8xi1> to vector<1x8x8xi1>
    %83 = vector.broadcast %82 : vector<1x8x8xi1> to vector<2x8x8xi1>
    %84 = vector.broadcast %cst_30 : f32 to vector<2x8x8xf32>
    %85 = arith.select %83, %81, %84 : vector<2x8x8xi1>, vector<2x8x8xf32>
    %cst_31 = arith.constant dense<0xFF800000> : vector<2x8xf32>
    %86 = vector.multi_reduction <maximumf>, %85, %cst_31 [2] : vector<2x8x8xf32> to vector<2x8xf32>
    %87 = vector.shape_cast %86 : vector<2x8xf32> to vector<2x8x1xf32>
    %88 = vector.broadcast %87 : vector<2x8x1xf32> to vector<2x8x8xf32>
    %89 = arith.subf %85, %88 : vector<2x8x8xf32>
    %90 = math.exp %89 : vector<2x8x8xf32>
    %cst_32 = arith.constant dense<0.000000e+00> : vector<2x8xf32>
    %91 = vector.multi_reduction <add>, %90, %cst_32 [2] : vector<2x8x8xf32> to vector<2x8xf32>
    %92 = vector.shape_cast %91 : vector<2x8xf32> to vector<2x8x1xf32>
    %93 = tpu.reciprocal %92 {approx = true} : vector<2x8x1xf32> -> vector<2x8x1xf32>
    %94 = vector.broadcast %93 : vector<2x8x1xf32> to vector<2x8x8xf32>
    %95 = arith.mulf %90, %94 : vector<2x8x8xf32>
    "tpu.trace_start"() <{level = 10 : i32, message = "bqk,bkd->bqd"}> : () -> ()
    %cst_33 = arith.constant dense<0.000000e+00> : vector<2x8x8xf32>
    %96 = tpu.matmul %95, %78, %cst_33 {dimension_numbers = #tpu.dot_dimension_numbers<[2], [1], [1], [2], [0, 0, 0, 1, 1, 2], [0], [0]>} : vector<2x8x8xf32>, vector<2x8x8xf32>, vector<2x8x8xf32> -> vector<2x8x8xf32>
    "tpu.trace_stop"() : () -> ()
    %97 = vector.extract_strided_slice %31 {offsets = [0, 0, 24], sizes = [2, 8, 8], strides = [1, 1, 1]} : vector<2x8x32xf32> to vector<2x8x8xf32>
    %98 = vector.extract_strided_slice %32 {offsets = [0, 0, 24], sizes = [2, 8, 8], strides = [1, 1, 1]} : vector<2x8x32xf32> to vector<2x8x8xf32>
    "tpu.trace_start"() <{level = 10 : i32, message = "bqd,bkd->bqk"}> : () -> ()
    %cst_34 = arith.constant dense<0.000000e+00> : vector<2x8x8xf32>
    %99 = tpu.matmul %97, %98, %cst_34 {dimension_numbers = #tpu.dot_dimension_numbers<[2], [2], [1], [1], [0, 0, 0, 1, 1, 1], [0], [0]>} : vector<2x8x8xf32>, vector<2x8x8xf32>, vector<2x8x8xf32> -> vector<2x8x8xf32>
    "tpu.trace_stop"() : () -> ()
    %cst_35 = arith.constant 0.353553385 : f32
    %100 = vector.broadcast %cst_35 : f32 to vector<2x8x8xf32>
    %101 = arith.mulf %99, %100 : vector<2x8x8xf32>
    %cst_36 = arith.constant -1.000000e+30 : f32
    %102 = vector.shape_cast %36 : vector<1x8x8xi1> to vector<1x8x8xi1>
    %103 = vector.broadcast %102 : vector<1x8x8xi1> to vector<2x8x8xi1>
    %104 = vector.broadcast %cst_36 : f32 to vector<2x8x8xf32>
    %105 = arith.select %103, %101, %104 : vector<2x8x8xi1>, vector<2x8x8xf32>
    %cst_37 = arith.constant dense<0xFF800000> : vector<2x8xf32>
    %106 = vector.multi_reduction <maximumf>, %105, %cst_37 [2] : vector<2x8x8xf32> to vector<2x8xf32>
    %107 = vector.shape_cast %106 : vector<2x8xf32> to vector<2x8x1xf32>
    %108 = vector.broadcast %107 : vector<2x8x1xf32> to vector<2x8x8xf32>
    %109 = arith.subf %105, %108 : vector<2x8x8xf32>
    %110 = math.exp %109 : vector<2x8x8xf32>
    %cst_38 = arith.constant dense<0.000000e+00> : vector<2x8xf32>
    %111 = vector.multi_reduction <add>, %110, %cst_38 [2] : vector<2x8x8xf32> to vector<2x8xf32>
    %112 = vector.shape_cast %111 : vector<2x8xf32> to vector<2x8x1xf32>
    %113 = tpu.reciprocal %112 {approx = true} : vector<2x8x1xf32> -> vector<2x8x1xf32>
    %114 = vector.broadcast %113 : vector<2x8x1xf32> to vector<2x8x8xf32>
    %115 = arith.mulf %110, %114 : vector<2x8x8xf32>
    "tpu.trace_start"() <{level = 10 : i32, message = "bqk,bkd->bqd"}> : () -> ()
    %cst_39 = arith.constant dense<0.000000e+00> : vector<2x8x8xf32>
    %116 = tpu.matmul %115, %98, %cst_39 {dimension_numbers = #tpu.dot_dimension_numbers<[2], [1], [1], [2], [0, 0, 0, 1, 1, 2], [0], [0]>} : vector<2x8x8xf32>, vector<2x8x8xf32>, vector<2x8x8xf32> -> vector<2x8x8xf32>
    "tpu.trace_stop"() : () -> ()
    %117 = tpu.concatenate %56, %76, %96, %116 in 2 : vector<2x8x8xf32>, vector<2x8x8xf32>, vector<2x8x8xf32>, vector<2x8x8xf32> -> vector<2x8x32xf32>
    %118 = vector.shape_cast %117 : vector<2x8x32xf32> to vector<16x32xf32>
    %c0_40 = arith.constant 0 : index
    %c0_41 = arith.constant 0 : index
    %119 = vector.load %arg7[%c0_40, %c0_41] : memref<32x32xf32, #tpu.memory_space<vmem>>, vector<32x32xf32>
    %c0_42 = arith.constant 0 : index
    %c0_43 = arith.constant 0 : index
    %120 = vector.load %arg8[%c0_42, %c0_43] : memref<1x32xf32, #tpu.memory_space<vmem>>, vector<1x32xf32>
    %cst_44 = arith.constant dense<0.000000e+00> : vector<16x32xf32>
    %121 = tpu.matmul %118, %119, %cst_44 {dimension_numbers = #tpu.dot_dimension_numbers<[1], [0], [0], [1], [0, 0, 1, 1], [], []>} : vector<16x32xf32>, vector<32x32xf32>, vector<16x32xf32> -> vector<16x32xf32>
    %122 = vector.broadcast %120 : vector<1x32xf32> to vector<16x32xf32>
    %123 = arith.addf %121, %122 : vector<16x32xf32>
    %124 = arith.addf %0, %123 : vector<16x32xf32>
    %c0_45 = arith.constant 0 : index
    %c0_46 = arith.constant 0 : index
    %125 = vector.load %arg9[%c0_45, %c0_46] : memref<1x32xf32, #tpu.memory_space<vmem>>, vector<1x32xf32>
    %c0_47 = arith.constant 0 : index
    %c0_48 = arith.constant 0 : index
    %126 = vector.load %arg10[%c0_47, %c0_48] : memref<1x32xf32, #tpu.memory_space<vmem>>, vector<1x32xf32>
    %cst_49 = arith.constant dense<0.000000e+00> : vector<16xf32>
    %127 = vector.multi_reduction <add>, %124, %cst_49 [1] : vector<16x32xf32> to vector<16xf32>
    %128 = vector.shape_cast %127 : vector<16xf32> to vector<16x1xf32>
    %cst_50 = arith.constant 3.200000e+01 : f32
    %129 = vector.broadcast %cst_50 : f32 to vector<16x1xf32>
    %130 = arith.divf %128, %129 : vector<16x1xf32>
    %131 = vector.broadcast %130 : vector<16x1xf32> to vector<16x32xf32>
    %132 = arith.subf %124, %131 : vector<16x32xf32>
    %133 = arith.mulf %132, %132 : vector<16x32xf32>
    %cst_51 = arith.constant dense<0.000000e+00> : vector<16xf32>
    %134 = vector.multi_reduction <add>, %133, %cst_51 [1] : vector<16x32xf32> to vector<16xf32>
    %135 = vector.shape_cast %134 : vector<16xf32> to vector<16x1xf32>
    %cst_52 = arith.constant 3.100000e+01 : f32
    %136 = vector.broadcast %cst_52 : f32 to vector<16x1xf32>
    %137 = arith.divf %135, %136 : vector<16x1xf32>
    %138 = math.sqrt %137 : vector<16x1xf32>
    %cst_53 = arith.constant 9.99999997E-7 : f32
    %139 = vector.broadcast %cst_53 : f32 to vector<16x1xf32>
    %140 = arith.addf %138, %139 : vector<16x1xf32>
    %141 = vector.broadcast %140 : vector<16x1xf32> to vector<16x32xf32>
    %142 = arith.divf %132, %141 : vector<16x32xf32>
    %143 = vector.broadcast %125 : vector<1x32xf32> to vector<16x32xf32>
    %144 = arith.mulf %143, %142 : vector<16x32xf32>
    %145 = vector.broadcast %126 : vector<1x32xf32> to vector<16x32xf32>
    %146 = arith.addf %144, %145 : vector<16x32xf32>
    %c0_54 = arith.constant 0 : index
    %c0_55 = arith.constant 0 : index
    %147 = vector.load %arg11[%c0_54, %c0_55] : memref<32x32xf32, #tpu.memory_space<vmem>>, vector<32x32xf32>
    %c0_56 = arith.constant 0 : index
    %c0_57 = arith.constant 0 : index
    %148 = vector.load %arg12[%c0_56, %c0_57] : memref<1x32xf32, #tpu.memory_space<vmem>>, vector<1x32xf32>
    %cst_58 = arith.constant dense<0.000000e+00> : vector<16x32xf32>
    %149 = tpu.matmul %146, %147, %cst_58 {dimension_numbers = #tpu.dot_dimension_numbers<[1], [0], [0], [1], [0, 0, 1, 1], [], []>} : vector<16x32xf32>, vector<32x32xf32>, vector<16x32xf32> -> vector<16x32xf32>
    %150 = vector.broadcast %148 : vector<1x32xf32> to vector<16x32xf32>
    %151 = arith.addf %149, %150 : vector<16x32xf32>
    %c0_59 = arith.constant 0 : index
    %c0_60 = arith.constant 0 : index
    %152 = vector.load %arg13[%c0_59, %c0_60] : memref<32x32xf32, #tpu.memory_space<vmem>>, vector<32x32xf32>
    %c0_61 = arith.constant 0 : index
    %c0_62 = arith.constant 0 : index
    %153 = vector.load %arg14[%c0_61, %c0_62] : memref<1x32xf32, #tpu.memory_space<vmem>>, vector<1x32xf32>
    %cst_63 = arith.constant dense<0.000000e+00> : vector<24x32xf32>
    %154 = tpu.matmul %1, %152, %cst_63 {dimension_numbers = #tpu.dot_dimension_numbers<[1], [0], [0], [1], [0, 0, 1, 1], [], []>} : vector<24x32xf32>, vector<32x32xf32>, vector<24x32xf32> -> vector<24x32xf32>
    %155 = vector.broadcast %153 : vector<1x32xf32> to vector<24x32xf32>
    %156 = arith.addf %154, %155 : vector<24x32xf32>
    %157 = vector.shape_cast %151 : vector<16x32xf32> to vector<2x8x32xf32>
    %158 = vector.shape_cast %156 : vector<24x32xf32> to vector<2x12x32xf32>
    %159 = vector.extract_strided_slice %157 {offsets = [0, 0, 0], sizes = [2, 8, 8], strides = [1, 1, 1]} : vector<2x8x32xf32> to vector<2x8x8xf32>
    %160 = vector.extract_strided_slice %158 {offsets = [0, 0, 0], sizes = [2, 12, 8], strides = [1, 1, 1]} : vector<2x12x32xf32> to vector<2x12x8xf32>
    "tpu.trace_start"() <{level = 10 : i32, message = "bqd,bkd->bqk"}> : () -> ()
    %cst_64 = arith.constant dense<0.000000e+00> : vector<2x8x12xf32>
    %161 = tpu.matmul %159, %160, %cst_64 {dimension_numbers = #tpu.dot_dimension_numbers<[2], [2], [1], [1], [0, 0, 0, 1, 1, 1], [0], [0]>} : vector<2x8x8xf32>, vector<2x12x8xf32>, vector<2x8x12xf32> -> vector<2x8x12xf32>
    "tpu.trace_stop"() : () -> ()
    %cst_65 = arith.constant 0.353553385 : f32
    %162 = vector.broadcast %cst_65 : f32 to vector<2x8x12xf32>
    %163 = arith.mulf %161, %162 : vector<2x8x12xf32>
    %cst_66 = arith.constant dense<0xFF800000> : vector<2x8xf32>
    %164 = vector.multi_reduction <maximumf>, %163, %cst_66 [2] : vector<2x8x12xf32> to vector<2x8xf32>
    %165 = vector.shape_cast %164 : vector<2x8xf32> to vector<2x8x1xf32>
    %166 = vector.broadcast %165 : vector<2x8x1xf32> to vector<2x8x12xf32>
    %167 = arith.subf %163, %166 : vector<2x8x12xf32>
    %168 = math.exp %167 : vector<2x8x12xf32>
    %cst_67 = arith.constant dense<0.000000e+00> : vector<2x8xf32>
    %169 = vector.multi_reduction <add>, %168, %cst_67 [2] : vector<2x8x12xf32> to vector<2x8xf32>
    %170 = vector.shape_cast %169 : vector<2x8xf32> to vector<2x8x1xf32>
    %171 = tpu.reciprocal %170 {approx = true} : vector<2x8x1xf32> -> vector<2x8x1xf32>
    %172 = vector.broadcast %171 : vector<2x8x1xf32> to vector<2x8x12xf32>
    %173 = arith.mulf %168, %172 : vector<2x8x12xf32>
    "tpu.trace_start"() <{level = 10 : i32, message = "bqk,bkd->bqd"}> : () -> ()
    %cst_68 = arith.constant dense<0.000000e+00> : vector<2x8x8xf32>
    %174 = tpu.matmul %173, %160, %cst_68 {dimension_numbers = #tpu.dot_dimension_numbers<[2], [1], [1], [2], [0, 0, 0, 1, 1, 2], [0], [0]>} : vector<2x8x12xf32>, vector<2x12x8xf32>, vector<2x8x8xf32> -> vector<2x8x8xf32>
    "tpu.trace_stop"() : () -> ()
    %175 = vector.extract_strided_slice %157 {offsets = [0, 0, 8], sizes = [2, 8, 8], strides = [1, 1, 1]} : vector<2x8x32xf32> to vector<2x8x8xf32>
    %176 = vector.extract_strided_slice %158 {offsets = [0, 0, 8], sizes = [2, 12, 8], strides = [1, 1, 1]} : vector<2x12x32xf32> to vector<2x12x8xf32>
    "tpu.trace_start"() <{level = 10 : i32, message = "bqd,bkd->bqk"}> : () -> ()
    %cst_69 = arith.constant dense<0.000000e+00> : vector<2x8x12xf32>
    %177 = tpu.matmul %175, %176, %cst_69 {dimension_numbers = #tpu.dot_dimension_numbers<[2], [2], [1], [1], [0, 0, 0, 1, 1, 1], [0], [0]>} : vector<2x8x8xf32>, vector<2x12x8xf32>, vector<2x8x12xf32> -> vector<2x8x12xf32>
    "tpu.trace_stop"() : () -> ()
    %cst_70 = arith.constant 0.353553385 : f32
    %178 = vector.broadcast %cst_70 : f32 to vector<2x8x12xf32>
    %179 = arith.mulf %177, %178 : vector<2x8x12xf32>
    %cst_71 = arith.constant dense<0xFF800000> : vector<2x8xf32>
    %180 = vector.multi_reduction <maximumf>, %179, %cst_71 [2] : vector<2x8x12xf32> to vector<2x8xf32>
    %181 = vector.shape_cast %180 : vector<2x8xf32> to vector<2x8x1xf32>
    %182 = vector.broadcast %181 : vector<2x8x1xf32> to vector<2x8x12xf32>
    %183 = arith.subf %179, %182 : vector<2x8x12xf32>
    %184 = math.exp %183 : vector<2x8x12xf32>
    %cst_72 = arith.constant dense<0.000000e+00> : vector<2x8xf32>
    %185 = vector.multi_reduction <add>, %184, %cst_72 [2] : vector<2x8x12xf32> to vector<2x8xf32>
    %186 = vector.shape_cast %185 : vector<2x8xf32> to vector<2x8x1xf32>
    %187 = tpu.reciprocal %186 {approx = true} : vector<2x8x1xf32> -> vector<2x8x1xf32>
    %188 = vector.broadcast %187 : vector<2x8x1xf32> to vector<2x8x12xf32>
    %189 = arith.mulf %184, %188 : vector<2x8x12xf32>
    "tpu.trace_start"() <{level = 10 : i32, message = "bqk,bkd->bqd"}> : () -> ()
    %cst_73 = arith.constant dense<0.000000e+00> : vector<2x8x8xf32>
    %190 = tpu.matmul %189, %176, %cst_73 {dimension_numbers = #tpu.dot_dimension_numbers<[2], [1], [1], [2], [0, 0, 0, 1, 1, 2], [0], [0]>} : vector<2x8x12xf32>, vector<2x12x8xf32>, vector<2x8x8xf32> -> vector<2x8x8xf32>
    "tpu.trace_stop"() : () -> ()
    %191 = vector.extract_strided_slice %157 {offsets = [0, 0, 16], sizes = [2, 8, 8], strides = [1, 1, 1]} : vector<2x8x32xf32> to vector<2x8x8xf32>
    %192 = vector.extract_strided_slice %158 {offsets = [0, 0, 16], sizes = [2, 12, 8], strides = [1, 1, 1]} : vector<2x12x32xf32> to vector<2x12x8xf32>
    "tpu.trace_start"() <{level = 10 : i32, message = "bqd,bkd->bqk"}> : () -> ()
    %cst_74 = arith.constant dense<0.000000e+00> : vector<2x8x12xf32>
    %193 = tpu.matmul %191, %192, %cst_74 {dimension_numbers = #tpu.dot_dimension_numbers<[2], [2], [1], [1], [0, 0, 0, 1, 1, 1], [0], [0]>} : vector<2x8x8xf32>, vector<2x12x8xf32>, vector<2x8x12xf32> -> vector<2x8x12xf32>
    "tpu.trace_stop"() : () -> ()
    %cst_75 = arith.constant 0.353553385 : f32
    %194 = vector.broadcast %cst_75 : f32 to vector<2x8x12xf32>
    %195 = arith.mulf %193, %194 : vector<2x8x12xf32>
    %cst_76 = arith.constant dense<0xFF800000> : vector<2x8xf32>
    %196 = vector.multi_reduction <maximumf>, %195, %cst_76 [2] : vector<2x8x12xf32> to vector<2x8xf32>
    %197 = vector.shape_cast %196 : vector<2x8xf32> to vector<2x8x1xf32>
    %198 = vector.broadcast %197 : vector<2x8x1xf32> to vector<2x8x12xf32>
    %199 = arith.subf %195, %198 : vector<2x8x12xf32>
    %200 = math.exp %199 : vector<2x8x12xf32>
    %cst_77 = arith.constant dense<0.000000e+00> : vector<2x8xf32>
    %201 = vector.multi_reduction <add>, %200, %cst_77 [2] : vector<2x8x12xf32> to vector<2x8xf32>
    %202 = vector.shape_cast %201 : vector<2x8xf32> to vector<2x8x1xf32>
    %203 = tpu.reciprocal %202 {approx = true} : vector<2x8x1xf32> -> vector<2x8x1xf32>
    %204 = vector.broadcast %203 : vector<2x8x1xf32> to vector<2x8x12xf32>
    %205 = arith.mulf %200, %204 : vector<2x8x12xf32>
    "tpu.trace_start"() <{level = 10 : i32, message = "bqk,bkd->bqd"}> : () -> ()
    %cst_78 = arith.constant dense<0.000000e+00> : vector<2x8x8xf32>
    %206 = tpu.matmul %205, %192, %cst_78 {dimension_numbers = #tpu.dot_dimension_numbers<[2], [1], [1], [2], [0, 0, 0, 1, 1, 2], [0], [0]>} : vector<2x8x12xf32>, vector<2x12x8xf32>, vector<2x8x8xf32> -> vector<2x8x8xf32>
    "tpu.trace_stop"() : () -> ()
    %207 = vector.extract_strided_slice %157 {offsets = [0, 0, 24], sizes = [2, 8, 8], strides = [1, 1, 1]} : vector<2x8x32xf32> to vector<2x8x8xf32>
    %208 = vector.extract_strided_slice %158 {offsets = [0, 0, 24], sizes = [2, 12, 8], strides = [1, 1, 1]} : vector<2x12x32xf32> to vector<2x12x8xf32>
    "tpu.trace_start"() <{level = 10 : i32, message = "bqd,bkd->bqk"}> : () -> ()
    %cst_79 = arith.constant dense<0.000000e+00> : vector<2x8x12xf32>
    %209 = tpu.matmul %207, %208, %cst_79 {dimension_numbers = #tpu.dot_dimension_numbers<[2], [2], [1], [1], [0, 0, 0, 1, 1, 1], [0], [0]>} : vector<2x8x8xf32>, vector<2x12x8xf32>, vector<2x8x12xf32> -> vector<2x8x12xf32>
    "tpu.trace_stop"() : () -> ()
    %cst_80 = arith.constant 0.353553385 : f32
    %210 = vector.broadcast %cst_80 : f32 to vector<2x8x12xf32>
    %211 = arith.mulf %209, %210 : vector<2x8x12xf32>
    %cst_81 = arith.constant dense<0xFF800000> : vector<2x8xf32>
    %212 = vector.multi_reduction <maximumf>, %211, %cst_81 [2] : vector<2x8x12xf32> to vector<2x8xf32>
    %213 = vector.shape_cast %212 : vector<2x8xf32> to vector<2x8x1xf32>
    %214 = vector.broadcast %213 : vector<2x8x1xf32> to vector<2x8x12xf32>
    %215 = arith.subf %211, %214 : vector<2x8x12xf32>
    %216 = math.exp %215 : vector<2x8x12xf32>
    %cst_82 = arith.constant dense<0.000000e+00> : vector<2x8xf32>
    %217 = vector.multi_reduction <add>, %216, %cst_82 [2] : vector<2x8x12xf32> to vector<2x8xf32>
    %218 = vector.shape_cast %217 : vector<2x8xf32> to vector<2x8x1xf32>
    %219 = tpu.reciprocal %218 {approx = true} : vector<2x8x1xf32> -> vector<2x8x1xf32>
    %220 = vector.broadcast %219 : vector<2x8x1xf32> to vector<2x8x12xf32>
    %221 = arith.mulf %216, %220 : vector<2x8x12xf32>
    "tpu.trace_start"() <{level = 10 : i32, message = "bqk,bkd->bqd"}> : () -> ()
    %cst_83 = arith.constant dense<0.000000e+00> : vector<2x8x8xf32>
    %222 = tpu.matmul %221, %208, %cst_83 {dimension_numbers = #tpu.dot_dimension_numbers<[2], [1], [1], [2], [0, 0, 0, 1, 1, 2], [0], [0]>} : vector<2x8x12xf32>, vector<2x12x8xf32>, vector<2x8x8xf32> -> vector<2x8x8xf32>
    "tpu.trace_stop"() : () -> ()
    %223 = tpu.concatenate %174, %190, %206, %222 in 2 : vector<2x8x8xf32>, vector<2x8x8xf32>, vector<2x8x8xf32>, vector<2x8x8xf32> -> vector<2x8x32xf32>
    %224 = vector.shape_cast %223 : vector<2x8x32xf32> to vector<16x32xf32>
    %c0_84 = arith.constant 0 : index
    %c0_85 = arith.constant 0 : index
    %225 = vector.load %arg15[%c0_84, %c0_85] : memref<32x32xf32, #tpu.memory_space<vmem>>, vector<32x32xf32>
    %c0_86 = arith.constant 0 : index
    %c0_87 = arith.constant 0 : index
    %226 = vector.load %arg16[%c0_86, %c0_87] : memref<1x32xf32, #tpu.memory_space<vmem>>, vector<1x32xf32>
    %cst_88 = arith.constant dense<0.000000e+00> : vector<16x32xf32>
    %227 = tpu.matmul %224, %225, %cst_88 {dimension_numbers = #tpu.dot_dimension_numbers<[1], [0], [0], [1], [0, 0, 1, 1], [], []>} : vector<16x32xf32>, vector<32x32xf32>, vector<16x32xf32> -> vector<16x32xf32>
    %228 = vector.broadcast %226 : vector<1x32xf32> to vector<16x32xf32>
    %229 = arith.addf %227, %228 : vector<16x32xf32>
    %230 = arith.addf %124, %229 : vector<16x32xf32>
    %c0_89 = arith.constant 0 : index
    %c0_90 = arith.constant 0 : index
    %231 = vector.load %arg17[%c0_89, %c0_90] : memref<1x32xf32, #tpu.memory_space<vmem>>, vector<1x32xf32>
    %c0_91 = arith.constant 0 : index
    %c0_92 = arith.constant 0 : index
    %232 = vector.load %arg18[%c0_91, %c0_92] : memref<1x32xf32, #tpu.memory_space<vmem>>, vector<1x32xf32>
    %cst_93 = arith.constant dense<0.000000e+00> : vector<16xf32>
    %233 = vector.multi_reduction <add>, %230, %cst_93 [1] : vector<16x32xf32> to vector<16xf32>
    %234 = vector.shape_cast %233 : vector<16xf32> to vector<16x1xf32>
    %cst_94 = arith.constant 3.200000e+01 : f32
    %235 = vector.broadcast %cst_94 : f32 to vector<16x1xf32>
    %236 = arith.divf %234, %235 : vector<16x1xf32>
    %237 = vector.broadcast %236 : vector<16x1xf32> to vector<16x32xf32>
    %238 = arith.subf %230, %237 : vector<16x32xf32>
    %239 = arith.mulf %238, %238 : vector<16x32xf32>
    %cst_95 = arith.constant dense<0.000000e+00> : vector<16xf32>
    %240 = vector.multi_reduction <add>, %239, %cst_95 [1] : vector<16x32xf32> to vector<16xf32>
    %241 = vector.shape_cast %240 : vector<16xf32> to vector<16x1xf32>
    %cst_96 = arith.constant 3.100000e+01 : f32
    %242 = vector.broadcast %cst_96 : f32 to vector<16x1xf32>
    %243 = arith.divf %241, %242 : vector<16x1xf32>
    %244 = math.sqrt %243 : vector<16x1xf32>
    %cst_97 = arith.constant 9.99999997E-7 : f32
    %245 = vector.broadcast %cst_97 : f32 to vector<16x1xf32>
    %246 = arith.addf %244, %245 : vector<16x1xf32>
    %247 = vector.broadcast %246 : vector<16x1xf32> to vector<16x32xf32>
    %248 = arith.divf %238, %247 : vector<16x32xf32>
    %249 = vector.broadcast %231 : vector<1x32xf32> to vector<16x32xf32>
    %250 = arith.mulf %249, %248 : vector<16x32xf32>
    %251 = vector.broadcast %232 : vector<1x32xf32> to vector<16x32xf32>
    %252 = arith.addf %250, %251 : vector<16x32xf32>
    %c0_98 = arith.constant 0 : index
    %c0_99 = arith.constant 0 : index
    %253 = vector.load %arg19[%c0_98, %c0_99] : memref<32x64xf32, #tpu.memory_space<vmem>>, vector<32x64xf32>
    %c0_100 = arith.constant 0 : index
    %c0_101 = arith.constant 0 : index
    %254 = vector.load %arg20[%c0_100, %c0_101] : memref<1x64xf32, #tpu.memory_space<vmem>>, vector<1x64xf32>
    %cst_102 = arith.constant dense<0.000000e+00> : vector<16x64xf32>
    %255 = tpu.matmul %252, %253, %cst_102 {dimension_numbers = #tpu.dot_dimension_numbers<[1], [0], [0], [1], [0, 0, 1, 1], [], []>} : vector<16x32xf32>, vector<32x64xf32>, vector<16x64xf32> -> vector<16x64xf32>
    %256 = vector.broadcast %254 : vector<1x64xf32> to vector<16x64xf32>
    %257 = arith.addf %255, %256 : vector<16x64xf32>
    %cst_103 = arith.constant 0.000000e+00 : f32
    %258 = vector.broadcast %cst_103 : f32 to vector<16x64xf32>
    %259 = arith.maximumf %257, %258 : vector<16x64xf32>
    %c0_104 = arith.constant 0 : index
    %c0_105 = arith.constant 0 : index
    %260 = vector.load %arg21[%c0_104, %c0_105] : memref<64x32xf32, #tpu.memory_space<vmem>>, vector<64x32xf32>
    %c0_106 = arith.constant 0 : index
    %c0_107 = arith.constant 0 : index
    %261 = vector.load %arg22[%c0_106, %c0_107] : memref<1x32xf32, #tpu.memory_space<vmem>>, vector<1x32xf32>
    %cst_108 = arith.constant dense<0.000000e+00> : vector<16x32xf32>
    %262 = tpu.matmul %259, %260, %cst_108 {dimension_numbers = #tpu.dot_dimension_numbers<[1], [0], [0], [1], [0, 0, 1, 1], [], []>} : vector<16x64xf32>, vector<64x32xf32>, vector<16x32xf32> -> vector<16x32xf32>
    %263 = vector.broadcast %261 : vector<1x32xf32> to vector<16x32xf32>
    %264 = arith.addf %262, %263 : vector<16x32xf32>
    %265 = arith.addf %230, %264 : vector<16x32xf32>
    %c0_109 = arith.constant 0 : index
    %c0_110 = arith.constant 0 : index
    %266 = vector.load %arg23[%c0_109, %c0_110] : memref<1x32xf32, #tpu.memory_space<vmem>>, vector<1x32xf32>
    %c0_111 = arith.constant 0 : index
    %c0_112 = arith.constant 0 : index
    %267 = vector.load %arg24[%c0_111, %c0_112] : memref<1x32xf32, #tpu.memory_space<vmem>>, vector<1x32xf32>
    %cst_113 = arith.constant dense<0.000000e+00> : vector<16xf32>
    %268 = vector.multi_reduction <add>, %265, %cst_113 [1] : vector<16x32xf32> to vector<16xf32>
    %269 = vector.shape_cast %268 : vector<16xf32> to vector<16x1xf32>
    %cst_114 = arith.constant 3.200000e+01 : f32
    %270 = vector.broadcast %cst_114 : f32 to vector<16x1xf32>
    %271 = arith.divf %269, %270 : vector<16x1xf32>
    %272 = vector.broadcast %271 : vector<16x1xf32> to vector<16x32xf32>
    %273 = arith.subf %265, %272 : vector<16x32xf32>
    %274 = arith.mulf %273, %273 : vector<16x32xf32>
    %cst_115 = arith.constant dense<0.000000e+00> : vector<16xf32>
    %275 = vector.multi_reduction <add>, %274, %cst_115 [1] : vector<16x32xf32> to vector<16xf32>
    %276 = vector.shape_cast %275 : vector<16xf32> to vector<16x1xf32>
    %cst_116 = arith.constant 3.100000e+01 : f32
    %277 = vector.broadcast %cst_116 : f32 to vector<16x1xf32>
    %278 = arith.divf %276, %277 : vector<16x1xf32>
    %279 = math.sqrt %278 : vector<16x1xf32>
    %cst_117 = arith.constant 9.99999997E-7 : f32
    %280 = vector.broadcast %cst_117 : f32 to vector<16x1xf32>
    %281 = arith.addf %279, %280 : vector<16x1xf32>
    %282 = vector.broadcast %281 : vector<16x1xf32> to vector<16x32xf32>
    %283 = arith.divf %273, %282 : vector<16x32xf32>
    %284 = vector.broadcast %266 : vector<1x32xf32> to vector<16x32xf32>
    %285 = arith.mulf %284, %283 : vector<16x32xf32>
    %286 = vector.broadcast %267 : vector<1x32xf32> to vector<16x32xf32>
    %287 = arith.addf %285, %286 : vector<16x32xf32>
    %c0_118 = arith.constant 0 : index
    %c0_119 = arith.constant 0 : index
    %288 = vector.load %arg25[%c0_118, %c0_119] : memref<16x32xf32, #tpu.memory_space<vmem>>, vector<16x32xf32>
    tpu.vector_store %arg25[%c0_118, %c0_119], %287 {strides = array<i32>} : memref<16x32xf32, #tpu.memory_space<vmem>>, vector<16x32xf32>,
    return
  }
  func.func @transform_0(%arg0: i32) -> (i32, i32) {
    %c0_i32 = arith.constant 0 : i32
    %c0_i32_0 = arith.constant 0 : i32
    %c0_i32_1 = arith.constant 0 : i32
    return %c0_i32, %c0_i32_0 : i32, i32
  }
  func.func @transform_1(%arg0: i32) -> (i32, i32) {
    %c0_i32 = arith.constant 0 : i32
    %c0_i32_0 = arith.constant 0 : i32
    %c0_i32_1 = arith.constant 0 : i32
    return %c0_i32, %c0_i32_0 : i32, i32
  }
  func.func @transform_2(%arg0: i32) -> (i32, i32) {
    %c0_i32 = arith.constant 0 : i32
    %c0_i32_0 = arith.constant 0 : i32
    %c0_i32_1 = arith.constant 0 : i32
    return %c0_i32, %c0_i32_0 : i32, i32
  }
  func.func @transform_3(%arg0: i32) -> (i32, i32) {
    %c0_i32 = arith.constant 0 : i32
    %c0_i32_0 = arith.constant 0 : i32
    %c0_i32_1 = arith.constant 0 : i32
    return %c0_i32, %c0_i32_0 : i32, i32
  }
  func.func @transform_4(%arg0: i32) -> (i32, i32) {
    %c0_i32 = arith.constant 0 : i32
    %c0_i32_0 = arith.constant 0 : i32
    %c0_i32_1 = arith.constant 0 : i32
    return %c0_i32, %c0_i32_0 : i32, i32
  }
  func.func @transform_5(%arg0: i32) -> (i32, i32) {
    %c0_i32 = arith.constant 0 : i32
    %c0_i32_0 = arith.constant 0 : i32
    %c0_i32_1 = arith.constant 0 : i32
    return %c0_i32, %c0_i32_0 : i32, i32
  }
  func.func @transform_6(%arg0: i32) -> (i32, i32) {
    %c0_i32 = arith.constant 0 : i32
    %c0_i32_0 = arith.constant 0 : i32
    %c0_i32_1 = arith.constant 0 : i32
    return %c0_i32, %c0_i32_0 : i32, i32
  }
  func.func @transform_7(%arg0: i32) -> (i32, i32) {
    %c0_i32 = arith.constant 0 : i32
    %c0_i32_0 = arith.constant 0 : i32
    %c0_i32_1 = arith.constant 0 : i32
    return %c0_i32, %c0_i32_0 : i32, i32
  }
  func.func @transform_8(%arg0: i32) -> (i32, i32) {
    %c0_i32 = arith.constant 0 : i32
    %c0_i32_0 = arith.constant 0 : i32
    %c0_i32_1 = arith.constant 0 : i32
    return %c0_i32, %c0_i32_0 : i32, i32
  }
  func.func @transform_9(%arg0: i32) -> (i32, i32) {
    %c0_i32 = arith.constant 0 : i32
    %c0_i32_0 = arith.constant 0 : i32
    %c0_i32_1 = arith.constant 0 : i32
    return %c0_i32, %c0_i32_0 : i32, i32
  }
  func.func @transform_10(%arg0: i32) -> (i32, i32) {
    %c0_i32 = arith.constant 0 : i32
    %c0_i32_0 = arith.constant 0 : i32
    %c0_i32_1 = arith.constant 0 : i32
    return %c0_i32, %c0_i32_0 : i32, i32
  }
  func.func @transform_11(%arg0: i32) -> (i32, i32) {
    %c0_i32 = arith.constant 0 : i32
    %c0_i32_0 = arith.constant 0 : i32
    %c0_i32_1 = arith.constant 0 : i32
    return %c0_i32, %c0_i32_0 : i32, i32
  }
  func.func @transform_12(%arg0: i32) -> (i32, i32) {
    %c0_i32 = arith.constant 0 : i32
    %c0_i32_0 = arith.constant 0 : i32
    %c0_i32_1 = arith.constant 0 : i32
    return %c0_i32, %c0_i32_0 : i32, i32
  }
  func.func @transform_13(%arg0: i32) -> (i32, i32) {
    %c0_i32 = arith.constant 0 : i32
    %c0_i32_0 = arith.constant 0 : i32
    %c0_i32_1 = arith.constant 0 : i32
    return %c0_i32, %c0_i32_0 : i32, i32
  }
  func.func @transform_14(%arg0: i32) -> (i32, i32) {
    %c0_i32 = arith.constant 0 : i32
    %c0_i32_0 = arith.constant 0 : i32
    %c0_i32_1 = arith.constant 0 : i32
    return %c0_i32, %c0_i32_0 : i32, i32
  }
  func.func @transform_15(%arg0: i32) -> (i32, i32) {
    %c0_i32 = arith.constant 0 : i32
    %c0_i32_0 = arith.constant 0 : i32
    %c0_i32_1 = arith.constant 0 : i32
    return %c0_i32, %c0_i32_0 : i32, i32
  }
  func.func @transform_16(%arg0: i32) -> (i32, i32) {
    %c0_i32 = arith.constant 0 : i32
    %c0_i32_0 = arith.constant 0 : i32
    %c0_i32_1 = arith.constant 0 : i32
    return %c0_i32, %c0_i32_0 : i32, i32
  }
  func.func @transform_17(%arg0: i32) -> (i32, i32) {
    %c0_i32 = arith.constant 0 : i32
    %c0_i32_0 = arith.constant 0 : i32
    %c0_i32_1 = arith.constant 0 : i32
    return %c0_i32, %c0_i32_0 : i32, i32
  }
  func.func @transform_18(%arg0: i32) -> (i32, i32) {
    %c0_i32 = arith.constant 0 : i32
    %c0_i32_0 = arith.constant 0 : i32
    %c0_i32_1 = arith.constant 0 : i32
    return %c0_i32, %c0_i32_0 : i32, i32
  }
  func.func @transform_19(%arg0: i32) -> (i32, i32) {
    %c0_i32 = arith.constant 0 : i32
    %c0_i32_0 = arith.constant 0 : i32
    %c0_i32_1 = arith.constant 0 : i32
    return %c0_i32, %c0_i32_0 : i32, i32
  }
  func.func @transform_20(%arg0: i32) -> (i32, i32) {
    %c0_i32 = arith.constant 0 : i32
    %c0_i32_0 = arith.constant 0 : i32
    %c0_i32_1 = arith.constant 0 : i32
    return %c0_i32, %c0_i32_0 : i32, i32
  }
  func.func @transform_21(%arg0: i32) -> (i32, i32) {
    %c0_i32 = arith.constant 0 : i32
    %c0_i32_0 = arith.constant 0 : i32
    %c0_i32_1 = arith.constant 0 : i32
    return %c0_i32, %c0_i32_0 : i32, i32
  }
  func.func @transform_22(%arg0: i32) -> (i32, i32) {
    %c0_i32 = arith.constant 0 : i32
    %c0_i32_0 = arith.constant 0 : i32
    %c0_i32_1 = arith.constant 0 : i32
    return %c0_i32, %c0_i32_0 : i32, i32
  }
  func.func @transform_23(%arg0: i32) -> (i32, i32) {
    %c0_i32 = arith.constant 0 : i32
    %c0_i32_0 = arith.constant 0 : i32
    %c0_i32_1 = arith.constant 0 : i32
    return %c0_i32, %c0_i32_0 : i32, i32
  }
  func.func @transform_24(%arg0: i32) -> (i32, i32) {
    %c0_i32 = arith.constant 0 : i32
    %c0_i32_0 = arith.constant 0 : i32
    %c0_i32_1 = arith.constant 0 : i32
    return %c0_i32, %c0_i32_0 : i32, i32
  }
}

</mosaic_0001>

<bundles_post_ra>
// kernel: _model_decoder_forward.3
= control target key start
LH: loop header
LB: loop body
LE: loop exit
PB: predicated region body
PF: predicated region fallthrough
CT: control target
= control target key end

     0   :  { %vm34_vm0 = vcmask 1043456   ;;  %vm27_vm1 = vcmask 31744   ;;  %vm119_vm2 = vcmask 261120   ;;  %s187_s1 = inlined_call_operand.vmem [shape: f32[4,32], index: 1, kind: input, shape index: {}]   ;;  %s188_s0 = inlined_call_operand.vmem [shape: f32[16,4], index: 0, kind: input, shape index: {}]   ;;  %s189_s2 = inlined_call_operand.vmem [shape: f32[1,32], index: 2, kind: input, shape index: {}]   ;;  %s190_s3 = inlined_call_operand.vmem [shape: f32[16,32], index: 3, kind: input, shape index: {}]   ;;  %s191_s4 = inlined_call_operand.vmem [shape: f32[16,32], index: 4, kind: output, shape index: {}]  }
   0x1   :  { %v19_v0 = vld [vmem:[%s187_s1] sm:$0xf]  ;;  %v18_v2 = vld [vmem:[%s188_s0 + $0x8] sm:$0xff] }
   0x2   :  { %v17_v1 = vld [vmem:[%s188_s0] sm:$0xff]  ;;  %133 = vmatprep.subr.msk.mxu0 %vm34_vm0, %v19_v0  ;;  %v116_v7 = vld [vmem:[%s190_s3 + $0x8] sm:$0xff] }
   0x3   :  { %135 = vmatprep.mubr.msk.f32.mxu0 %vm27_vm1, %v17_v1  ;;  %134 = vmatpush3.msk.msra.mxu0 %vm34_vm0, %v19_v0  ;;  %v126_v3 = vld [vmem:[%s189_s2] ss:$0 sm:$0xff] }
   0x4   :  { %136 = vmatmul.mubr.msk.f32.vlgmr.msra.gmra.mrb[0].mxu0 %vm27_vm1, %v18_v2  ;;  %v115_v10 = vld [vmem:[%s190_s3] sm:$0xff] }
  0xd7   :  { %v137_v4 = vpop.f32.mrb[0].mxu0 }
  0xd8   :  { %v110_v5 = vadd.f32 %v137_v4, %v126_v3  ;;  %v104_v6 = vpop.f32.mrb[1].mxu0 }
  0xd9   :  { %v105_v8 = vadd.f32 %v126_v3, %v104_v6 }
  0xda   :  { %v114_v9 = vmul.f32 5.656854, %v110_v5 }
  0xdb   :  { %v113_v11 = vmul.f32 5.656854, %v105_v8 }
  0xdc   :  { %v118_v12 = vadd.f32 %v116_v7, %v114_v9 }
  0xdd   :  { %v117_v13 = vadd.f32 %v115_v10, %v113_v11 }
  0xde   :  { %121 = vst.msk [vmem:[%s191_s4 + $0x8] sm:$0xff] %vm119_vm2, %v118_v12 }
  0xdf   :  { %120 = vst.msk [vmem:[%s191_s4] sm:$0xff] %vm119_vm2, %v117_v13 }

// kernel: _model_decoder_forward.4
= control target key start
LH: loop header
LB: loop body
LE: loop exit
PB: predicated region body
PF: predicated region fallthrough
CT: control target
= control target key end

     0   :  { %vm78_vm0 = vcmask 261120   ;;  %v4432_v46 = vmov 0.0   ;;  %vm4433_vm5 = vmmov 0   ;;  %vm237_vm6 = vcmask 64512   ;;  %s4435_s24 = smov 88   ;;  %s4437_s25 = smov 80   ;;  %s5135_s0 = inlined_call_operand.vmem [shape: f32[16,32], index: 0, kind: input, shape index: {}]   ;;  %s5136_s4 = inlined_call_operand.vmem [shape: f32[32,64], index: 4, kind: input, shape index: {}]   ;;  %s5137_s2 = inlined_call_operand.vmem [shape: f32[1,32], index: 2, kind: input, shape index: {}]   ;;  %s5138_s3 = inlined_call_operand.vmem [shape: f32[1,32], index: 3, kind: input, shape index: {}]   ;;  %s5139_s5 = inlined_call_operand.vmem [shape: f32[1,64], index: 5, kind: input, shape index: {}]   ;;  %s5140_s6 = inlined_call_operand.vmem [shape: f32[32,32], index: 6, kind: input, shape index: {}]   ;;  %s5141_s7 = inlined_call_operand.vmem [shape: f32[1,32], index: 7, kind: input, shape index: {}]   ;;  %s5142_s12 = inlined_call_operand.vmem [shape: f32[32,32], index: 12, kind: input, shape index: {}]   ;;  %s5143_s1 = inlined_call_operand.vmem [shape: f32[24,32], index: 1, kind: input, shape index: {}]   ;;  %s5144_s10 = inlined_call_operand.vmem [shape: f32[32,32], index: 10, kind: input, shape index: {}]   ;;  %s5145_s8 = inlined_call_operand.vmem [shape: f32[1,32], index: 8, kind: input, shape index: {}]   ;;  %s5146_s9 = inlined_call_operand.vmem [shape: f32[1,32], index: 9, kind: input, shape index: {}]   ;;  %s5147_s13 = inlined_call_operand.vmem [shape: f32[1,32], index: 13, kind: input, shape index: {}]   ;;  %s5148_s11 = inlined_call_operand.vmem [shape: f32[1,32], index: 11, kind: input, shape index: {}]   ;;  %s5149_s14 = inlined_call_operand.vmem [shape: f32[32,32], index: 14, kind: input, shape index: {}]   ;;  %s5150_s15 = inlined_call_operand.vmem [shape: f32[1,32], index: 15, kind: input, shape index: {}]   ;;  %s5151_s18 = inlined_call_operand.vmem [shape: f32[32,64], index: 18, kind: input, shape index: {}]   ;;  %s5152_s20 = inlined_call_operand.vmem [shape: f32[64,32], index: 20, kind: input, shape index: {}]   ;;  %s5153_s16 = inlined_call_operand.vmem [shape: f32[1,32], index: 16, kind: input, shape index: {}]   ;;  %s5154_s17 = inlined_call_operand.vmem [shape: f32[1,32], index: 17, kind: input, shape index: {}]   ;;  %s5155_s19 = inlined_call_operand.vmem [shape: f32[1,64], index: 19, kind: input, shape index: {}]   ;;  %s5156_s21 = inlined_call_operand.vmem [shape: f32[1,32], index: 21, kind: input, shape index: {}]   ;;  %s5157_s22 = inlined_call_operand.vmem [shape: f32[16,32], index: 22, kind: output, shape index: {}]  }
   0x1   :  { %5163 = sst [smem:[#allocation2_spill]] %s5135_s0  ;;  %3912 = vmatprep.subr.mxu0 %v4432_v46  ;;  %3914 = vmatprep.mubr.msk.f32.mxu0 %vm4433_vm5, %v4432_v46  ;;  %v229_v54 = vlaneseq  ;;  %s4438_s26 = smov 112   ;;  %vm1584_vm8 = vcmask 195584   ;;  %vm1581_vm9 = vcmask 130048   ;;  %vm2122_vm14 = vcmask 1043456   ;;  %vm4864_vm15 = vmpackc.low %vm237_vm6, %vm237_vm6 }
   0x2   :  { %5164 = sst [smem:[#allocation3_spill]] %s5136_s4  ;;  %s5170_s29 = sld [smem:[#allocation2_spill]] }
   0x3   :  { %5165 = sst [smem:[#allocation4_spill]] %s5137_s2  ;;  %s5171_s4 = sld [smem:[#allocation3_spill]]  ;;  %v230_v55 = vshrl.u32 %v229_v54, 7  ;;  %v232_v56 = vand.u32 127, %v229_v54 }
   0x4   :  { %5166 = sst [smem:[#allocation5_spill]] %s5138_s3  ;;  %s5172_s28 = sld [smem:[#allocation4_spill]] }
   0x5   :  { %5167 = sst [smem:[#allocation6_spill]] %s5139_s5  ;;  %s5173_s5 = sld [smem:[#allocation5_spill]]  ;;  %vm4628_vm7 = vcmp.ge.s32.totalorder %v230_v55, %v232_v56 }
   0x6   :  { %5168 = sst [smem:[#allocation7_spill]] %s5140_s6  ;;  %s4434_s6 = smov 96  }
   0x7   :  { %5169 = sst [smem:[#allocation8_spill]] %s5141_s7  ;;  %s4436_s7 = smov 120  }
   0x8   :  { %v4564_v0 = vld [vmem:[%s5170_s29] sm:$0xff]  ;;  %v4569_v1 = vld [vmem:[%s5170_s29 + $0x8] sm:$0xff]  ;;  %s4439_s2 = smov 72   ;;  %s4440_s27 = smov 104  }
   0x9   :  { %v79_v2 = vsel %vm78_vm0, %v4564_v0, 0.0  ;;  %v82_v3 = vsel %vm78_vm0, %v4569_v1, 0.0  ;;  %v137_v14 = vld [vmem:[%s5171_s4] sm:$0xff]  ;;  %v138_v15 = vld [vmem:[%s5171_s4 + $0x8] sm:$0xff]  ;;  %v139_v16 = vld [vmem:[%s5171_s4 + $0x10] sm:$0xff]  ;;  %s4441_s3 = smov 8  }
   0xa   :  { %80 = vadd.xlane.f32.xlu0 %v79_v2  ;;  %v4174_v17 = vpack.c.bf16 %v138_v15, %v137_v14  ;;  %v140_v18 = vld [vmem:[%s5171_s4 + $0x18] sm:$0xff]  ;;  %v3672_v37 = vld [vmem:[%s5172_s28] ss:$0 sm:$0xff]  ;;  %s5174_s4 = sld [smem:[#allocation6_spill]]  ;;  %s4442_s28 = smov 16  }
   0xb   :  { %v4178_v19 = vpack.c.bf16 %v140_v18, %v139_v16  ;;  %v3673_v39 = vld [vmem:[%s5173_s5] ss:$0 sm:$0xff]  ;;  %s5177_s5 = sld [smem:[#allocation7_spill]] }
   0xc   :  { %4175 = vmatprep.subr.bf16.mxu1 %v4174_v17 }
   0xd   :  { %4177 = vmatpush3.bf16.msra.mxu1 %v4174_v17 }
   0xe   :  { %83 = vadd.xlane.f32.xlu0 %v82_v3  ;;  %4179 = vmatprep.subr.bf16.mxu1 %v4178_v19 }
  0x10   :  { %v3674_v47 = vld [vmem:[%s5174_s4] ss:$0 sm:$0xff] }
  0x11   :  { %4181 = vmatpush3.bf16.msra.mxu1 %v4178_v19 }
  0x12   :  { %3902 = vmatprep.subr.mxu1 %v4432_v46 }
  0x97   :  { %v81_v4 = vpop.xlane.xlu0 %80 }
  0x98   :  { %v86_v5 = vmul.f32 0.03125, %v81_v4 }
  0x9a   :  { %v88_v6 = vsub.f32 %v4564_v0, %v86_v5 }
  0x9b   :  { %v84_v7 = vpop.xlane.xlu0 %83 }
  0x9c   :  { %v87_v8 = vmul.f32 0.03125, %v84_v7  ;;  %v90_v9 = vmul.f32 %v88_v6, %v88_v6 }
  0x9e   :  { %v89_v10 = vsub.f32 %v4569_v1, %v87_v8  ;;  %v92_v11 = vsel %vm78_vm0, %v90_v9, 0.0 }
  0x9f   :  { %93 = vadd.xlane.f32.xlu1 %v92_v11 }
  0xa0   :  { %v91_v12 = vmul.f32 %v89_v10, %v89_v10 }
  0xa2   :  { %v95_v13 = vsel %vm78_vm0, %v91_v12, 0.0 }
  0xa3   :  { %96 = vadd.xlane.f32.xlu1 %v95_v13 }
 0x12c   :  { %v94_v20 = vpop.xlane.xlu1 %93 }
 0x12d   :  { %v99_v21 = vmul.f32 0.032258064, %v94_v20 }
 0x12f   :  { %4344 = vrsqrt.f32 %v99_v21  ;;  %vm103_vm1 = vcmp.eq.f32.partialorder %v99_v21, inf  ;;  %v106_v26 = vand.u32 2147483648, %v99_v21  ;;  %vm105_vm2 = vcmp.eq.f32.partialorder %v99_v21, 0.0 }
 0x130   :  { %v97_v22 = vpop.xlane.xlu1 %96 }
 0x131   :  { %v100_v23 = vmul.f32 0.032258064, %v97_v22 }
 0x133   :  { %4346 = vrsqrt.f32 %v100_v23  ;;  %vm110_vm3 = vcmp.eq.f32.partialorder %v100_v23, inf  ;;  %v113_v32 = vand.u32 2147483648, %v100_v23  ;;  %vm112_vm4 = vcmp.eq.f32.partialorder %v100_v23, 0.0 }
 0x139   :  { %v4345_v24 = vpop.eup %4344 }
 0x13a   :  { %v102_v25 = vmul.f32 %v4345_v24, %v99_v21 }
 0x13c   :  { %v104_v27 = vsel %vm103_vm1, %v99_v21, %v102_v25  ;;  %vm4445_vm1 = vmmov 1  }
 0x13d   :  { %v4347_v28 = vpop.eup %4346  ;;  %v107_v29 = vsel %vm105_vm2, %v106_v26, %v104_v27  ;;  %vm4868_vm2 = vmpackc.low %vm2122_vm14, %vm4445_vm1 }
 0x13e   :  { %v109_v30 = vmul.f32 %v4347_v28, %v100_v23  ;;  %v115_v31 = vadd.f32 1e-06, %v107_v29 }
 0x140   :  { %v111_v33 = vsel %vm110_vm3, %v100_v23, %v109_v30  ;;  %4348 = vrcp.f32 %v115_v31  ;;  %vm2095_vm3 = vcmask 97280  }
 0x141   :  { %v114_v34 = vsel %vm112_vm4, %v113_v32, %v111_v33 }
 0x142   :  { %v116_v35 = vadd.f32 1e-06, %v114_v34 }
 0x144   :  { %4350 = vrcp.f32 %v116_v35 }
 0x14a   :  { %v4349_v36 = vpop.eup %4348 }
 0x14b   :  { %v118_v38 = vmul.f32 %v4349_v36, %v88_v6 }
 0x14d   :  { %v127_v40 = vmul.f32 %v3672_v37, %v118_v38 }
 0x14e   :  { %v4351_v41 = vpop.eup %4350 }
 0x14f   :  { %v120_v42 = vmul.f32 %v4351_v41, %v89_v10  ;;  %v135_v43 = vadd.f32 %v3673_v39, %v127_v40 }
 0x151   :  { %v128_v44 = vmul.f32 %v3672_v37, %v120_v42  ;;  %3899 = vmatprep.mubr.msk.f32.mxu1 %vm78_vm0, %v135_v43 }
 0x153   :  { %v136_v45 = vadd.f32 %v3673_v39, %v128_v44 }
 0x155   :  { %3900 = vmatmul.mubr.msk.f32.vlgmr.msra.gmra.mrb[0].mxu1 %vm78_vm0, %v136_v45 }
 0x156   :  { %3904 = vmatprep.mubr.msk.f32.mxu1 %vm4433_vm5, %v4432_v46 }
 0x228   :  { %v3901_v48 = vpop.f32.mrb[0].mxu1 }
 0x229   :  { %v4608_v49 = vadd.f32 %v3901_v48, %v3674_v47  ;;  %v220_v50 = vpop.f32.mrb[1].mxu1 }
 0x22a   :  { %v4610_v51 = vadd.f32 %v3674_v47, %v220_v50 }
 0x22b   :  { %313 = vrot.lane.b32.xlu1 %v4608_v49, %s4434_s6 }
 0x22c   :  { %235 = vrot.lane.b32.xlu0 %v4610_v51, %s4434_s6 }
 0x29d   :  { %v314_v53 = vpop.permute.xlu1 %313 }
 0x29e   :  { %v236_v52 = vpop.permute.xlu0 %235 }
 0x29f   :  { %3903 = vmatpush3.xpose.msk.msra.mxu1 %vm237_vm6, %v236_v52  ;;  %3913 = vmatpush3.msra.mxu0 %v236_v52 }
 0x2a0   :  { %3907 = vmatprep.subr.mxu1 %v4432_v46  ;;  %3922 = vmatprep.subr.mxu0 %v4432_v46 }
 0x2a2   :  { %3905 = vmatmul.mubr.msk.f32.vlgmr.msra.gmra.mrb[2].mxu1 %vm237_vm6, %v4610_v51 }
 0x2a3   :  { %3908 = vmatpush3.xpose.msk.msra.mxu1 %vm237_vm6, %v314_v53  ;;  %3909 = vmatprep.mubr.msk.f32.mxu1 %vm4433_vm5, %v4432_v46 }
 0x2a4   :  { %3917 = vmatprep.subr.mxu1 %v4432_v46 }
 0x2a6   :  { %3910 = vmatmul.mubr.msk.f32.vlgmr.msra.gmra.mrb[4].mxu1 %vm237_vm6, %v4608_v49 }
 0x2a7   :  { %3918 = vmatpush3.msra.mxu1 %v314_v53  ;;  %3919 = vmatprep.mubr.msk.f32.mxu1 %vm4433_vm5, %v4432_v46 }
 0x2a8   :  { %3927 = vmatprep.subr.mxu1 %v4432_v46 }
 0x375   :  { %v308_v57 = vpop.f32.mrb[2].mxu1 }
 0x376   :  { %v389_v59 = vmul.f32 0.35355338, %v308_v57  ;;  %v3906_v60 = vpop.f32.mrb[3].mxu1 }
 0x378   :  { %v393_v61 = vsel %vm4628_vm7, %v389_v59, -1e+30 }
 0x379   :  { %v385_v62 = vpop.f32.mrb[4].mxu1  ;;  %v395_v63 = vsel %vm237_vm6, %v393_v61, -inf }
 0x37a   :  { %v390_v2 = vmul.f32 0.35355338, %v385_v62  ;;  %396 = vmax.xlane.f32.xlu1 %v395_v63  ;;  %v3911_v3 = vpop.f32.mrb[5].mxu1 }
 0x37c   :  { %v394_v4 = vsel %vm4628_vm7, %v390_v2, -1e+30 }
 0x37d   :  { %v398_v5 = vsel %vm237_vm6, %v394_v4, -inf }
 0x37e   :  { %399 = vmax.xlane.f32.xlu0 %v398_v5 }
 0x38b   :  { %645 = vrot.lane.b32.xlu1 %v4608_v49, %s4435_s24 }
 0x38f   :  { %565 = vrot.lane.b32.xlu1 %v4610_v51, %s4436_s7 }
 0x407   :  { %v397_v6 = vpop.xlane.xlu1 %396 }
 0x408   :  { %v401_v7 = vsub.f32 %v393_v61, %v397_v6 }
 0x40a   :  { %v403_v8 = vmul.f32 1.442695, %v401_v7 }
 0x40b   :  { %v400_v9 = vpop.xlane.xlu0 %399  ;;  %v646_v16 = vpop.permute.xlu1 %645 }
 0x40c   :  { %4352 = vpow2.f32 %v403_v8  ;;  %v402_v10 = vsub.f32 %v394_v4, %v400_v9 }
 0x40e   :  { %v405_v11 = vmul.f32 1.442695, %v402_v10 }
 0x40f   :  { %v566_v17 = vpop.permute.xlu1 %565 }
 0x410   :  { %4354 = vpow2.f32 %v405_v11 }
 0x416   :  { %v4353_v12 = vpop.eup %4352 }
 0x417   :  { %v407_v13 = vsel %vm237_vm6, %v4353_v12, 0.0 }
 0x418   :  { %408 = vadd.xlane.f32.xlu0 %v407_v13 }
 0x41a   :  { %v4355_v14 = vpop.eup %4354 }
 0x41b   :  { %v410_v15 = vsel %vm237_vm6, %v4355_v14, 0.0 }
 0x41c   :  { %411 = vadd.xlane.f32.xlu1 %v410_v15 }
 0x42d   :  { %643 = vrot.lane.b32.xlu1 %v4608_v49, %s4436_s7 }
 0x42e   :  { %567 = vrot.lane.b32.xlu0 %v4610_v51, %s4435_s24 }
 0x4a5   :  { %v409_v18 = vpop.xlane.xlu0 %408 }
 0x4a6   :  { %4356 = vrcp.f32 %v409_v18 }
 0x4a9   :  { %v412_v19 = vpop.xlane.xlu1 %411  ;;  %v568_v22 = vpop.permute.xlu0 %567 }
 0x4aa   :  { %4358 = vrcp.f32 %v412_v19 }
 0x4ad   :  { %v644_v25 = vpop.permute.xlu1 %643 }
 0x4b0   :  { %v4357_v20 = vpop.eup %4356 }
 0x4b1   :  { %v415_v21 = vmul.f32 %v4357_v20, %v4353_v12 }
 0x4b3   :  { %3915 = vmatmul.mubr.msk.f32.vlgmr.msra.gmra.mrb[0].mxu0 %vm237_vm6, %v415_v21 }
 0x4b4   :  { %v4359_v23 = vpop.eup %4358  ;;  %3923 = vmatpush3.xpose.msk.msra.mxu0 %vm237_vm6, %v568_v22  ;;  %3924 = vmatprep.mubr.msk.f32.mxu0 %vm4433_vm5, %v4432_v46 }
 0x4b5   :  { %v416_v24 = vmul.f32 %v4359_v23, %v4355_v14  ;;  %3932 = vmatprep.subr.mxu0 %v4432_v46 }
 0x4b7   :  { %3920 = vmatmul.mubr.msk.f32.vlgmr.msra.gmra.mrb[6].mxu1 %vm237_vm6, %v416_v24  ;;  %3925 = vmatmul.mubr.msk.f32.vlgmr.msra.gmra.mrb[2].mxu0 %vm237_vm6, %v566_v17 }
 0x4b8   :  { %3928 = vmatpush3.xpose.msk.msra.mxu1 %vm237_vm6, %v646_v16  ;;  %3933 = vmatpush3.msra.mxu0 %v568_v22 }
 0x4b9   :  { %3929 = vmatprep.mubr.msk.f32.mxu1 %vm4433_vm5, %v4432_v46  ;;  %3937 = vmatprep.subr.mxu1 %v4432_v46 }
 0x4ba   :  { %3934 = vmatprep.mubr.msk.f32.mxu0 %vm4433_vm5, %v4432_v46  ;;  %3942 = vmatprep.subr.mxu0 %v4432_v46 }
 0x4bb   :  { %3930 = vmatmul.mubr.msk.f32.vlgmr.msra.gmra.mrb[8].mxu1 %vm237_vm6, %v644_v25 }
 0x4bc   :  { %3938 = vmatpush3.msra.mxu1 %v646_v16  ;;  %3939 = vmatprep.mubr.msk.f32.mxu1 %vm4433_vm5, %v4432_v46 }
 0x4bd   :  { %3947 = vmatprep.subr.mxu1 %v4432_v46 }
 0x586   :  { %v4664_v26 = vpop.f32.mrb[0].mxu0 }
 0x587   :  { %v3916_v27 = vpop.f32.mrb[1].mxu0 }
 0x58a   :  { %v4666_v28 = vpop.f32.mrb[6].mxu1  ;;  %v639_v29 = vpop.f32.mrb[2].mxu0 }
 0x58b   :  { %v721_v30 = vmul.f32 0.35355338, %v639_v29  ;;  %v3921_v31 = vpop.f32.mrb[7].mxu1  ;;  %v3926_v32 = vpop.f32.mrb[3].mxu0 }
 0x58d   :  { %v723_v33 = vsel %vm4628_vm7, %v721_v30, -1e+30 }
 0x58e   :  { %v717_v34 = vpop.f32.mrb[8].mxu1  ;;  %v725_v35 = vsel %vm237_vm6, %v723_v33, -inf }
 0x58f   :  { %v722_v36 = vmul.f32 0.35355338, %v717_v34  ;;  %726 = vmax.xlane.f32.xlu0 %v725_v35  ;;  %v3931_v37 = vpop.f32.mrb[9].mxu1 }
 0x591   :  { %v724_v38 = vsel %vm4628_vm7, %v722_v36, -1e+30 }
 0x592   :  { %v728_v39 = vsel %vm237_vm6, %v724_v38, -inf }
 0x593   :  { %729 = vmax.xlane.f32.xlu1 %v728_v39 }
 0x5a4   :  { %975 = vrot.lane.b32.xlu1 %v4608_v49, %s4437_s25 }
 0x5a8   :  { %895 = vrot.lane.b32.xlu1 %v4610_v51, %s4438_s26 }
 0x5ac   :  { %973 = vrot.lane.b32.xlu1 %v4608_v49, %s4438_s26 }
 0x61c   :  { %v727_v40 = vpop.xlane.xlu0 %726 }
 0x61d   :  { %v731_v41 = vsub.f32 %v723_v33, %v727_v40 }
 0x61f   :  { %v733_v42 = vmul.f32 1.442695, %v731_v41 }
 0x620   :  { %v730_v43 = vpop.xlane.xlu1 %729 }
 0x621   :  { %4360 = vpow2.f32 %v733_v42  ;;  %v732_v44 = vsub.f32 %v724_v38, %v730_v43 }
 0x623   :  { %v735_v45 = vmul.f32 1.442695, %v732_v44 }
 0x624   :  { %v976_v55 = vpop.permute.xlu1 %975 }
 0x625   :  { %4362 = vpow2.f32 %v735_v45 }
 0x628   :  { %v896_v61 = vpop.permute.xlu1 %895 }
 0x62b   :  { %v4361_v47 = vpop.eup %4360 }
 0x62c   :  { %v737_v48 = vsel %vm237_vm6, %v4361_v47, 0.0  ;;  %v974_v63 = vpop.permute.xlu1 %973 }
 0x62d   :  { %738 = vadd.xlane.f32.xlu0 %v737_v48 }
 0x62f   :  { %v4363_v50 = vpop.eup %4362 }
 0x630   :  { %v740_v52 = vsel %vm237_vm6, %v4363_v50, 0.0 }
 0x631   :  { %741 = vadd.xlane.f32.xlu0 %v740_v52 }
 0x647   :  { %897 = vrot.lane.b32.xlu0 %v4610_v51, %s4437_s25 }
 0x6ba   :  { %v739_v53 = vpop.xlane.xlu0 %738 }
 0x6bb   :  { %4364 = vrcp.f32 %v739_v53 }
 0x6be   :  { %v742_v54 = vpop.xlane.xlu0 %741 }
 0x6bf   :  { %4366 = vrcp.f32 %v742_v54 }
 0x6c2   :  { %v898_v59 = vpop.permute.xlu0 %897 }
 0x6c5   :  { %v4365_v56 = vpop.eup %4364 }
 0x6c6   :  { %v745_v57 = vmul.f32 %v4365_v56, %v4361_v47 }
 0x6c8   :  { %3935 = vmatmul.mubr.msk.f32.vlgmr.msra.gmra.mrb[4].mxu0 %vm237_vm6, %v745_v57 }
 0x6c9   :  { %v4367_v60 = vpop.eup %4366  ;;  %3943 = vmatpush3.xpose.msk.msra.mxu0 %vm237_vm6, %v898_v59  ;;  %3944 = vmatprep.mubr.msk.f32.mxu0 %vm4433_vm5, %v4432_v46 }
 0x6ca   :  { %v746_v62 = vmul.f32 %v4367_v60, %v4363_v50  ;;  %3952 = vmatprep.subr.mxu0 %v4432_v46 }
 0x6cc   :  { %3940 = vmatmul.mubr.msk.f32.vlgmr.msra.gmra.mrb[10].mxu1 %vm237_vm6, %v746_v62  ;;  %3945 = vmatmul.mubr.msk.f32.vlgmr.msra.gmra.mrb[6].mxu0 %vm237_vm6, %v896_v61 }
 0x6cd   :  { %3948 = vmatpush3.xpose.msk.msra.mxu1 %vm237_vm6, %v976_v55  ;;  %3953 = vmatpush3.msra.mxu0 %v898_v59 }
 0x6ce   :  { %3949 = vmatprep.mubr.msk.f32.mxu1 %vm4433_vm5, %v4432_v46  ;;  %3957 = vmatprep.subr.mxu1 %v4432_v46 }
 0x6cf   :  { %3954 = vmatprep.mubr.msk.f32.mxu0 %vm4433_vm5, %v4432_v46  ;;  %3962 = vmatprep.subr.mxu0 %v4432_v46 }
 0x6d0   :  { %3950 = vmatmul.mubr.msk.f32.vlgmr.msra.gmra.mrb[12].mxu1 %vm237_vm6, %v974_v63 }
 0x6d1   :  { %3958 = vmatpush3.msra.mxu1 %v976_v55  ;;  %3959 = vmatprep.mubr.msk.f32.mxu1 %vm4433_vm5, %v4432_v46 }
 0x6d2   :  { %3967 = vmatprep.subr.mxu1 %v4432_v46 }
 0x79b   :  { %v4700_v2 = vpop.f32.mrb[4].mxu0 }
 0x79c   :  { %v3936_v3 = vpop.f32.mrb[5].mxu0 }
 0x79f   :  { %v4702_v4 = vpop.f32.mrb[10].mxu1  ;;  %v969_v5 = vpop.f32.mrb[6].mxu0 }
 0x7a0   :  { %v1051_v6 = vmul.f32 0.35355338, %v969_v5  ;;  %v3941_v7 = vpop.f32.mrb[11].mxu1  ;;  %v3946_v8 = vpop.f32.mrb[7].mxu0 }
 0x7a1   :  { %v1587_v8 = vld [vmem:[%s5177_s5] sm:$0xff] }
 0x7a2   :  { %v1053_v9 = vsel %vm4628_vm7, %v1051_v6, -1e+30 }
 0x7a3   :  { %v1047_v10 = vpop.f32.mrb[12].mxu1  ;;  %v1055_v11 = vsel %vm237_vm6, %v1053_v9, -inf }
 0x7a4   :  { %v1052_v12 = vmul.f32 0.35355338, %v1047_v10  ;;  %1056 = vmax.xlane.f32.xlu0 %v1055_v11  ;;  %v3951_v13 = vpop.f32.mrb[13].mxu1  ;;  %v1589_v10 = vld [vmem:[%s5177_s5 + $0x10] sm:$0xff]  ;;  %v1590_v11 = vld [vmem:[%s5177_s5 + $0x18] sm:$0xff] }
 0x7a6   :  { %v1054_v14 = vsel %vm4628_vm7, %v1052_v12, -1e+30  ;;  %v4186_v12 = vpack.c.bf16 %v1590_v11, %v1589_v10 }
 0x7a7   :  { %v1058_v15 = vsel %vm237_vm6, %v1054_v14, -inf }
 0x7a8   :  { %1059 = vmax.xlane.f32.xlu1 %v1058_v15 }
 0x7b9   :  { %1305 = vrot.lane.b32.xlu1 %v4608_v49, %s4439_s2 }
 0x7bd   :  { %1225 = vrot.lane.b32.xlu1 %v4610_v51, %s4440_s27 }
 0x7c1   :  { %1303 = vrot.lane.b32.xlu1 %v4608_v49, %s4440_s27 }
 0x831   :  { %v1057_v16 = vpop.xlane.xlu0 %1056 }
 0x832   :  { %v1061_v17 = vsub.f32 %v1053_v9, %v1057_v16 }
 0x834   :  { %v1063_v18 = vmul.f32 1.442695, %v1061_v17 }
 0x835   :  { %v1060_v19 = vpop.xlane.xlu1 %1059 }
 0x836   :  { %4368 = vpow2.f32 %v1063_v18  ;;  %v1062_v20 = vsub.f32 %v1054_v14, %v1060_v19 }
 0x838   :  { %v1065_v21 = vmul.f32 1.442695, %v1062_v20 }
 0x839   :  { %v1306_v29 = vpop.permute.xlu1 %1305 }
 0x83a   :  { %4370 = vpow2.f32 %v1065_v21 }
 0x83d   :  { %v1226_v34 = vpop.permute.xlu1 %1225 }
 0x840   :  { %v4369_v22 = vpop.eup %4368 }
 0x841   :  { %v1067_v23 = vsel %vm237_vm6, %v4369_v22, 0.0 }
 0x842   :  { %1068 = vadd.xlane.f32.xlu0 %v1067_v23 }
 0x844   :  { %v4371_v24 = vpop.eup %4370 }
 0x845   :  { %v1070_v25 = vsel %vm237_vm6, %v4371_v24, 0.0 }
 0x846   :  { %1071 = vadd.xlane.f32.xlu0 %v1070_v25 }
 0x85c   :  { %1227 = vrot.lane.b32.xlu0 %v4610_v51, %s4439_s2  ;;  %v1304_v51 = vpop.permute.xlu1 %1303  ;;  %s5161_s2 = smov 24  }
 0x8cf   :  { %v1069_v27 = vpop.xlane.xlu0 %1068 }
 0x8d0   :  { %4372 = vrcp.f32 %v1069_v27 }
 0x8d3   :  { %v1072_v49 = vpop.xlane.xlu0 %1071 }
 0x8d4   :  { %4374 = vrcp.f32 %v1072_v49 }
 0x8d7   :  { %v1228_v32 = vpop.permute.xlu0 %1227 }
 0x8da   :  { %v4373_v30 = vpop.eup %4372 }
 0x8db   :  { %v1075_v31 = vmul.f32 %v4373_v30, %v4369_v22 }
 0x8dd   :  { %3955 = vmatmul.mubr.msk.f32.vlgmr.msra.gmra.mrb[8].mxu0 %vm237_vm6, %v1075_v31 }
 0x8de   :  { %v4375_v33 = vpop.eup %4374  ;;  %3963 = vmatpush3.xpose.msk.msra.mxu0 %vm237_vm6, %v1228_v32  ;;  %3964 = vmatprep.mubr.msk.f32.mxu0 %vm4433_vm5, %v4432_v46 }
 0x8df   :  { %v1076_v35 = vmul.f32 %v4375_v33, %v4371_v24  ;;  %3972 = vmatprep.subr.mxu0 %v4432_v46 }
 0x8e1   :  { %3960 = vmatmul.mubr.msk.f32.vlgmr.msra.gmra.mrb[14].mxu1 %vm237_vm6, %v1076_v35  ;;  %3965 = vmatmul.mubr.msk.f32.vlgmr.msra.gmra.mrb[10].mxu0 %vm237_vm6, %v1226_v34 }
 0x8e2   :  { %3968 = vmatpush3.xpose.msk.msra.mxu1 %vm237_vm6, %v1306_v29  ;;  %3973 = vmatpush3.msra.mxu0 %v1228_v32 }
 0x8e3   :  { %3969 = vmatprep.mubr.msk.f32.mxu1 %vm4433_vm5, %v4432_v46  ;;  %3977 = vmatprep.subr.mxu1 %v4432_v46 }
 0x8e4   :  { %3974 = vmatprep.mubr.msk.f32.mxu0 %vm4433_vm5, %v4432_v46 }
 0x8e5   :  { %3970 = vmatmul.mubr.msk.f32.vlgmr.msra.gmra.mrb[16].mxu1 %vm237_vm6, %v1304_v51 }
 0x8e6   :  { %3978 = vmatpush3.msra.mxu1 %v1306_v29  ;;  %3979 = vmatprep.mubr.msk.f32.mxu1 %vm4433_vm5, %v4432_v46 }
 0x9b0   :  { %v1147_v36 = vpop.f32.mrb[8].mxu0 }
 0x9b1   :  { %v3956_v37 = vpop.f32.mrb[9].mxu0 }
 0x9b4   :  { %v1221_v38 = vpop.f32.mrb[14].mxu1  ;;  %v1299_v39 = vpop.f32.mrb[10].mxu0 }
 0x9b5   :  { %v1381_v40 = vmul.f32 0.35355338, %v1299_v39  ;;  %v3961_v41 = vpop.f32.mrb[15].mxu1  ;;  %v3966_v42 = vpop.f32.mrb[11].mxu0 }
 0x9b7   :  { %v1383_v43 = vsel %vm4628_vm7, %v1381_v40, -1e+30 }
 0x9b8   :  { %v1377_v44 = vpop.f32.mrb[16].mxu1  ;;  %v1385_v45 = vsel %vm237_vm6, %v1383_v43, -inf }
 0x9b9   :  { %v1382_v47 = vmul.f32 0.35355338, %v1377_v44  ;;  %1386 = vmax.xlane.f32.xlu0 %v1385_v45  ;;  %v3971_v48 = vpop.f32.mrb[17].mxu1  ;;  %v1831_v44 = vld [vmem:[%s5142_s12] sm:$0xff]  ;;  %v1832_v45 = vld [vmem:[%s5142_s12 + $0x8] sm:$0xff] }
 0x9ba   :  { %v4444_v48 = vmov 0.0|0.0  }
 0x9bb   :  { %v1384_v50 = vsel %vm4628_vm7, %v1382_v47, -1e+30  ;;  %v4199_v47 = vpack.c.bf16 %v1832_v45, %v1831_v44 }
 0x9bc   :  { %v1388_v52 = vsel %vm237_vm6, %v1384_v50, -inf }
 0x9bd   :  { %1389 = vmax.xlane.f32.xlu1 %v1388_v52  ;;  %v1834_v52 = vld [vmem:[%s5142_s12 + $0x18] sm:$0xff] }
 0x9ce   :  { %1559 = vrot.lane.b32.xlu1 %v4702_v4, %s4441_s3 }
 0x9d2   :  { %1565 = vrot.lane.b32.xlu1 %v1147_v36, %s4442_s28 }
 0x9d6   :  { %1567 = vrot.lane.b32.xlu1 %v1221_v38, %s4442_s28 }
 0xa46   :  { %v1387_v53 = vpop.xlane.xlu0 %1386 }
 0xa47   :  { %v1391_v54 = vsub.f32 %v1383_v43, %v1387_v53 }
 0xa49   :  { %v1393_v55 = vmul.f32 1.442695, %v1391_v54  ;;  %v73_v54 = vld [vmem:[%s5143_s1] sm:$0xff] }
 0xa4a   :  { %v1390_v56 = vpop.xlane.xlu1 %1389 }
 0xa4b   :  { %4376 = vpow2.f32 %v1393_v55  ;;  %v1392_v57 = vsub.f32 %v1384_v50, %v1390_v56  ;;  %v1833_v50 = vld [vmem:[%s5142_s12 + $0x10] sm:$0xff]  ;;  %v1739_v55 = vld [vmem:[%s5144_s10] sm:$0xff]  ;;  %v1740_v56 = vld [vmem:[%s5144_s10 + $0x8] sm:$0xff]  ;;  %s5183_s12 = smov 24  }
 0xa4c   :  { %v4202_v53 = vpack.c.bf16 %v1834_v52, %v1833_v50 }
 0xa4d   :  { %v1395_v58 = vmul.f32 1.442695, %v1392_v57  ;;  %v1741_v57 = vld [vmem:[%s5144_s10 + $0x10] sm:$0xff] }
 0xa4e   :  { %v1560_v17 = vpop.permute.xlu1 %1559 }
 0xa4f   :  { %4378 = vpow2.f32 %v1395_v58  ;;  %v1580_v25 = vsel %vm237_vm6, %v4666_v28, %v1560_v17  ;;  %v4190_v58 = vpack.c.bf16 %v1740_v56, %v1739_v55 }
 0xa51   :  { %4191 = vmatprep.subr.bf16.mxu1 %v4190_v58 }
 0xa52   :  { %v1566_v18 = vpop.permute.xlu1 %1565 }
 0xa55   :  { %v4377_v59 = vpop.eup %4376 }
 0xa56   :  { %v1397_v60 = vsel %vm237_vm6, %v4377_v59, 0.0  ;;  %v1568_v21 = vpop.permute.xlu1 %1567 }
 0xa57   :  { %1398 = vadd.xlane.f32.xlu0 %v1397_v60  ;;  %v1583_v27 = vsel %vm1581_vm9, %v1580_v25, %v1568_v21  ;;  %v74_v60 = vld [vmem:[%s5143_s1 + $0x8] sm:$0xff] }
 0xa59   :  { %v4379_v61 = vpop.eup %4378 }
 0xa5a   :  { %v1400_v62 = vsel %vm237_vm6, %v4379_v61, 0.0 }
 0xa5b   :  { %1401 = vadd.xlane.f32.xlu0 %v1400_v62  ;;  %v75_v62 = vld [vmem:[%s5143_s1 + $0x10] sm:$0xff] }
 0xa71   :  { %1557 = vrot.lane.b32.xlu0 %v4700_v2, %s4441_s3  ;;  %v1588_v2 = vld [vmem:[%s5177_s5 + $0x8] sm:$0xff]  ;;  %s5178_s5 = sld [smem:[#allocation8_spill]] }
 0xa72   :  { %v4182_v9 = vpack.c.bf16 %v1588_v2, %v1587_v8 }
 0xa74   :  { %4183 = vmatprep.subr.bf16.mxu0 %v4182_v9 }
 0xae4   :  { %v1399_v63 = vpop.xlane.xlu0 %1398 }
 0xae5   :  { %4380 = vrcp.f32 %v1399_v63 }
 0xae8   :  { %v1402_v3 = vpop.xlane.xlu0 %1401 }
 0xae9   :  { %4382 = vrcp.f32 %v1402_v3 }
 0xaec   :  { %v1558_v19 = vpop.permute.xlu0 %1557 }
 0xaed   :  { %v1579_v20 = vsel %vm237_vm6, %v4664_v26, %v1558_v19  ;;  %v3701_v26 = vld [vmem:[%s5178_s5] ss:$0 sm:$0xff] }
 0xaee   :  { %v1582_v23 = vsel %vm1581_vm9, %v1579_v20, %v1566_v18  ;;  %v3704_v18 = vld [vmem:[%s5145_s8] ss:$0 sm:$0xff] }
 0xaef   :  { %v4381_v4 = vpop.eup %4380  ;;  %v3705_v20 = vld [vmem:[%s5146_s9] ss:$0 sm:$0xff] }
 0xaf0   :  { %v1405_v5 = vmul.f32 %v4381_v4, %v4377_v59  ;;  %v1742_v59 = vld [vmem:[%s5144_s10 + $0x18] sm:$0xff] }
 0xaf2   :  { %3975 = vmatmul.mubr.msk.f32.vlgmr.msra.gmra.mrb[12].mxu0 %vm237_vm6, %v1405_v5 }
 0xaf3   :  { %v4383_v6 = vpop.eup %4382  ;;  %4185 = vmatpush3.bf16.msra.mxu0 %v4182_v9 }
 0xaf4   :  { %v1406_v7 = vmul.f32 %v4383_v6, %v4379_v61  ;;  %4187 = vmatprep.subr.bf16.mxu0 %v4186_v12  ;;  %v4194_v61 = vpack.c.bf16 %v1742_v59, %v1741_v57 }
 0xaf6   :  { %3980 = vmatmul.mubr.msk.f32.vlgmr.msra.gmra.mrb[18].mxu1 %vm237_vm6, %v1406_v7 }
 0xaf7   :  { %4189 = vmatpush3.bf16.msra.mxu0 %v4186_v12  ;;  %4193 = vmatpush3.bf16.msra.mxu1 %v4190_v58 }
 0xaf8   :  { %4198 = vmatprep.subr.bf16.mxu0 %v4444_v48  ;;  %4195 = vmatprep.subr.bf16.mxu1 %v4194_v61 }
 0xafb   :  { %4197 = vmatpush3.bf16.msra.mxu1 %v4194_v61 }
 0xafc   :  { %4204 = vmatprep.subr.bf16.mxu1 %v4444_v48 }
 0xbc5   :  { %v1477_v13 = vpop.f32.mrb[12].mxu0 }
 0xbc6   :  { %v3976_v14 = vpop.f32.mrb[13].mxu0  ;;  %1573 = vrot.lane.b32.xlu0 %v1477_v13, %s5161_s2 }
 0xbc9   :  { %v1551_v15 = vpop.f32.mrb[18].mxu1 }
 0xbca   :  { %1575 = vrot.lane.b32.xlu1 %v1551_v15, %s5161_s2  ;;  %v3981_v16 = vpop.f32.mrb[19].mxu1 }
 0xc38   :  { %v1574_v22 = vpop.permute.xlu0 %1573 }
 0xc39   :  { %v1585_v24 = vsel %vm1584_vm8, %v1582_v23, %v1574_v22 }
 0xc3a   :  { %3990 = vmatprep.mubr.msk.f32.mxu0 %vm78_vm0, %v1585_v24 }
 0xc3c   :  { %v1576_v49 = vpop.permute.xlu1 %1575 }
 0xc3d   :  { %v1586_v29 = vsel %vm1584_vm8, %v1583_v27, %v1576_v49  ;;  %v3709_v49 = vld [vmem:[%s5147_s13] ss:$0 sm:$0xff] }
 0xc3e   :  { %3991 = vmatmul.mubr.msk.f32.vlgmr.msra.gmra.mrb[14].mxu0 %vm78_vm0, %v1586_v29 }
 0xc3f   :  { %4012 = vmatprep.mubr.msk.f32.mxu0 %vm4433_vm5, %v4432_v46  ;;  %4200 = vmatpush3.bf16.msra.mxu0 %v4199_v47  ;;  %v3706_v47 = vld [vmem:[%s5148_s11] ss:$0 sm:$0xff] }
 0xc40   :  { %4201 = vmatprep.subr.bf16.mxu0 %v4444_v48 }
 0xc43   :  { %4203 = vmatpush3.bf16.msra.mxu0 %v4202_v53 }
 0xc44   :  { %4212 = vmatprep.subr.bf16.mxu0 %v4444_v48 }
 0xc46   :  { %4013 = vmatmul.mubr.msk.f32.vlgmr.msra.gmra.mrb[16].mxu0 %vm78_vm0, %v73_v54 }
 0xc47   :  { %4015 = vmatprep.mubr.msk.f32.mxu0 %vm4433_vm5, %v4432_v46 }
 0xc4a   :  { %4016 = vmatmul.mubr.msk.f32.gmra.mrb[18].mxu0 %vm78_vm0, %v74_v60 }
 0xc4b   :  { %4018 = vmatprep.mubr.msk.f32.mxu0 %vm4433_vm5, %v4432_v46 }
 0xc4e   :  { %4019 = vmatmul.mubr.msk.f32.gmra.mrb[20].mxu0 %vm78_vm0, %v75_v62 }
 0xc4f   :  { %4039 = vmatprep.mubr.msk.f32.mxu0 %vm4433_vm5, %v4432_v46 }
 0xd11   :  { %v3992_v30 = vpop.f32.mrb[14].mxu0 }
 0xd12   :  { %v1676_v31 = vadd.f32 %v3992_v30, %v3701_v26  ;;  %v1670_v32 = vpop.f32.mrb[15].mxu0 }
 0xd13   :  { %v1671_v33 = vadd.f32 %v3701_v26, %v1670_v32 }
 0xd14   :  { %v4780_v28 = vadd.f32 %v1676_v31, %v4569_v1 }
 0xd15   :  { %v4783_v34 = vadd.f32 %v1671_v33, %v4564_v0 }
 0xd16   :  { %v1686_v35 = vsel %vm78_vm0, %v4780_v28, 0.0 }
 0xd17   :  { %1687 = vadd.xlane.f32.xlu1 %v1686_v35  ;;  %v1683_v51 = vsel %vm78_vm0, %v4783_v34, 0.0 }
 0xd18   :  { %1684 = vadd.xlane.f32.xlu0 %v1683_v51 }
 0xd19   :  { %v1917_v29 = vpop.f32.mrb[16].mxu0 }
 0xd1a   :  { %v1918_v26 = vadd.f32 %v3709_v49, %v1917_v29  ;;  %v4014_v30 = vpop.f32.mrb[17].mxu0 }
 0xd1c   :  { %v1934_v31 = vcombine.high %v1918_v26, %v1918_v26 }
 0xd1d   :  { %v1922_v32 = vpop.f32.mrb[18].mxu0 }
 0xd1e   :  { %v1937_v33 = vcombine.low %v1918_v26, %v1934_v31  ;;  %v1923_v35 = vadd.f32 %v3709_v49, %v1922_v32  ;;  %v4017_v51 = vpop.f32.mrb[19].mxu0 }
 0xda4   :  { %v1688_v36 = vpop.xlane.xlu1 %1687 }
 0xda5   :  { %v1690_v37 = vmul.f32 0.03125, %v1688_v36  ;;  %v1685_v38 = vpop.xlane.xlu0 %1684 }
 0xda6   :  { %v1689_v39 = vmul.f32 0.03125, %v1685_v38  ;;  %v1935_v38 = vcombine.high %v1923_v35, %v1923_v35 }
 0xda7   :  { %v4790_v40 = vsub.f32 %v4780_v28, %v1690_v37 }
 0xda8   :  { %v4793_v1 = vsub.f32 %v4783_v34, %v1689_v39  ;;  %v4205_v39 = vpack.c.bf16 %v1923_v35, %v1937_v33 }
 0xda9   :  { %v1694_v42 = vmul.f32 %v4790_v40, %v4790_v40 }
 0xdaa   :  { %v1693_v0 = vmul.f32 %v4793_v1, %v4793_v1  ;;  %4215 = vmatpush3.bf16.msk.msra.mxu0 %vm4868_vm2, %v4205_v39 }
 0xdab   :  { %v1698_v43 = vsel %vm78_vm0, %v1694_v42, 0.0  ;;  %4220 = vmatprep.subr.bf16.mxu0 %v4444_v48 }
 0xdac   :  { %v1695_v41 = vsel %vm78_vm0, %v1693_v0, 0.0 }
 0xdad   :  { %1696 = vadd.xlane.f32.xlu0 %v1695_v41 }
 0xdb1   :  { %1699 = vadd.xlane.f32.xlu0 %v1698_v43 }
 0xe3a   :  { %v1697_v63 = vpop.xlane.xlu0 %1696 }
 0xe3b   :  { %v1701_v3 = vmul.f32 0.032258064, %v1697_v63 }
 0xe3d   :  { %4384 = vrsqrt.f32 %v1701_v3  ;;  %vm1705_vm10 = vcmp.eq.f32.partialorder %v1701_v3, inf  ;;  %v1708_v8 = vand.u32 2147483648, %v1701_v3  ;;  %vm1707_vm11 = vcmp.eq.f32.partialorder %v1701_v3, 0.0 }
 0xe3e   :  { %v1700_v4 = vpop.xlane.xlu0 %1699 }
 0xe3f   :  { %v1702_v5 = vmul.f32 0.032258064, %v1700_v4 }
 0xe41   :  { %4386 = vrsqrt.f32 %v1702_v5  ;;  %vm1712_vm12 = vcmp.eq.f32.partialorder %v1702_v5, inf  ;;  %v1715_v13 = vand.u32 2147483648, %v1702_v5  ;;  %vm1714_vm13 = vcmp.eq.f32.partialorder %v1702_v5, 0.0 }
 0xe47   :  { %v4385_v6 = vpop.eup %4384 }
 0xe48   :  { %v1704_v7 = vmul.f32 %v4385_v6, %v1701_v3 }
 0xe4a   :  { %v1706_v2 = vsel %vm1705_vm10, %v1701_v3, %v1704_v7 }
 0xe4b   :  { %v4387_v9 = vpop.eup %4386  ;;  %v1709_v10 = vsel %vm1707_vm11, %v1708_v8, %v1706_v2 }
 0xe4c   :  { %v1717_v11 = vadd.f32 1e-06, %v1709_v10  ;;  %v1711_v12 = vmul.f32 %v4387_v9, %v1702_v5 }
 0xe4e   :  { %4388 = vrcp.f32 %v1717_v11  ;;  %v1713_v14 = vsel %vm1712_vm12, %v1702_v5, %v1711_v12 }
 0xe4f   :  { %v1716_v15 = vsel %vm1714_vm13, %v1715_v13, %v1713_v14 }
 0xe50   :  { %v1718_v16 = vadd.f32 1e-06, %v1716_v15 }
 0xe52   :  { %4390 = vrcp.f32 %v1718_v16 }
 0xe58   :  { %v4389_v17 = vpop.eup %4388 }
 0xe59   :  { %v1720_v19 = vmul.f32 %v4389_v17, %v4793_v1  ;;  %v1927_v1 = vpop.f32.mrb[20].mxu0 }
 0xe5a   :  { %v1928_v0 = vadd.f32 %v3709_v49, %v1927_v1  ;;  %v4020_v41 = vpop.f32.mrb[21].mxu0 }
 0xe5b   :  { %v1729_v21 = vmul.f32 %v3704_v18, %v1720_v19 }
 0xe5c   :  { %v4391_v22 = vpop.eup %4390  ;;  %v1936_v42 = vcombine.high %v1928_v0, %v1928_v0  ;;  %v2015_v43 = vcombine.low %v1935_v38, %v1928_v0 }
 0xe5d   :  { %v1722_v23 = vmul.f32 %v4391_v22, %v4790_v40  ;;  %v1737_v24 = vadd.f32 %v3705_v20, %v1729_v21  ;;  %v4872_v40 = vpack.i.bf16 %v1923_v35, %v1937_v33 }
 0xe5e   :  { %v4209_v44 = vpack.c.bf16 %v1936_v42, %v2015_v43  ;;  %v4880_v45 = vpack.i.bf16 %v1936_v42, %v2015_v43 }
 0xe5f   :  { %v1730_v25 = vmul.f32 %v3704_v18, %v1722_v23  ;;  %4001 = vmatprep.mubr.msk.f32.mxu1 %vm78_vm0, %v1737_v24 }
 0xe61   :  { %v1738_v27 = vadd.f32 %v3705_v20, %v1730_v25 }
 0xe63   :  { %4002 = vmatmul.mubr.msk.f32.vlgmr.msra.gmra.mrb[20].mxu1 %vm78_vm0, %v1738_v27 }
 0xe64   :  { %4025 = vmatprep.mubr.msk.f32.mxu1 %vm4433_vm5, %v4432_v46  ;;  %4207 = vmatpush3.bf16.xpose.msk.msra.mxu1 %vm4864_vm15, %v4205_v39 }
 0xe65   :  { %4208 = vmatprep.subr.bf16.mxu1 %v4444_v48 }
 0xf36   :  { %v4003_v50 = vpop.f32.mrb[20].mxu1 }
 0xf37   :  { %v1822_v52 = vpop.f32.mrb[21].mxu1  ;;  %v4894_v54 = vadd.f32 %v4003_v50, %v3706_v47 }
 0xf38   :  { %v4885_v53 = vadd.f32 %v3706_v47, %v1822_v52 }
 0xf3a   :  { %4026 = vmatmul.mubr.msk.f32.vlgmr.msra.gmra.mrb[22].mxu1 %vm237_vm6, %v4885_v53 }
 0xf3b   :  { %4211 = vmatpush3.bf16.xpose.msk.msra.mxu1 %vm4864_vm15, %v4209_v44  ;;  %4032 = vmatprep.mubr.msk.f32.mxu1 %vm4433_vm5, %v4432_v46 }
 0xf3c   :  { %4216 = vmatprep.subr.bf16.mxu1 %v4444_v48 }
 0xf42   :  { %4033 = vmatmul.mubr.msk.f32.vlgmr.msra.gmra.mrb[24].mxu1 %vm237_vm6, %v4894_v54 }
 0xf43   :  { %4219 = vmatpush3.bf16.msk.msra.mxu1 %vm4868_vm2, %v4209_v44  ;;  %4046 = vmatprep.mubr.msk.f32.mxu1 %vm4433_vm5, %v4432_v46 }
 0xf44   :  { %4224 = vmatprep.subr.bf16.mxu1 %v4444_v48 }
0x100d   :  { %v2011_v55 = vpop.f32.mrb[22].mxu1 }
0x100e   :  { %v2093_v56 = vmul.f32 0.35355338, %v2011_v55  ;;  %v4027_v57 = vpop.f32.mrb[23].mxu1 }
0x1010   :  { %v2096_v58 = vsel %vm2095_vm3, %v2093_v56, -inf }
0x1011   :  { %2097 = vmax.xlane.f32.xlu0 %v2096_v58 }
0x1015   :  { %v2089_v59 = vpop.f32.mrb[24].mxu1 }
0x1016   :  { %v2094_v60 = vmul.f32 0.35355338, %v2089_v59  ;;  %v4034_v61 = vpop.f32.mrb[25].mxu1 }
0x1018   :  { %v2099_v62 = vsel %vm2095_vm3, %v2094_v60, -inf }
0x1019   :  { %2100 = vmax.xlane.f32.xlu1 %v2099_v62 }
0x102a   :  { %4320 = vrot.lane.b32.xlu1 %v4880_v45, %s4436_s7 }
0x102e   :  { %2271 = vrot.lane.b32.xlu1 %v4885_v53, %s4436_s7 }
0x109e   :  { %v2098_v63 = vpop.xlane.xlu0 %2097 }
0x109f   :  { %v2102_v3 = vsub.f32 %v2093_v56, %v2098_v63 }
0x10a1   :  { %v2104_v4 = vmul.f32 1.442695, %v2102_v3 }
0x10a3   :  { %4392 = vpow2.f32 %v2104_v4 }
0x10a6   :  { %v2101_v5 = vpop.xlane.xlu1 %2100 }
0x10a7   :  { %v2103_v6 = vsub.f32 %v2094_v60, %v2101_v5 }
0x10a9   :  { %v2106_v7 = vmul.f32 1.442695, %v2103_v6 }
0x10aa   :  { %v4321_v11 = vpop.permute.xlu1 %4320 }
0x10ab   :  { %4394 = vpow2.f32 %v2106_v7  ;;  %v4323_v21 = vunpack.i.h.bf16 %v4321_v11  ;;  %v4322_v22 = vunpack.i.l.bf16 %v4321_v11 }
0x10ad   :  { %v4393_v8 = vpop.eup %4392  ;;  %v4225_v25 = vpack.c.bf16 %v4323_v21, %v4322_v22 }
0x10ae   :  { %v2108_v2 = vsel %vm2095_vm3, %v4393_v8, 0.0  ;;  %v2272_v13 = vpop.permute.xlu1 %2271 }
0x10af   :  { %2109 = vadd.xlane.f32.xlu0 %v2108_v2 }
0x10b5   :  { %v4395_v9 = vpop.eup %4394 }
0x10b6   :  { %v2111_v10 = vsel %vm2095_vm3, %v4395_v9, 0.0 }
0x10b7   :  { %2112 = vadd.xlane.f32.xlu1 %v2111_v10 }
0x10c5   :  { %4315 = vrot.lane.b32.xlu0 %v4872_v40, %s4436_s7 }
0x10c8   :  { %2353 = vrot.lane.b32.xlu1 %v4894_v54, %s4436_s7 }
0x113c   :  { %v2110_v12 = vpop.xlane.xlu0 %2109 }
0x113d   :  { %4396 = vrcp.f32 %v2110_v12 }
0x1140   :  { %v4316_v14 = vpop.permute.xlu0 %4315 }
0x1141   :  { %v4318_v16 = vunpack.i.h.bf16 %v4316_v14  ;;  %v4317_v17 = vunpack.i.l.bf16 %v4316_v14 }
0x1143   :  { %v4221_v20 = vpack.c.bf16 %v4318_v16, %v4317_v17 }
0x1144   :  { %v2113_v15 = vpop.xlane.xlu1 %2112 }
0x1145   :  { %4398 = vrcp.f32 %v2113_v15 }
0x1147   :  { %v4397_v18 = vpop.eup %4396 }
0x1148   :  { %v2116_v19 = vmul.f32 %v4397_v18, %v4393_v8  ;;  %v2354_v27 = vpop.permute.xlu1 %2353 }
0x114a   :  { %4040 = vmatmul.mubr.msk.f32.vlgmr.msra.gmra.mrb[22].mxu0 %vm2095_vm3, %v2116_v19 }
0x114b   :  { %4223 = vmatpush3.bf16.xpose.msk.msra.mxu0 %vm4864_vm15, %v4221_v20  ;;  %4053 = vmatprep.mubr.msk.f32.mxu0 %vm4433_vm5, %v4432_v46 }
0x114c   :  { %4228 = vmatprep.subr.bf16.mxu0 %v4444_v48 }
0x114f   :  { %v4399_v23 = vpop.eup %4398 }
0x1150   :  { %v2117_v24 = vmul.f32 %v4399_v23, %v4395_v9 }
0x1152   :  { %4047 = vmatmul.mubr.msk.f32.vlgmr.msra.gmra.mrb[26].mxu1 %vm2095_vm3, %v2117_v24  ;;  %4054 = vmatmul.mubr.msk.f32.vlgmr.msra.gmra.mrb[24].mxu0 %vm237_vm6, %v2272_v13 }
0x1153   :  { %4227 = vmatpush3.bf16.xpose.msk.msra.mxu1 %vm4864_vm15, %v4225_v25  ;;  %4231 = vmatpush3.bf16.msk.msra.mxu0 %vm4868_vm2, %v4221_v20 }
0x1154   :  { %4060 = vmatprep.mubr.msk.f32.mxu1 %vm4433_vm5, %v4432_v46  ;;  %4232 = vmatprep.subr.bf16.mxu1 %v4444_v48 }
0x1155   :  { %4067 = vmatprep.mubr.msk.f32.mxu0 %vm4433_vm5, %v4432_v46  ;;  %4236 = vmatprep.subr.bf16.mxu0 %v4444_v48 }
0x115a   :  { %4061 = vmatmul.mubr.msk.f32.vlgmr.msra.gmra.mrb[28].mxu1 %vm237_vm6, %v2354_v27 }
0x115b   :  { %4235 = vmatpush3.bf16.msk.msra.mxu1 %vm4868_vm2, %v4225_v25  ;;  %4074 = vmatprep.mubr.msk.f32.mxu1 %vm4433_vm5, %v4432_v46 }
0x115c   :  { %4240 = vmatprep.subr.bf16.mxu1 %v4444_v48 }
0x121d   :  { %v4939_v49 = vpop.f32.mrb[22].mxu0 }
0x121e   :  { %v4041_v29 = vpop.f32.mrb[23].mxu0 }
0x1225   :  { %v4941_v26 = vpop.f32.mrb[26].mxu1  ;;  %v2349_v30 = vpop.f32.mrb[24].mxu0 }
0x1226   :  { %v2435_v31 = vmul.f32 0.35355338, %v2349_v30  ;;  %v4048_v32 = vpop.f32.mrb[27].mxu1  ;;  %v4055_v33 = vpop.f32.mrb[25].mxu0 }
0x1228   :  { %v2437_v35 = vsel %vm2095_vm3, %v2435_v31, -inf }
0x1229   :  { %2438 = vmax.xlane.f32.xlu0 %v2437_v35 }
0x122d   :  { %v2431_v51 = vpop.f32.mrb[28].mxu1 }
0x122e   :  { %v2436_v38 = vmul.f32 0.35355338, %v2431_v51  ;;  %v4062_v39 = vpop.f32.mrb[29].mxu1 }
0x1230   :  { %v2440_v1 = vsel %vm2095_vm3, %v2436_v38, -inf }
0x1231   :  { %2441 = vmax.xlane.f32.xlu1 %v2440_v1 }
0x1242   :  { %4330 = vrot.lane.b32.xlu1 %v4880_v45, %s4438_s26 }
0x1246   :  { %2611 = vrot.lane.b32.xlu1 %v4885_v53, %s4438_s26 }
0x124a   :  { %2693 = vrot.lane.b32.xlu1 %v4894_v54, %s4438_s26 }
0x12b6   :  { %v2439_v0 = vpop.xlane.xlu0 %2438 }
0x12b7   :  { %v2443_v41 = vsub.f32 %v2435_v31, %v2439_v0 }
0x12b9   :  { %v2445_v42 = vmul.f32 1.442695, %v2443_v41 }
0x12bb   :  { %4400 = vpow2.f32 %v2445_v42 }
0x12be   :  { %v2442_v43 = vpop.xlane.xlu1 %2441 }
0x12bf   :  { %v2444_v44 = vsub.f32 %v2436_v38, %v2442_v43 }
0x12c1   :  { %v2447_v47 = vmul.f32 1.442695, %v2444_v44 }
0x12c2   :  { %v4331_v3 = vpop.permute.xlu1 %4330 }
0x12c3   :  { %4402 = vpow2.f32 %v2447_v47  ;;  %v4333_v5 = vunpack.i.h.bf16 %v4331_v3  ;;  %v4332_v6 = vunpack.i.l.bf16 %v4331_v3 }
0x12c5   :  { %v4401_v50 = vpop.eup %4400  ;;  %v4241_v2 = vpack.c.bf16 %v4333_v5, %v4332_v6 }
0x12c6   :  { %v2449_v52 = vsel %vm2095_vm3, %v4401_v50, 0.0  ;;  %v2612_v9 = vpop.permute.xlu1 %2611 }
0x12c7   :  { %2450 = vadd.xlane.f32.xlu0 %v2449_v52 }
0x12ca   :  { %v2694_v10 = vpop.permute.xlu1 %2693 }
0x12cd   :  { %v4403_v55 = vpop.eup %4402 }
0x12ce   :  { %v2452_v56 = vsel %vm2095_vm3, %v4403_v55, 0.0 }
0x12cf   :  { %2453 = vadd.xlane.f32.xlu0 %v2452_v56 }
0x12e5   :  { %4325 = vrot.lane.b32.xlu0 %v4872_v40, %s4438_s26 }
0x1354   :  { %v2451_v57 = vpop.xlane.xlu0 %2450 }
0x1355   :  { %4404 = vrcp.f32 %v2451_v57 }
0x135c   :  { %v2454_v58 = vpop.xlane.xlu0 %2453 }
0x135d   :  { %4406 = vrcp.f32 %v2454_v58 }
0x135f   :  { %v4405_v59 = vpop.eup %4404 }
0x1360   :  { %v2457_v60 = vmul.f32 %v4405_v59, %v4401_v50  ;;  %v4326_v61 = vpop.permute.xlu0 %4325 }
0x1361   :  { %v4328_v62 = vunpack.i.h.bf16 %v4326_v61  ;;  %v4327_v63 = vunpack.i.l.bf16 %v4326_v61 }
0x1362   :  { %4068 = vmatmul.mubr.msk.f32.vlgmr.msra.gmra.mrb[26].mxu0 %vm2095_vm3, %v2457_v60 }
0x1363   :  { %v4237_v4 = vpack.c.bf16 %v4328_v62, %v4327_v63  ;;  %4081 = vmatprep.mubr.msk.f32.mxu0 %vm4433_vm5, %v4432_v46 }
0x1365   :  { %4239 = vmatpush3.bf16.xpose.msk.msra.mxu0 %vm4864_vm15, %v4237_v4 }
0x1366   :  { %4244 = vmatprep.subr.bf16.mxu0 %v4444_v48 }
0x1367   :  { %v4407_v7 = vpop.eup %4406 }
0x1368   :  { %v2458_v8 = vmul.f32 %v4407_v7, %v4403_v55 }
0x136a   :  { %4075 = vmatmul.mubr.msk.f32.vlgmr.msra.gmra.mrb[30].mxu1 %vm2095_vm3, %v2458_v8 }
0x136b   :  { %4243 = vmatpush3.bf16.xpose.msk.msra.mxu1 %vm4864_vm15, %v4241_v2  ;;  %4088 = vmatprep.mubr.msk.f32.mxu1 %vm4433_vm5, %v4432_v46 }
0x136c   :  { %4082 = vmatmul.mubr.msk.f32.vlgmr.msra.gmra.mrb[28].mxu0 %vm237_vm6, %v2612_v9  ;;  %4248 = vmatprep.subr.bf16.mxu1 %v4444_v48 }
0x136d   :  { %4247 = vmatpush3.bf16.msk.msra.mxu0 %vm4868_vm2, %v4237_v4  ;;  %4095 = vmatprep.mubr.msk.f32.mxu0 %vm4433_vm5, %v4432_v46 }
0x136e   :  { %4252 = vmatprep.subr.bf16.mxu0 %v4444_v48 }
0x1372   :  { %4089 = vmatmul.mubr.msk.f32.vlgmr.msra.gmra.mrb[32].mxu1 %vm237_vm6, %v2694_v10 }
0x1373   :  { %4251 = vmatpush3.bf16.msk.msra.mxu1 %vm4868_vm2, %v4241_v2  ;;  %4102 = vmatprep.mubr.msk.f32.mxu1 %vm4433_vm5, %v4432_v46 }
0x1374   :  { %4256 = vmatprep.subr.bf16.mxu1 %v4444_v48 }
0x1435   :  { %v4979_v11 = vpop.f32.mrb[26].mxu0 }
0x1436   :  { %v4069_v12 = vpop.f32.mrb[27].mxu0 }
0x143d   :  { %v4981_v13 = vpop.f32.mrb[30].mxu1 }
0x143e   :  { %v4076_v14 = vpop.f32.mrb[31].mxu1 }
0x143f   :  { %v2689_v15 = vpop.f32.mrb[28].mxu0 }
0x1440   :  { %v2775_v16 = vmul.f32 0.35355338, %v2689_v15  ;;  %v4083_v17 = vpop.f32.mrb[29].mxu0 }
0x1442   :  { %v2777_v18 = vsel %vm2095_vm3, %v2775_v16, -inf }
0x1443   :  { %2778 = vmax.xlane.f32.xlu0 %v2777_v18  ;;  %v3321_v18 = vld [vmem:[%s5149_s14] sm:$0xff] }
0x1445   :  { %v2771_v19 = vpop.f32.mrb[32].mxu1 }
0x1446   :  { %v2776_v20 = vmul.f32 0.35355338, %v2771_v19  ;;  %v4090_v21 = vpop.f32.mrb[33].mxu1 }
0x1447   :  { %v3324_v21 = vld [vmem:[%s5149_s14 + $0x18] sm:$0xff] }
0x1448   :  { %v2780_v22 = vsel %vm2095_vm3, %v2776_v20, -inf }
0x1449   :  { %2781 = vmax.xlane.f32.xlu1 %v2780_v22 }
0x145a   :  { %4340 = vrot.lane.b32.xlu1 %v4880_v45, %s4440_s27 }
0x145e   :  { %2951 = vrot.lane.b32.xlu1 %v4885_v53, %s4440_s27 }
0x1462   :  { %3033 = vrot.lane.b32.xlu1 %v4894_v54, %s4440_s27 }
0x14d0   :  { %v2779_v23 = vpop.xlane.xlu0 %2778 }
0x14d1   :  { %v2783_v24 = vsub.f32 %v2775_v16, %v2779_v23 }
0x14d3   :  { %v2785_v25 = vmul.f32 1.442695, %v2783_v24 }
0x14d5   :  { %4408 = vpow2.f32 %v2785_v25 }
0x14d6   :  { %v2782_v27 = vpop.xlane.xlu1 %2781 }
0x14d7   :  { %v2784_v29 = vsub.f32 %v2776_v20, %v2782_v27  ;;  %v3323_v20 = vld [vmem:[%s5149_s14 + $0x10] sm:$0xff] }
0x14d8   :  { %v4272_v22 = vpack.c.bf16 %v3324_v21, %v3323_v20 }
0x14d9   :  { %v2787_v30 = vmul.f32 1.442695, %v2784_v29 }
0x14da   :  { %v4341_v1 = vpop.permute.xlu1 %4340 }
0x14db   :  { %4410 = vpow2.f32 %v2787_v30  ;;  %v4343_v42 = vunpack.i.h.bf16 %v4341_v1  ;;  %v4342_v43 = vunpack.i.l.bf16 %v4341_v1 }
0x14dd   :  { %v4257_v47 = vpack.c.bf16 %v4343_v42, %v4342_v43 }
0x14de   :  { %v2952_v50 = vpop.permute.xlu1 %2951 }
0x14df   :  { %v4409_v31 = vpop.eup %4408 }
0x14e0   :  { %v2789_v32 = vsel %vm2095_vm3, %v4409_v31, 0.0 }
0x14e1   :  { %2790 = vadd.xlane.f32.xlu0 %v2789_v32 }
0x14e2   :  { %v3034_v52 = vpop.permute.xlu1 %3033 }
0x14e5   :  { %v4411_v33 = vpop.eup %4410 }
0x14e6   :  { %v2792_v45 = vsel %vm2095_vm3, %v4411_v33, 0.0 }
0x14e7   :  { %2793 = vadd.xlane.f32.xlu0 %v2792_v45 }
0x14fd   :  { %4335 = vrot.lane.b32.xlu0 %v4872_v40, %s4440_s27 }
0x156e   :  { %v2791_v53 = vpop.xlane.xlu0 %2790 }
0x156f   :  { %4412 = vrcp.f32 %v2791_v53 }
0x1574   :  { %v2794_v54 = vpop.xlane.xlu0 %2793 }
0x1575   :  { %4414 = vrcp.f32 %v2794_v54 }
0x1578   :  { %v4336_v35 = vpop.permute.xlu0 %4335 }
0x1579   :  { %v4413_v51 = vpop.eup %4412  ;;  %v4338_v38 = vunpack.i.h.bf16 %v4336_v35  ;;  %v4337_v39 = vunpack.i.l.bf16 %v4336_v35 }
0x157a   :  { %v2797_v0 = vmul.f32 %v4413_v51, %v4409_v31 }
0x157b   :  { %v4253_v41 = vpack.c.bf16 %v4338_v38, %v4337_v39 }
0x157c   :  { %4096 = vmatmul.mubr.msk.f32.vlgmr.msra.gmra.mrb[30].mxu0 %vm2095_vm3, %v2797_v0 }
0x157d   :  { %4255 = vmatpush3.bf16.xpose.msk.msra.mxu0 %vm4864_vm15, %v4253_v41  ;;  %4109 = vmatprep.mubr.msk.f32.mxu0 %vm4433_vm5, %v4432_v46 }
0x157e   :  { %4260 = vmatprep.subr.bf16.mxu0 %v4444_v48 }
0x157f   :  { %v4415_v40 = vpop.eup %4414 }
0x1580   :  { %v2798_v44 = vmul.f32 %v4415_v40, %v4411_v33 }
0x1582   :  { %4103 = vmatmul.mubr.msk.f32.vlgmr.msra.gmra.mrb[34].mxu1 %vm2095_vm3, %v2798_v44 }
0x1583   :  { %4259 = vmatpush3.bf16.xpose.msk.msra.mxu1 %vm4864_vm15, %v4257_v47  ;;  %4116 = vmatprep.mubr.msk.f32.mxu1 %vm4433_vm5, %v4432_v46 }
0x1584   :  { %4110 = vmatmul.mubr.msk.f32.vlgmr.msra.gmra.mrb[32].mxu0 %vm237_vm6, %v2952_v50  ;;  %4264 = vmatprep.subr.bf16.mxu1 %v4444_v48 }
0x1585   :  { %4263 = vmatpush3.bf16.msk.msra.mxu0 %vm4868_vm2, %v4253_v41  ;;  %4123 = vmatprep.mubr.msk.f32.mxu0 %vm4433_vm5, %v4432_v46 }
0x158a   :  { %4117 = vmatmul.mubr.msk.f32.vlgmr.msra.gmra.mrb[36].mxu1 %vm237_vm6, %v3034_v52 }
0x158b   :  { %4267 = vmatpush3.bf16.msk.msra.mxu1 %vm4868_vm2, %v4257_v47  ;;  %4130 = vmatprep.mubr.msk.f32.mxu1 %vm4433_vm5, %v4432_v46 }
0x164f   :  { %v2871_v36 = vpop.f32.mrb[30].mxu0 }
0x1650   :  { %v4097_v55 = vpop.f32.mrb[31].mxu0 }
0x1655   :  { %v2947_v56 = vpop.f32.mrb[34].mxu1 }
0x1656   :  { %v4104_v57 = vpop.f32.mrb[35].mxu1 }
0x1657   :  { %v3029_v48 = vpop.f32.mrb[32].mxu0 }
0x1658   :  { %v3115_v58 = vmul.f32 0.35355338, %v3029_v48  ;;  %v4111_v59 = vpop.f32.mrb[33].mxu0 }
0x1659   :  { %v3474_v59 = vld [vmem:[%s5151_s18 + $0x8] sm:$0xff] }
0x165a   :  { %v3117_v60 = vsel %vm2095_vm3, %v3115_v58, -inf }
0x165b   :  { %3118 = vmax.xlane.f32.xlu0 %v3117_v60  ;;  %v3475_v60 = vld [vmem:[%s5151_s18 + $0x10] sm:$0xff] }
0x165d   :  { %v3111_v61 = vpop.f32.mrb[36].mxu1 }
0x165e   :  { %v3116_v62 = vmul.f32 0.35355338, %v3111_v61  ;;  %v4118_v63 = vpop.f32.mrb[37].mxu1 }
0x1660   :  { %v3120_v3 = vsel %vm2095_vm3, %v3116_v62, -inf }
0x1661   :  { %3121 = vmax.xlane.f32.xlu1 %v3120_v3  ;;  %v3567_v3 = vld [vmem:[%s5152_s20] sm:$0xff] }
0x1672   :  { %3295 = vrot.lane.b32.xlu1 %v4981_v13, %s4441_s3 }
0x1676   :  { %3301 = vrot.lane.b32.xlu1 %v2871_v36, %s4442_s28 }
0x167a   :  { %3303 = vrot.lane.b32.xlu1 %v2947_v56, %s4442_s28 }
0x16e8   :  { %v3119_v46 = vpop.xlane.xlu0 %3118 }
0x16e9   :  { %v3123_v37 = vsub.f32 %v3115_v58, %v3119_v46  ;;  %v3473_v58 = vld [vmem:[%s5151_s18] sm:$0xff]  ;;  %v3568_v46 = vld [vmem:[%s5152_s20 + $0x8] sm:$0xff] }
0x16ea   :  { %v4276_v61 = vpack.c.bf16 %v3474_v59, %v3473_v58 }
0x16eb   :  { %v3125_v4 = vmul.f32 1.442695, %v3123_v37  ;;  %v3569_v37 = vld [vmem:[%s5152_s20 + $0x10] sm:$0xff] }
0x16ec   :  { %4277 = vmatprep.subr.bf16.mxu1 %v4276_v61 }
0x16ed   :  { %4416 = vpow2.f32 %v3125_v4  ;;  %v4284_v4 = vpack.c.bf16 %v3568_v46, %v3567_v3 }
0x16ee   :  { %v3122_v5 = vpop.xlane.xlu1 %3121 }
0x16ef   :  { %v3124_v6 = vsub.f32 %v3116_v62, %v3122_v5  ;;  %v3476_v62 = vld [vmem:[%s5151_s18 + $0x18] sm:$0xff] }
0x16f0   :  { %v4280_v63 = vpack.c.bf16 %v3476_v62, %v3475_v60  ;;  %v3570_v5 = vld [vmem:[%s5152_s20 + $0x18] sm:$0xff] }
0x16f1   :  { %v3127_v7 = vmul.f32 1.442695, %v3124_v6  ;;  %v4288_v6 = vpack.c.bf16 %v3570_v5, %v3569_v37 }
0x16f2   :  { %v3296_v29 = vpop.permute.xlu1 %3295 }
0x16f3   :  { %4418 = vpow2.f32 %v3127_v7  ;;  %v3316_v35 = vsel %vm237_vm6, %v4941_v26, %v3296_v29  ;;  %v3571_v7 = vld [vmem:[%s5152_s20 + $0x20] sm:$0xff] }
0x16f6   :  { %v3302_v31 = vpop.permute.xlu1 %3301 }
0x16f7   :  { %v4417_v8 = vpop.eup %4416 }
0x16f8   :  { %v3129_v2 = vsel %vm2095_vm3, %v4417_v8, 0.0 }
0x16f9   :  { %3130 = vadd.xlane.f32.xlu0 %v3129_v2 }
0x16fa   :  { %v3304_v54 = vpop.permute.xlu1 %3303 }
0x16fb   :  { %v3318_v51 = vsel %vm1581_vm9, %v3316_v35, %v3304_v54  ;;  %v3573_v35 = vld [vmem:[%s5152_s20 + $0x30] sm:$0xff] }
0x16fd   :  { %v4419_v9 = vpop.eup %4418 }
0x16fe   :  { %v3132_v10 = vsel %vm2095_vm3, %v4419_v9, 0.0 }
0x16ff   :  { %3133 = vadd.xlane.f32.xlu0 %v3132_v10 }
0x1715   :  { %3293 = vrot.lane.b32.xlu0 %v4979_v11, %s4441_s3  ;;  %v3322_v11 = vld [vmem:[%s5149_s14 + $0x8] sm:$0xff] }
0x1716   :  { %v4268_v19 = vpack.c.bf16 %v3322_v11, %v3321_v18 }
0x1718   :  { %4269 = vmatprep.subr.bf16.mxu0 %v4268_v19 }
0x1786   :  { %v3131_v12 = vpop.xlane.xlu0 %3130 }
0x1787   :  { %4420 = vrcp.f32 %v3131_v12 }
0x178c   :  { %v3134_v13 = vpop.xlane.xlu0 %3133 }
0x178d   :  { %4422 = vrcp.f32 %v3134_v13 }
0x1790   :  { %v3294_v30 = vpop.permute.xlu0 %3293 }
0x1791   :  { %v4421_v14 = vpop.eup %4420  ;;  %v3315_v32 = vsel %vm237_vm6, %v4939_v49, %v3294_v30  ;;  %v3753_v49 = vld [vmem:[%s5150_s15] ss:$0 sm:$0xff] }
0x1792   :  { %v3137_v15 = vmul.f32 %v4421_v14, %v4417_v8  ;;  %v3317_v45 = vsel %vm1581_vm9, %v3315_v32, %v3302_v31  ;;  %v3572_v8 = vld [vmem:[%s5152_s20 + $0x28] sm:$0xff]  ;;  %v3757_v30 = vld [vmem:[%s5154_s17] ss:$0 sm:$0xff] }
0x1793   :  { %v4292_v2 = vpack.c.bf16 %v3572_v8, %v3571_v7 }
0x1794   :  { %4124 = vmatmul.mubr.msk.f32.vlgmr.msra.gmra.mrb[34].mxu0 %vm2095_vm3, %v3137_v15 }
0x1795   :  { %4271 = vmatpush3.bf16.msra.mxu0 %v4268_v19 }
0x1796   :  { %4273 = vmatprep.subr.bf16.mxu0 %v4272_v22 }
0x1797   :  { %v4423_v16 = vpop.eup %4422 }
0x1798   :  { %v3138_v17 = vmul.f32 %v4423_v16, %v4419_v9 }
0x1799   :  { %4275 = vmatpush3.bf16.msra.mxu0 %v4272_v22 }
0x179a   :  { %4131 = vmatmul.mubr.msk.f32.vlgmr.msra.gmra.mrb[38].mxu1 %vm2095_vm3, %v3138_v17  ;;  %4285 = vmatprep.subr.bf16.mxu0 %v4284_v4 }
0x179b   :  { %4279 = vmatpush3.bf16.msra.mxu1 %v4276_v61 }
0x179c   :  { %4281 = vmatprep.subr.bf16.mxu1 %v4280_v63 }
0x179f   :  { %4283 = vmatpush3.bf16.msra.mxu1 %v4280_v63 }
0x1867   :  { %v3211_v23 = vpop.f32.mrb[34].mxu0 }
0x1868   :  { %v4125_v24 = vpop.f32.mrb[35].mxu0  ;;  %3309 = vrot.lane.b32.xlu0 %v3211_v23, %s5183_s12 }
0x186d   :  { %v3287_v25 = vpop.f32.mrb[38].mxu1 }
0x186e   :  { %3311 = vrot.lane.b32.xlu1 %v3287_v25, %s5183_s12  ;;  %v4132_v27 = vpop.f32.mrb[39].mxu1 }
0x186f   :  { %v3756_v27 = vld [vmem:[%s5153_s16] ss:$0 sm:$0xff] }
0x18da   :  { %v3310_v33 = vpop.permute.xlu0 %3309 }
0x18db   :  { %v3319_v53 = vsel %vm1584_vm8, %v3317_v45, %v3310_v33 }
0x18dc   :  { %4141 = vmatprep.mubr.msk.f32.mxu0 %vm78_vm0, %v3319_v53 }
0x18e0   :  { %v3312_v38 = vpop.permute.xlu1 %3311 }
0x18e1   :  { %v3320_v39 = vsel %vm1584_vm8, %v3318_v51, %v3312_v38  ;;  %v3574_v51 = vld [vmem:[%s5152_s20 + $0x38] sm:$0xff]  ;;  %vm3582_vm8 = vcmask 523264  }
0x18e2   :  { %4142 = vmatmul.mubr.msk.f32.vlgmr.msra.gmra.mrb[36].mxu0 %vm78_vm0, %v3320_v39  ;;  %v4296_v38 = vpack.c.bf16 %v3574_v51, %v3573_v35  ;;  %v3758_v39 = vld [vmem:[%s5155_s19] ss:$0 sm:$0xff] }
0x18e3   :  { %4287 = vmatpush3.bf16.msra.mxu0 %v4284_v4 }
0x18e4   :  { %4289 = vmatprep.subr.bf16.mxu0 %v4288_v6 }
0x18e7   :  { %4291 = vmatpush3.bf16.msra.mxu0 %v4288_v6 }
0x18e8   :  { %4293 = vmatprep.subr.bf16.mxu0 %v4292_v2 }
0x18eb   :  { %4295 = vmatpush3.bf16.msra.mxu0 %v4292_v2 }
0x18ec   :  { %4297 = vmatprep.subr.bf16.mxu0 %v4296_v38 }
0x18ef   :  { %4299 = vmatpush3.bf16.msra.mxu0 %v4296_v38 }
0x19b5   :  { %v4143_v1 = vpop.f32.mrb[36].mxu0 }
0x19b6   :  { %v3410_v0 = vadd.f32 %v4143_v1, %v3753_v49  ;;  %v3404_v41 = vpop.f32.mrb[37].mxu0 }
0x19b7   :  { %v3405_v42 = vadd.f32 %v3753_v49, %v3404_v41 }
0x19b8   :  { %v5057_v43 = vadd.f32 %v3410_v0, %v4780_v28 }
0x19b9   :  { %v5060_v26 = vadd.f32 %v3405_v42, %v4783_v34 }
0x19ba   :  { %v3420_v40 = vsel %vm78_vm0, %v5057_v43, 0.0 }
0x19bb   :  { %3421 = vadd.xlane.f32.xlu1 %v3420_v40  ;;  %v3417_v44 = vsel %vm78_vm0, %v5060_v26, 0.0 }
0x19bc   :  { %3418 = vadd.xlane.f32.xlu0 %v3417_v44  ;;  %v3761_v44 = vld [vmem:[%s5156_s21] ss:$0 sm:$0xff] }
0x1a48   :  { %v3422_v47 = vpop.xlane.xlu1 %3421 }
0x1a49   :  { %v3424_v50 = vmul.f32 0.03125, %v3422_v47  ;;  %v3419_v52 = vpop.xlane.xlu0 %3418 }
0x1a4a   :  { %v3423_v36 = vmul.f32 0.03125, %v3419_v52 }
0x1a4b   :  { %v5067_v55 = vsub.f32 %v5057_v43, %v3424_v50 }
0x1a4c   :  { %v3425_v28 = vsub.f32 %v5060_v26, %v3423_v36 }
0x1a4d   :  { %v3428_v57 = vmul.f32 %v5067_v55, %v5067_v55 }
0x1a4e   :  { %v3427_v56 = vmul.f32 %v3425_v28, %v3425_v28 }
0x1a4f   :  { %v3432_v48 = vsel %vm78_vm0, %v3428_v57, 0.0 }
0x1a50   :  { %v3429_v34 = vsel %vm78_vm0, %v3427_v56, 0.0 }
0x1a51   :  { %3430 = vadd.xlane.f32.xlu0 %v3429_v34 }
0x1a55   :  { %3433 = vadd.xlane.f32.xlu0 %v3432_v48 }
0x1ade   :  { %v3431_v9 = vpop.xlane.xlu0 %3430 }
0x1adf   :  { %v3435_v10 = vmul.f32 0.032258064, %v3431_v9 }
0x1ae1   :  { %4424 = vrsqrt.f32 %v3435_v10  ;;  %vm3439_vm4 = vcmp.eq.f32.partialorder %v3435_v10, inf  ;;  %v3442_v16 = vand.u32 2147483648, %v3435_v10  ;;  %vm3441_vm5 = vcmp.eq.f32.partialorder %v3435_v10, 0.0 }
0x1ae2   :  { %v3434_v12 = vpop.xlane.xlu0 %3433 }
0x1ae3   :  { %v3436_v13 = vmul.f32 0.032258064, %v3434_v12 }
0x1ae5   :  { %4426 = vrsqrt.f32 %v3436_v13  ;;  %vm3446_vm6 = vcmp.eq.f32.partialorder %v3436_v13, inf  ;;  %v3449_v21 = vand.u32 2147483648, %v3436_v13  ;;  %vm3448_vm7 = vcmp.eq.f32.partialorder %v3436_v13, 0.0 }
0x1aeb   :  { %v4425_v14 = vpop.eup %4424 }
0x1aec   :  { %v3438_v15 = vmul.f32 %v4425_v14, %v3435_v10 }
0x1aee   :  { %v3440_v17 = vsel %vm3439_vm4, %v3435_v10, %v3438_v15 }
0x1aef   :  { %v4427_v18 = vpop.eup %4426  ;;  %v3443_v11 = vsel %vm3441_vm5, %v3442_v16, %v3440_v17 }
0x1af0   :  { %v3451_v19 = vadd.f32 1e-06, %v3443_v11  ;;  %v3445_v20 = vmul.f32 %v4427_v18, %v3436_v13 }
0x1af2   :  { %4428 = vrcp.f32 %v3451_v19  ;;  %v3447_v22 = vsel %vm3446_vm6, %v3436_v13, %v3445_v20 }
0x1af3   :  { %v3450_v23 = vsel %vm3448_vm7, %v3449_v21, %v3447_v22 }
0x1af4   :  { %v3452_v24 = vadd.f32 1e-06, %v3450_v23 }
0x1af6   :  { %4430 = vrcp.f32 %v3452_v24 }
0x1afc   :  { %v4429_v25 = vpop.eup %4428 }
0x1afd   :  { %v3454_v29 = vmul.f32 %v4429_v25, %v3425_v28 }
0x1aff   :  { %v3463_v31 = vmul.f32 %v3756_v27, %v3454_v29 }
0x1b00   :  { %v4431_v32 = vpop.eup %4430 }
0x1b01   :  { %v3456_v33 = vmul.f32 %v4431_v32, %v5067_v55  ;;  %v3471_v45 = vadd.f32 %v3757_v30, %v3463_v31 }
0x1b03   :  { %v3464_v53 = vmul.f32 %v3756_v27, %v3456_v33  ;;  %4152 = vmatprep.mubr.msk.f32.mxu1 %vm78_vm0, %v3471_v45 }
0x1b05   :  { %v3472_v54 = vadd.f32 %v3757_v30, %v3464_v53 }
0x1b07   :  { %4153 = vmatmul.mubr.msk.f32.vlgmr.msra.gmra.mrb[40].mxu1 %vm78_vm0, %v3472_v54 }
0x1bda   :  { %v4154_v49 = vpop.f32.mrb[40].mxu1 }
0x1bdb   :  { %v3562_v1 = vadd.f32 %v4154_v49, %v3758_v39  ;;  %v3556_v0 = vpop.f32.mrb[41].mxu1 }
0x1bdc   :  { %v3557_v41 = vadd.f32 %v3758_v39, %v3556_v0 }
0x1bdd   :  { %v3566_v40 = vmax.f32 %v3562_v1, 0.0 }
0x1bde   :  { %v3565_v42 = vmax.f32 %v3557_v41, 0.0 }
0x1be0   :  { %4171 = vmatprep.mubr.msk.f32.mxu0 %vm3582_vm8, %v3565_v42 }
0x1be1   :  { %4172 = vmatmul.mubr.msk.f32.vlgmr.msra.gmra.mrb[38].mxu0 %vm3582_vm8, %v3566_v40 }
0x1cb4   :  { %v4173_v47 = vpop.f32.mrb[38].mxu0 }
0x1cb5   :  { %v3661_v50 = vadd.f32 %v4173_v47, %v3761_v44  ;;  %v3655_v52 = vpop.f32.mrb[39].mxu0 }
0x1cb6   :  { %v3656_v36 = vadd.f32 %v3761_v44, %v3655_v52 }
0x1cb7   :  { %v3665_v55 = vadd.f32 %v3661_v50, %v5057_v43 }
0x1cb8   :  { %v3664_v28 = vadd.f32 %v3656_v36, %v5060_v26 }
0x1cb9   :  { %3667 = vst.msk [vmem:[%s5157_s22 + $0x8] sm:$0xff] %vm78_vm0, %v3665_v55 }
0x1cba   :  { %3666 = vst.msk [vmem:[%s5157_s22] sm:$0xff] %vm78_vm0, %v3664_v28 }

// kernel: _model_decoder_forward.5
= control target key start
LH: loop header
LB: loop body
LE: loop exit
PB: predicated region body
PF: predicated region fallthrough
CT: control target
= control target key end

     0   :  { %s5277_s0 = inlined_call_operand.vmem [shape: f32[16,32], index: 0, kind: input, shape index: {}]   ;;  %s5278_s1 = inlined_call_operand.vmem [shape: f32[24,32], index: 1, kind: input, shape index: {}]   ;;  %s5279_s2 = inlined_call_operand.vmem [shape: f32[1,32], index: 2, kind: input, shape index: {}]   ;;  %s5280_s3 = inlined_call_operand.vmem [shape: f32[1,32], index: 3, kind: input, shape index: {}]   ;;  %s5281_s4 = inlined_call_operand.vmem [shape: f32[32,64], index: 4, kind: input, shape index: {}]   ;;  %s5282_s5 = inlined_call_operand.vmem [shape: f32[1,64], index: 5, kind: input, shape index: {}]   ;;  %s5283_s6 = inlined_call_operand.vmem [shape: f32[32,32], index: 6, kind: input, shape index: {}]   ;;  %s5284_s7 = inlined_call_operand.vmem [shape: f32[1,32], index: 7, kind: input, shape index: {}]   ;;  %s5285_s8 = inlined_call_operand.vmem [shape: f32[1,32], index: 8, kind: input, shape index: {}]   ;;  %s5286_s9 = inlined_call_operand.vmem [shape: f32[1,32], index: 9, kind: input, shape index: {}]   ;;  %s5287_s10 = inlined_call_operand.vmem [shape: f32[32,32], index: 10, kind: input, shape index: {}]   ;;  %s5288_s11 = inlined_call_operand.vmem [shape: f32[1,32], index: 11, kind: input, shape index: {}]   ;;  %s5289_s12 = inlined_call_operand.vmem [shape: f32[32,32], index: 12, kind: input, shape index: {}]   ;;  %s5290_s13 = inlined_call_operand.vmem [shape: f32[1,32], index: 13, kind: input, shape index: {}]   ;;  %s5291_s14 = inlined_call_operand.vmem [shape: f32[32,32], index: 14, kind: input, shape index: {}]   ;;  %s5292_s15 = inlined_call_operand.vmem [shape: f32[1,32], index: 15, kind: input, shape index: {}]   ;;  %s5293_s16 = inlined_call_operand.vmem [shape: f32[1,32], index: 16, kind: input, shape index: {}]   ;;  %s5294_s17 = inlined_call_operand.vmem [shape: f32[1,32], index: 17, kind: input, shape index: {}]   ;;  %s5295_s18 = inlined_call_operand.vmem [shape: f32[32,64], index: 18, kind: input, shape index: {}]   ;;  %s5296_s19 = inlined_call_operand.vmem [shape: f32[1,64], index: 19, kind: input, shape index: {}]   ;;  %s5297_s20 = inlined_call_operand.vmem [shape: f32[64,32], index: 20, kind: input, shape index: {}]   ;;  %s5298_s21 = inlined_call_operand.vmem [shape: f32[1,32], index: 21, kind: input, shape index: {}]   ;;  %s5299_s22 = inlined_call_operand.vmem [shape: f32[1,32], index: 22, kind: input, shape index: {}]   ;;  %s5300_s23 = inlined_call_operand.vmem [shape: f32[1,32], index: 23, kind: input, shape index: {}]   ;;  %s5301_s24 = inlined_call_operand.hbm [shape: f32[16,32], index: 24, kind: output, shape index: {}]  }
   0x1   :  { %5310 = sst [smem:[#allocation5_spill]] %s5277_s0 }
   0x2   :  { %5311 = sst [smem:[#allocation6_spill]] %s5278_s1 }
   0x3   :  { %5312 = sst [smem:[#allocation7_spill]] %s5279_s2 }
   0x4   :  { %5313 = sst [smem:[#allocation8_spill]] %s5280_s3 }
   0x5   :  { %5314 = sst [smem:[#allocation9_spill]] %s5281_s4 }
   0x6   :  { %5315 = sst [smem:[#allocation10_spill]] %s5282_s5 }
   0x7   :  { %5316 = sst [smem:[#allocation11_spill]] %s5283_s6 }
   0x8   :  { %5317 = sst [smem:[#allocation12_spill]] %s5284_s7 }
   0x9   :  { %5318 = sst [smem:[#allocation13_spill]] %s5285_s8 }
   0xa   :  { %s5319_s27 = sld [smem:[#allocation5_spill]]  ;;  %vm85_vm0 = vcmask 261120  }
  0x10   :  { %v4689_v0 = vld [vmem:[%s5319_s27] sm:$0xff]  ;;  %v4694_v1 = vld [vmem:[%s5319_s27 + $0x8] sm:$0xff] }
  0x11   :  { %29 = vsyncpa [#allocation3], 0  ;;  %v86_v2 = vsel %vm85_vm0, %v4689_v0, 0.0  ;;  %v89_v3 = vsel %vm85_vm0, %v4694_v1, 0.0  ;;  %s5320_s0 = sld [smem:[#allocation9_spill]]  ;;  %s5321_s26 = sld [smem:[#allocation7_spill]]  ;;  %v236_v54 = vlaneseq }
  0x12   :  { %87 = vadd.xlane.f32.xlu0 %v86_v2  ;;  %s5322_s6 = sld [smem:[#allocation8_spill]]  ;;  %v4545_v46 = vmov 0.0   ;;  %vm4546_vm5 = vmmov 0   ;;  %s4547_s7 = smov 96   ;;  %vm244_vm6 = vcmask 64512   ;;  %vm1591_vm8 = vcmask 195584  }
  0x13   :  { %3991 = vmatprep.subr.mxu0 %v4545_v46  ;;  %3993 = vmatprep.mubr.msk.f32.mxu0 %vm4546_vm5, %v4545_v46  ;;  %v237_v55 = vshrl.u32 %v236_v54, 7  ;;  %v239_v56 = vand.u32 127, %v236_v54  ;;  %s4548_s30 = smov 88   ;;  %s4549_s3 = smov 120   ;;  %vm1588_vm9 = vcmask 130048   ;;  %vm2129_vm14 = vcmask 1043456   ;;  %vm4989_vm15 = vmpackc.low %vm244_vm6, %vm244_vm6 }
  0x14   :  { %s4550_s25 = smov 80   ;;  %s4551_s8 = smov 112  }
  0x15   :  { %vm4753_vm7 = vcmp.ge.s32.totalorder %v237_v55, %v239_v56  ;;  %s4552_s4 = smov 72   ;;  %s4553_s1 = smov 104  }
  0x16   :  { %90 = vadd.xlane.f32.xlu0 %v89_v3  ;;  %s4554_s5 = smov 8   ;;  %s5328_s29 = sld [smem:[#allocation6_spill]] }
  0x17   :  { %v144_v14 = vld [vmem:[%s5320_s0] sm:$0xff]  ;;  %v145_v15 = vld [vmem:[%s5320_s0 + $0x8] sm:$0xff]  ;;  %v146_v16 = vld [vmem:[%s5320_s0 + $0x10] sm:$0xff] }
  0x18   :  { %v4253_v17 = vpack.c.bf16 %v145_v15, %v144_v14  ;;  %v147_v18 = vld [vmem:[%s5320_s0 + $0x18] sm:$0xff]  ;;  %v3749_v37 = vld [vmem:[%s5321_s26] ss:$0 sm:$0xff]  ;;  %s5323_s0 = sld [smem:[#allocation10_spill]]  ;;  %s5308_s26 = smov 16  }
  0x19   :  { %v4257_v19 = vpack.c.bf16 %v147_v18, %v146_v16  ;;  %v3750_v39 = vld [vmem:[%s5322_s6] ss:$0 sm:$0xff]  ;;  %s5326_s6 = sld [smem:[#allocation11_spill]] }
  0x1a   :  { %4254 = vmatprep.subr.bf16.mxu1 %v4253_v17 }
  0x1b   :  { %4256 = vmatpush3.bf16.msra.mxu1 %v4253_v17 }
  0x1c   :  { %4258 = vmatprep.subr.bf16.mxu1 %v4257_v19 }
  0x1e   :  { %v3751_v47 = vld [vmem:[%s5323_s0] ss:$0 sm:$0xff] }
  0x1f   :  { %4260 = vmatpush3.bf16.msra.mxu1 %v4257_v19 }
  0x20   :  { %3981 = vmatprep.subr.mxu1 %v4545_v46 }
  0x9f   :  { %v88_v4 = vpop.xlane.xlu0 %87 }
  0xa0   :  { %v93_v5 = vmul.f32 0.03125, %v88_v4 }
  0xa2   :  { %v95_v6 = vsub.f32 %v4689_v0, %v93_v5 }
  0xa3   :  { %v91_v7 = vpop.xlane.xlu0 %90 }
  0xa4   :  { %v94_v8 = vmul.f32 0.03125, %v91_v7  ;;  %v97_v9 = vmul.f32 %v95_v6, %v95_v6 }
  0xa6   :  { %v96_v10 = vsub.f32 %v4694_v1, %v94_v8  ;;  %v99_v11 = vsel %vm85_vm0, %v97_v9, 0.0 }
  0xa7   :  { %100 = vadd.xlane.f32.xlu1 %v99_v11 }
  0xa8   :  { %v98_v12 = vmul.f32 %v96_v10, %v96_v10 }
  0xaa   :  { %v102_v13 = vsel %vm85_vm0, %v98_v12, 0.0 }
  0xab   :  { %103 = vadd.xlane.f32.xlu1 %v102_v13 }
 0x134   :  { %v101_v20 = vpop.xlane.xlu1 %100 }
 0x135   :  { %v106_v21 = vmul.f32 0.032258064, %v101_v20 }
 0x137   :  { %4425 = vrsqrt.f32 %v106_v21  ;;  %vm110_vm1 = vcmp.eq.f32.partialorder %v106_v21, inf  ;;  %v113_v26 = vand.u32 2147483648, %v106_v21  ;;  %vm112_vm2 = vcmp.eq.f32.partialorder %v106_v21, 0.0 }
 0x138   :  { %v104_v22 = vpop.xlane.xlu1 %103 }
 0x139   :  { %v107_v23 = vmul.f32 0.032258064, %v104_v22 }
 0x13b   :  { %4427 = vrsqrt.f32 %v107_v23  ;;  %vm117_vm3 = vcmp.eq.f32.partialorder %v107_v23, inf  ;;  %v120_v32 = vand.u32 2147483648, %v107_v23  ;;  %vm119_vm4 = vcmp.eq.f32.partialorder %v107_v23, 0.0 }
 0x141   :  { %v4426_v24 = vpop.eup %4425 }
 0x142   :  { %v109_v25 = vmul.f32 %v4426_v24, %v106_v21 }
 0x144   :  { %v111_v27 = vsel %vm110_vm1, %v106_v21, %v109_v25  ;;  %vm4558_vm1 = vmmov 1  }
 0x145   :  { %v4428_v28 = vpop.eup %4427  ;;  %v114_v29 = vsel %vm112_vm2, %v113_v26, %v111_v27  ;;  %vm4993_vm2 = vmpackc.low %vm2129_vm14, %vm4558_vm1 }
 0x146   :  { %v116_v30 = vmul.f32 %v4428_v28, %v107_v23  ;;  %v122_v31 = vadd.f32 1e-06, %v114_v29 }
 0x148   :  { %v118_v33 = vsel %vm117_vm3, %v107_v23, %v116_v30  ;;  %4429 = vrcp.f32 %v122_v31  ;;  %vm2102_vm3 = vcmask 97280  }
 0x149   :  { %v121_v34 = vsel %vm119_vm4, %v120_v32, %v118_v33 }
 0x14a   :  { %v123_v35 = vadd.f32 1e-06, %v121_v34 }
 0x14c   :  { %4431 = vrcp.f32 %v123_v35 }
 0x152   :  { %v4430_v36 = vpop.eup %4429 }
 0x153   :  { %v125_v38 = vmul.f32 %v4430_v36, %v95_v6 }
 0x155   :  { %v134_v40 = vmul.f32 %v3749_v37, %v125_v38 }
 0x156   :  { %v4432_v41 = vpop.eup %4431 }
 0x157   :  { %v127_v42 = vmul.f32 %v4432_v41, %v96_v10  ;;  %v142_v43 = vadd.f32 %v3750_v39, %v134_v40 }
 0x159   :  { %v135_v44 = vmul.f32 %v3749_v37, %v127_v42  ;;  %3978 = vmatprep.mubr.msk.f32.mxu1 %vm85_vm0, %v142_v43 }
 0x15b   :  { %v143_v45 = vadd.f32 %v3750_v39, %v135_v44 }
 0x15d   :  { %3979 = vmatmul.mubr.msk.f32.vlgmr.msra.gmra.mrb[0].mxu1 %vm85_vm0, %v143_v45 }
 0x15e   :  { %3983 = vmatprep.mubr.msk.f32.mxu1 %vm4546_vm5, %v4545_v46 }
 0x230   :  { %v3980_v48 = vpop.f32.mrb[0].mxu1 }
 0x231   :  { %v4733_v49 = vadd.f32 %v3980_v48, %v3751_v47  ;;  %v227_v50 = vpop.f32.mrb[1].mxu1 }
 0x232   :  { %v4735_v51 = vadd.f32 %v3751_v47, %v227_v50 }
 0x233   :  { %320 = vrot.lane.b32.xlu1 %v4733_v49, %s4547_s7 }
 0x234   :  { %242 = vrot.lane.b32.xlu0 %v4735_v51, %s4547_s7 }
 0x2a5   :  { %v321_v53 = vpop.permute.xlu1 %320 }
 0x2a6   :  { %v243_v52 = vpop.permute.xlu0 %242 }
 0x2a7   :  { %3982 = vmatpush3.xpose.msk.msra.mxu1 %vm244_vm6, %v243_v52  ;;  %3992 = vmatpush3.msra.mxu0 %v243_v52 }
 0x2a8   :  { %3986 = vmatprep.subr.mxu1 %v4545_v46  ;;  %4001 = vmatprep.subr.mxu0 %v4545_v46 }
 0x2aa   :  { %3984 = vmatmul.mubr.msk.f32.vlgmr.msra.gmra.mrb[2].mxu1 %vm244_vm6, %v4735_v51 }
 0x2ab   :  { %3987 = vmatpush3.xpose.msk.msra.mxu1 %vm244_vm6, %v321_v53  ;;  %3988 = vmatprep.mubr.msk.f32.mxu1 %vm4546_vm5, %v4545_v46 }
 0x2ac   :  { %3996 = vmatprep.subr.mxu1 %v4545_v46 }
 0x2ae   :  { %3989 = vmatmul.mubr.msk.f32.vlgmr.msra.gmra.mrb[4].mxu1 %vm244_vm6, %v4733_v49 }
 0x2af   :  { %3997 = vmatpush3.msra.mxu1 %v321_v53  ;;  %3998 = vmatprep.mubr.msk.f32.mxu1 %vm4546_vm5, %v4545_v46 }
 0x2b0   :  { %4006 = vmatprep.subr.mxu1 %v4545_v46 }
 0x37d   :  { %v315_v57 = vpop.f32.mrb[2].mxu1 }
 0x37e   :  { %v396_v59 = vmul.f32 0.35355338, %v315_v57  ;;  %v3985_v60 = vpop.f32.mrb[3].mxu1 }
 0x380   :  { %v400_v61 = vsel %vm4753_vm7, %v396_v59, -1e+30 }
 0x381   :  { %v392_v62 = vpop.f32.mrb[4].mxu1  ;;  %v402_v63 = vsel %vm244_vm6, %v400_v61, -inf }
 0x382   :  { %v397_v2 = vmul.f32 0.35355338, %v392_v62  ;;  %403 = vmax.xlane.f32.xlu1 %v402_v63  ;;  %v3990_v3 = vpop.f32.mrb[5].mxu1 }
 0x384   :  { %v401_v4 = vsel %vm4753_vm7, %v397_v2, -1e+30 }
 0x385   :  { %v405_v5 = vsel %vm244_vm6, %v401_v4, -inf }
 0x386   :  { %406 = vmax.xlane.f32.xlu0 %v405_v5 }
 0x393   :  { %652 = vrot.lane.b32.xlu1 %v4733_v49, %s4548_s30 }
 0x397   :  { %572 = vrot.lane.b32.xlu1 %v4735_v51, %s4549_s3 }
 0x40f   :  { %v404_v6 = vpop.xlane.xlu1 %403 }
 0x410   :  { %v408_v7 = vsub.f32 %v400_v61, %v404_v6 }
 0x412   :  { %v410_v8 = vmul.f32 1.442695, %v408_v7 }
 0x413   :  { %v407_v9 = vpop.xlane.xlu0 %406  ;;  %v653_v16 = vpop.permute.xlu1 %652 }
 0x414   :  { %4433 = vpow2.f32 %v410_v8  ;;  %v409_v10 = vsub.f32 %v401_v4, %v407_v9 }
 0x416   :  { %v412_v11 = vmul.f32 1.442695, %v409_v10 }
 0x417   :  { %v573_v17 = vpop.permute.xlu1 %572 }
 0x418   :  { %4435 = vpow2.f32 %v412_v11 }
 0x41e   :  { %v4434_v12 = vpop.eup %4433 }
 0x41f   :  { %v414_v13 = vsel %vm244_vm6, %v4434_v12, 0.0 }
 0x420   :  { %415 = vadd.xlane.f32.xlu0 %v414_v13 }
 0x422   :  { %v4436_v14 = vpop.eup %4435 }
 0x423   :  { %v417_v15 = vsel %vm244_vm6, %v4436_v14, 0.0 }
 0x424   :  { %418 = vadd.xlane.f32.xlu1 %v417_v15 }
 0x435   :  { %650 = vrot.lane.b32.xlu1 %v4733_v49, %s4549_s3 }
 0x436   :  { %574 = vrot.lane.b32.xlu0 %v4735_v51, %s4548_s30 }
 0x4ad   :  { %v416_v18 = vpop.xlane.xlu0 %415 }
 0x4ae   :  { %4437 = vrcp.f32 %v416_v18 }
 0x4b1   :  { %v419_v19 = vpop.xlane.xlu1 %418  ;;  %v575_v22 = vpop.permute.xlu0 %574 }
 0x4b2   :  { %4439 = vrcp.f32 %v419_v19 }
 0x4b5   :  { %v651_v25 = vpop.permute.xlu1 %650 }
 0x4b8   :  { %v4438_v20 = vpop.eup %4437 }
 0x4b9   :  { %v422_v21 = vmul.f32 %v4438_v20, %v4434_v12 }
 0x4bb   :  { %3994 = vmatmul.mubr.msk.f32.vlgmr.msra.gmra.mrb[0].mxu0 %vm244_vm6, %v422_v21 }
 0x4bc   :  { %v4440_v23 = vpop.eup %4439  ;;  %4002 = vmatpush3.xpose.msk.msra.mxu0 %vm244_vm6, %v575_v22  ;;  %4003 = vmatprep.mubr.msk.f32.mxu0 %vm4546_vm5, %v4545_v46 }
 0x4bd   :  { %v423_v24 = vmul.f32 %v4440_v23, %v4436_v14  ;;  %4011 = vmatprep.subr.mxu0 %v4545_v46 }
 0x4bf   :  { %3999 = vmatmul.mubr.msk.f32.vlgmr.msra.gmra.mrb[6].mxu1 %vm244_vm6, %v423_v24  ;;  %4004 = vmatmul.mubr.msk.f32.vlgmr.msra.gmra.mrb[2].mxu0 %vm244_vm6, %v573_v17 }
 0x4c0   :  { %4007 = vmatpush3.xpose.msk.msra.mxu1 %vm244_vm6, %v653_v16  ;;  %4012 = vmatpush3.msra.mxu0 %v575_v22 }
 0x4c1   :  { %4008 = vmatprep.mubr.msk.f32.mxu1 %vm4546_vm5, %v4545_v46  ;;  %4016 = vmatprep.subr.mxu1 %v4545_v46 }
 0x4c2   :  { %4013 = vmatprep.mubr.msk.f32.mxu0 %vm4546_vm5, %v4545_v46  ;;  %4021 = vmatprep.subr.mxu0 %v4545_v46 }
 0x4c3   :  { %4009 = vmatmul.mubr.msk.f32.vlgmr.msra.gmra.mrb[8].mxu1 %vm244_vm6, %v651_v25 }
 0x4c4   :  { %4017 = vmatpush3.msra.mxu1 %v653_v16  ;;  %4018 = vmatprep.mubr.msk.f32.mxu1 %vm4546_vm5, %v4545_v46 }
 0x4c5   :  { %4026 = vmatprep.subr.mxu1 %v4545_v46 }
 0x58e   :  { %v4789_v26 = vpop.f32.mrb[0].mxu0 }
 0x58f   :  { %v3995_v27 = vpop.f32.mrb[1].mxu0 }
 0x592   :  { %v4791_v28 = vpop.f32.mrb[6].mxu1  ;;  %v646_v29 = vpop.f32.mrb[2].mxu0 }
 0x593   :  { %v728_v30 = vmul.f32 0.35355338, %v646_v29  ;;  %v4000_v31 = vpop.f32.mrb[7].mxu1  ;;  %v4005_v32 = vpop.f32.mrb[3].mxu0 }
 0x595   :  { %v730_v33 = vsel %vm4753_vm7, %v728_v30, -1e+30 }
 0x596   :  { %v724_v34 = vpop.f32.mrb[8].mxu1  ;;  %v732_v35 = vsel %vm244_vm6, %v730_v33, -inf }
 0x597   :  { %v729_v36 = vmul.f32 0.35355338, %v724_v34  ;;  %733 = vmax.xlane.f32.xlu0 %v732_v35  ;;  %v4010_v37 = vpop.f32.mrb[9].mxu1 }
 0x599   :  { %v731_v38 = vsel %vm4753_vm7, %v729_v36, -1e+30 }
 0x59a   :  { %v735_v39 = vsel %vm244_vm6, %v731_v38, -inf }
 0x59b   :  { %736 = vmax.xlane.f32.xlu1 %v735_v39 }
 0x5ac   :  { %982 = vrot.lane.b32.xlu1 %v4733_v49, %s4550_s25 }
 0x5b0   :  { %902 = vrot.lane.b32.xlu1 %v4735_v51, %s4551_s8 }
 0x5b4   :  { %980 = vrot.lane.b32.xlu1 %v4733_v49, %s4551_s8 }
 0x624   :  { %v734_v40 = vpop.xlane.xlu0 %733 }
 0x625   :  { %v738_v41 = vsub.f32 %v730_v33, %v734_v40 }
 0x627   :  { %v740_v42 = vmul.f32 1.442695, %v738_v41 }
 0x628   :  { %v737_v43 = vpop.xlane.xlu1 %736 }
 0x629   :  { %4441 = vpow2.f32 %v740_v42  ;;  %v739_v44 = vsub.f32 %v731_v38, %v737_v43 }
 0x62b   :  { %v742_v45 = vmul.f32 1.442695, %v739_v44 }
 0x62c   :  { %v983_v55 = vpop.permute.xlu1 %982 }
 0x62d   :  { %4443 = vpow2.f32 %v742_v45 }
 0x630   :  { %v903_v61 = vpop.permute.xlu1 %902 }
 0x633   :  { %v4442_v47 = vpop.eup %4441 }
 0x634   :  { %v744_v48 = vsel %vm244_vm6, %v4442_v47, 0.0  ;;  %v981_v63 = vpop.permute.xlu1 %980 }
 0x635   :  { %745 = vadd.xlane.f32.xlu0 %v744_v48 }
 0x637   :  { %v4444_v50 = vpop.eup %4443 }
 0x638   :  { %v747_v52 = vsel %vm244_vm6, %v4444_v50, 0.0 }
 0x639   :  { %748 = vadd.xlane.f32.xlu0 %v747_v52 }
 0x64f   :  { %904 = vrot.lane.b32.xlu0 %v4735_v51, %s4550_s25 }
 0x6c2   :  { %v746_v53 = vpop.xlane.xlu0 %745 }
 0x6c3   :  { %4445 = vrcp.f32 %v746_v53 }
 0x6c6   :  { %v749_v54 = vpop.xlane.xlu0 %748 }
 0x6c7   :  { %4447 = vrcp.f32 %v749_v54 }
 0x6ca   :  { %v905_v59 = vpop.permute.xlu0 %904 }
 0x6cd   :  { %v4446_v56 = vpop.eup %4445 }
 0x6ce   :  { %v752_v57 = vmul.f32 %v4446_v56, %v4442_v47 }
 0x6d0   :  { %4014 = vmatmul.mubr.msk.f32.vlgmr.msra.gmra.mrb[4].mxu0 %vm244_vm6, %v752_v57 }
 0x6d1   :  { %v4448_v60 = vpop.eup %4447  ;;  %4022 = vmatpush3.xpose.msk.msra.mxu0 %vm244_vm6, %v905_v59  ;;  %4023 = vmatprep.mubr.msk.f32.mxu0 %vm4546_vm5, %v4545_v46 }
 0x6d2   :  { %v753_v62 = vmul.f32 %v4448_v60, %v4444_v50  ;;  %4031 = vmatprep.subr.mxu0 %v4545_v46 }
 0x6d4   :  { %4019 = vmatmul.mubr.msk.f32.vlgmr.msra.gmra.mrb[10].mxu1 %vm244_vm6, %v753_v62  ;;  %4024 = vmatmul.mubr.msk.f32.vlgmr.msra.gmra.mrb[6].mxu0 %vm244_vm6, %v903_v61 }
 0x6d5   :  { %4027 = vmatpush3.xpose.msk.msra.mxu1 %vm244_vm6, %v983_v55  ;;  %4032 = vmatpush3.msra.mxu0 %v905_v59 }
 0x6d6   :  { %4028 = vmatprep.mubr.msk.f32.mxu1 %vm4546_vm5, %v4545_v46  ;;  %4036 = vmatprep.subr.mxu1 %v4545_v46 }
 0x6d7   :  { %4033 = vmatprep.mubr.msk.f32.mxu0 %vm4546_vm5, %v4545_v46  ;;  %4041 = vmatprep.subr.mxu0 %v4545_v46 }
 0x6d8   :  { %4029 = vmatmul.mubr.msk.f32.vlgmr.msra.gmra.mrb[12].mxu1 %vm244_vm6, %v981_v63 }
 0x6d9   :  { %4037 = vmatpush3.msra.mxu1 %v983_v55  ;;  %4038 = vmatprep.mubr.msk.f32.mxu1 %vm4546_vm5, %v4545_v46 }
 0x6da   :  { %4046 = vmatprep.subr.mxu1 %v4545_v46 }
 0x7a3   :  { %v4825_v2 = vpop.f32.mrb[4].mxu0 }
 0x7a4   :  { %v4015_v3 = vpop.f32.mrb[5].mxu0 }
 0x7a7   :  { %v4827_v4 = vpop.f32.mrb[10].mxu1  ;;  %v976_v5 = vpop.f32.mrb[6].mxu0 }
 0x7a8   :  { %v1058_v6 = vmul.f32 0.35355338, %v976_v5  ;;  %v4020_v7 = vpop.f32.mrb[11].mxu1  ;;  %v4025_v8 = vpop.f32.mrb[7].mxu0 }
 0x7a9   :  { %v1594_v8 = vld [vmem:[%s5326_s6] sm:$0xff] }
 0x7aa   :  { %v1060_v9 = vsel %vm4753_vm7, %v1058_v6, -1e+30 }
 0x7ab   :  { %v1054_v10 = vpop.f32.mrb[12].mxu1  ;;  %v1062_v11 = vsel %vm244_vm6, %v1060_v9, -inf }
 0x7ac   :  { %v1059_v12 = vmul.f32 0.35355338, %v1054_v10  ;;  %1063 = vmax.xlane.f32.xlu0 %v1062_v11  ;;  %v4030_v13 = vpop.f32.mrb[13].mxu1  ;;  %v1596_v10 = vld [vmem:[%s5326_s6 + $0x10] sm:$0xff]  ;;  %v1597_v11 = vld [vmem:[%s5326_s6 + $0x18] sm:$0xff] }
 0x7ae   :  { %v1061_v14 = vsel %vm4753_vm7, %v1059_v12, -1e+30  ;;  %v4265_v12 = vpack.c.bf16 %v1597_v11, %v1596_v10 }
 0x7af   :  { %v1065_v15 = vsel %vm244_vm6, %v1061_v14, -inf }
 0x7b0   :  { %1066 = vmax.xlane.f32.xlu1 %v1065_v15 }
 0x7c1   :  { %1312 = vrot.lane.b32.xlu1 %v4733_v49, %s4552_s4 }
 0x7c5   :  { %1232 = vrot.lane.b32.xlu1 %v4735_v51, %s4553_s1 }
 0x7c9   :  { %1310 = vrot.lane.b32.xlu1 %v4733_v49, %s4553_s1 }
 0x839   :  { %v1064_v16 = vpop.xlane.xlu0 %1063 }
 0x83a   :  { %v1068_v17 = vsub.f32 %v1060_v9, %v1064_v16 }
 0x83c   :  { %v1070_v18 = vmul.f32 1.442695, %v1068_v17 }
 0x83d   :  { %v1067_v19 = vpop.xlane.xlu1 %1066 }
 0x83e   :  { %4449 = vpow2.f32 %v1070_v18  ;;  %v1069_v20 = vsub.f32 %v1061_v14, %v1067_v19 }
 0x840   :  { %v1072_v21 = vmul.f32 1.442695, %v1069_v20 }
 0x841   :  { %v1313_v29 = vpop.permute.xlu1 %1312 }
 0x842   :  { %4451 = vpow2.f32 %v1072_v21 }
 0x845   :  { %v1233_v34 = vpop.permute.xlu1 %1232 }
 0x848   :  { %v4450_v22 = vpop.eup %4449 }
 0x849   :  { %v1074_v23 = vsel %vm244_vm6, %v4450_v22, 0.0 }
 0x84a   :  { %1075 = vadd.xlane.f32.xlu0 %v1074_v23 }
 0x84c   :  { %v4452_v24 = vpop.eup %4451 }
 0x84d   :  { %v1077_v25 = vsel %vm244_vm6, %v4452_v24, 0.0 }
 0x84e   :  { %1078 = vadd.xlane.f32.xlu0 %v1077_v25 }
 0x864   :  { %1234 = vrot.lane.b32.xlu0 %v4735_v51, %s4552_s4  ;;  %v1311_v51 = vpop.permute.xlu1 %1310  ;;  %s5306_s4 = smov 24  }
 0x8d7   :  { %v1076_v27 = vpop.xlane.xlu0 %1075 }
 0x8d8   :  { %4453 = vrcp.f32 %v1076_v27 }
 0x8db   :  { %v1079_v49 = vpop.xlane.xlu0 %1078 }
 0x8dc   :  { %4455 = vrcp.f32 %v1079_v49 }
 0x8df   :  { %v1235_v32 = vpop.permute.xlu0 %1234 }
 0x8e2   :  { %v4454_v30 = vpop.eup %4453 }
 0x8e3   :  { %v1082_v31 = vmul.f32 %v4454_v30, %v4450_v22 }
 0x8e5   :  { %4034 = vmatmul.mubr.msk.f32.vlgmr.msra.gmra.mrb[8].mxu0 %vm244_vm6, %v1082_v31 }
 0x8e6   :  { %v4456_v33 = vpop.eup %4455  ;;  %4042 = vmatpush3.xpose.msk.msra.mxu0 %vm244_vm6, %v1235_v32  ;;  %4043 = vmatprep.mubr.msk.f32.mxu0 %vm4546_vm5, %v4545_v46 }
 0x8e7   :  { %v1083_v35 = vmul.f32 %v4456_v33, %v4452_v24  ;;  %4051 = vmatprep.subr.mxu0 %v4545_v46 }
 0x8e9   :  { %4039 = vmatmul.mubr.msk.f32.vlgmr.msra.gmra.mrb[14].mxu1 %vm244_vm6, %v1083_v35  ;;  %4044 = vmatmul.mubr.msk.f32.vlgmr.msra.gmra.mrb[10].mxu0 %vm244_vm6, %v1233_v34 }
 0x8ea   :  { %4047 = vmatpush3.xpose.msk.msra.mxu1 %vm244_vm6, %v1313_v29  ;;  %4052 = vmatpush3.msra.mxu0 %v1235_v32 }
 0x8eb   :  { %4048 = vmatprep.mubr.msk.f32.mxu1 %vm4546_vm5, %v4545_v46  ;;  %4056 = vmatprep.subr.mxu1 %v4545_v46 }
 0x8ec   :  { %4053 = vmatprep.mubr.msk.f32.mxu0 %vm4546_vm5, %v4545_v46 }
 0x8ed   :  { %4049 = vmatmul.mubr.msk.f32.vlgmr.msra.gmra.mrb[16].mxu1 %vm244_vm6, %v1311_v51 }
 0x8ee   :  { %4057 = vmatpush3.msra.mxu1 %v1313_v29  ;;  %4058 = vmatprep.mubr.msk.f32.mxu1 %vm4546_vm5, %v4545_v46 }
 0x9b8   :  { %v1154_v36 = vpop.f32.mrb[8].mxu0 }
 0x9b9   :  { %v4035_v37 = vpop.f32.mrb[9].mxu0 }
 0x9bc   :  { %v1228_v38 = vpop.f32.mrb[14].mxu1  ;;  %v1306_v39 = vpop.f32.mrb[10].mxu0 }
 0x9bd   :  { %v1388_v40 = vmul.f32 0.35355338, %v1306_v39  ;;  %v4040_v41 = vpop.f32.mrb[15].mxu1  ;;  %v4045_v42 = vpop.f32.mrb[11].mxu0 }
 0x9bf   :  { %v1390_v43 = vsel %vm4753_vm7, %v1388_v40, -1e+30 }
 0x9c0   :  { %v1384_v44 = vpop.f32.mrb[16].mxu1  ;;  %v1392_v45 = vsel %vm244_vm6, %v1390_v43, -inf }
 0x9c1   :  { %v1389_v47 = vmul.f32 0.35355338, %v1384_v44  ;;  %1393 = vmax.xlane.f32.xlu0 %v1392_v45  ;;  %v4050_v48 = vpop.f32.mrb[17].mxu1  ;;  %v1838_v44 = vld [vmem:[%s5289_s12] sm:$0xff]  ;;  %v1839_v45 = vld [vmem:[%s5289_s12 + $0x8] sm:$0xff] }
 0x9c2   :  { %v4557_v48 = vmov 0.0|0.0  }
 0x9c3   :  { %v1391_v50 = vsel %vm4753_vm7, %v1389_v47, -1e+30  ;;  %v4278_v47 = vpack.c.bf16 %v1839_v45, %v1838_v44 }
 0x9c4   :  { %v1395_v52 = vsel %vm244_vm6, %v1391_v50, -inf }
 0x9c5   :  { %1396 = vmax.xlane.f32.xlu1 %v1395_v52  ;;  %v1841_v52 = vld [vmem:[%s5289_s12 + $0x18] sm:$0xff] }
 0x9d6   :  { %1566 = vrot.lane.b32.xlu1 %v4827_v4, %s4554_s5 }
 0x9da   :  { %1572 = vrot.lane.b32.xlu1 %v1154_v36, %s5308_s26 }
 0x9de   :  { %1574 = vrot.lane.b32.xlu1 %v1228_v38, %s5308_s26 }
 0xa4e   :  { %v1394_v53 = vpop.xlane.xlu0 %1393 }
 0xa4f   :  { %v1398_v54 = vsub.f32 %v1390_v43, %v1394_v53 }
 0xa51   :  { %v1400_v55 = vmul.f32 1.442695, %v1398_v54  ;;  %v80_v54 = vld [vmem:[%s5328_s29] sm:$0xff] }
 0xa52   :  { %v1397_v56 = vpop.xlane.xlu1 %1396 }
 0xa53   :  { %4457 = vpow2.f32 %v1400_v55  ;;  %v1399_v57 = vsub.f32 %v1391_v50, %v1397_v56  ;;  %v1840_v50 = vld [vmem:[%s5289_s12 + $0x10] sm:$0xff]  ;;  %v1746_v55 = vld [vmem:[%s5287_s10] sm:$0xff]  ;;  %v1747_v56 = vld [vmem:[%s5287_s10 + $0x8] sm:$0xff] }
 0xa54   :  { %v4281_v53 = vpack.c.bf16 %v1841_v52, %v1840_v50 }
 0xa55   :  { %v1402_v58 = vmul.f32 1.442695, %v1399_v57  ;;  %v1748_v57 = vld [vmem:[%s5287_s10 + $0x10] sm:$0xff] }
 0xa56   :  { %v1567_v17 = vpop.permute.xlu1 %1566 }
 0xa57   :  { %4459 = vpow2.f32 %v1402_v58  ;;  %v1587_v25 = vsel %vm244_vm6, %v4791_v28, %v1567_v17  ;;  %v4269_v58 = vpack.c.bf16 %v1747_v56, %v1746_v55 }
 0xa59   :  { %4270 = vmatprep.subr.bf16.mxu1 %v4269_v58 }
 0xa5a   :  { %v1573_v18 = vpop.permute.xlu1 %1572 }
 0xa5d   :  { %v4458_v59 = vpop.eup %4457 }
 0xa5e   :  { %v1404_v60 = vsel %vm244_vm6, %v4458_v59, 0.0  ;;  %v1575_v21 = vpop.permute.xlu1 %1574 }
 0xa5f   :  { %1405 = vadd.xlane.f32.xlu0 %v1404_v60  ;;  %v1590_v27 = vsel %vm1588_vm9, %v1587_v25, %v1575_v21 }
 0xa61   :  { %v4460_v61 = vpop.eup %4459 }
 0xa62   :  { %v1407_v62 = vsel %vm244_vm6, %v4460_v61, 0.0 }
 0xa63   :  { %1408 = vadd.xlane.f32.xlu0 %v1407_v62  ;;  %v82_v62 = vld [vmem:[%s5328_s29 + $0x10] sm:$0xff] }
 0xa79   :  { %1564 = vrot.lane.b32.xlu0 %v4825_v2, %s4554_s5  ;;  %v1595_v2 = vld [vmem:[%s5326_s6 + $0x8] sm:$0xff]  ;;  %s5327_s6 = sld [smem:[#allocation12_spill]] }
 0xa7a   :  { %v4261_v9 = vpack.c.bf16 %v1595_v2, %v1594_v8 }
 0xa7c   :  { %4262 = vmatprep.subr.bf16.mxu0 %v4261_v9 }
 0xaec   :  { %v1406_v63 = vpop.xlane.xlu0 %1405 }
 0xaed   :  { %4461 = vrcp.f32 %v1406_v63 }
 0xaf0   :  { %v1409_v3 = vpop.xlane.xlu0 %1408 }
 0xaf1   :  { %4463 = vrcp.f32 %v1409_v3 }
 0xaf4   :  { %v1565_v19 = vpop.permute.xlu0 %1564 }
 0xaf5   :  { %v1586_v20 = vsel %vm244_vm6, %v4789_v26, %v1565_v19  ;;  %v3778_v26 = vld [vmem:[%s5327_s6] ss:$0 sm:$0xff] }
 0xaf6   :  { %v1589_v23 = vsel %vm1588_vm9, %v1586_v20, %v1573_v18  ;;  %v3782_v20 = vld [vmem:[%s5286_s9] ss:$0 sm:$0xff] }
 0xaf7   :  { %v4462_v4 = vpop.eup %4461 }
 0xaf8   :  { %v1412_v5 = vmul.f32 %v4462_v4, %v4458_v59  ;;  %v1749_v59 = vld [vmem:[%s5287_s10 + $0x18] sm:$0xff]  ;;  %s5335_s10 = smov 24  }
 0xaf9   :  { %v4273_v60 = vpack.c.bf16 %v1749_v59, %v1748_v57 }
 0xafa   :  { %4054 = vmatmul.mubr.msk.f32.vlgmr.msra.gmra.mrb[12].mxu0 %vm244_vm6, %v1412_v5 }
 0xafb   :  { %v4464_v6 = vpop.eup %4463  ;;  %4264 = vmatpush3.bf16.msra.mxu0 %v4261_v9 }
 0xafc   :  { %v1413_v7 = vmul.f32 %v4464_v6, %v4460_v61  ;;  %4266 = vmatprep.subr.bf16.mxu0 %v4265_v12  ;;  %v81_v61 = vld [vmem:[%s5328_s29 + $0x8] sm:$0xff]  ;;  %s5329_s29 = sld [smem:[#allocation13_spill]] }
 0xafe   :  { %4059 = vmatmul.mubr.msk.f32.vlgmr.msra.gmra.mrb[18].mxu1 %vm244_vm6, %v1413_v7 }
 0xaff   :  { %4268 = vmatpush3.bf16.msra.mxu0 %v4265_v12  ;;  %4272 = vmatpush3.bf16.msra.mxu1 %v4269_v58 }
 0xb00   :  { %4277 = vmatprep.subr.bf16.mxu0 %v4557_v48  ;;  %4274 = vmatprep.subr.bf16.mxu1 %v4273_v60 }
 0xb02   :  { %v3781_v18 = vld [vmem:[%s5329_s29] ss:$0 sm:$0xff] }
 0xb03   :  { %4276 = vmatpush3.bf16.msra.mxu1 %v4273_v60 }
 0xb04   :  { %4283 = vmatprep.subr.bf16.mxu1 %v4557_v48 }
 0xbcd   :  { %v1484_v13 = vpop.f32.mrb[12].mxu0 }
 0xbce   :  { %v4055_v14 = vpop.f32.mrb[13].mxu0  ;;  %1580 = vrot.lane.b32.xlu0 %v1484_v13, %s5306_s4 }
 0xbd1   :  { %v1558_v15 = vpop.f32.mrb[18].mxu1 }
 0xbd2   :  { %1582 = vrot.lane.b32.xlu1 %v1558_v15, %s5306_s4  ;;  %v4060_v16 = vpop.f32.mrb[19].mxu1 }
 0xc40   :  { %v1581_v22 = vpop.permute.xlu0 %1580 }
 0xc41   :  { %v1592_v24 = vsel %vm1591_vm8, %v1589_v23, %v1581_v22 }
 0xc42   :  { %4069 = vmatprep.mubr.msk.f32.mxu0 %vm85_vm0, %v1592_v24 }
 0xc44   :  { %v1583_v49 = vpop.permute.xlu1 %1582 }
 0xc45   :  { %v1593_v29 = vsel %vm1591_vm8, %v1590_v27, %v1583_v49  ;;  %v3786_v49 = vld [vmem:[%s5290_s13] ss:$0 sm:$0xff] }
 0xc46   :  { %4070 = vmatmul.mubr.msk.f32.vlgmr.msra.gmra.mrb[14].mxu0 %vm85_vm0, %v1593_v29 }
 0xc47   :  { %4091 = vmatprep.mubr.msk.f32.mxu0 %vm4546_vm5, %v4545_v46  ;;  %4279 = vmatpush3.bf16.msra.mxu0 %v4278_v47  ;;  %v3783_v47 = vld [vmem:[%s5288_s11] ss:$0 sm:$0xff]  ;;  %s5334_s11 = smov 16  }
 0xc48   :  { %4280 = vmatprep.subr.bf16.mxu0 %v4557_v48 }
 0xc4b   :  { %4282 = vmatpush3.bf16.msra.mxu0 %v4281_v53 }
 0xc4c   :  { %4291 = vmatprep.subr.bf16.mxu0 %v4557_v48 }
 0xc4e   :  { %4092 = vmatmul.mubr.msk.f32.vlgmr.msra.gmra.mrb[16].mxu0 %vm85_vm0, %v80_v54 }
 0xc4f   :  { %4094 = vmatprep.mubr.msk.f32.mxu0 %vm4546_vm5, %v4545_v46 }
 0xc52   :  { %4095 = vmatmul.mubr.msk.f32.gmra.mrb[18].mxu0 %vm85_vm0, %v81_v61 }
 0xc53   :  { %4097 = vmatprep.mubr.msk.f32.mxu0 %vm4546_vm5, %v4545_v46 }
 0xc56   :  { %4098 = vmatmul.mubr.msk.f32.gmra.mrb[20].mxu0 %vm85_vm0, %v82_v62 }
 0xc57   :  { %4118 = vmatprep.mubr.msk.f32.mxu0 %vm4546_vm5, %v4545_v46 }
 0xd19   :  { %v4071_v30 = vpop.f32.mrb[14].mxu0 }
 0xd1a   :  { %v1683_v31 = vadd.f32 %v4071_v30, %v3778_v26  ;;  %v1677_v32 = vpop.f32.mrb[15].mxu0 }
 0xd1b   :  { %v1678_v33 = vadd.f32 %v3778_v26, %v1677_v32 }
 0xd1c   :  { %v4905_v28 = vadd.f32 %v1683_v31, %v4694_v1 }
 0xd1d   :  { %v4908_v34 = vadd.f32 %v1678_v33, %v4689_v0 }
 0xd1e   :  { %v1693_v35 = vsel %vm85_vm0, %v4905_v28, 0.0 }
 0xd1f   :  { %1694 = vadd.xlane.f32.xlu1 %v1693_v35  ;;  %v1690_v51 = vsel %vm85_vm0, %v4908_v34, 0.0 }
 0xd20   :  { %1691 = vadd.xlane.f32.xlu0 %v1690_v51 }
 0xd21   :  { %v1924_v29 = vpop.f32.mrb[16].mxu0 }
 0xd22   :  { %v1925_v26 = vadd.f32 %v3786_v49, %v1924_v29  ;;  %v4093_v30 = vpop.f32.mrb[17].mxu0 }
 0xd24   :  { %v1941_v31 = vcombine.high %v1925_v26, %v1925_v26 }
 0xd25   :  { %v1929_v32 = vpop.f32.mrb[18].mxu0 }
 0xd26   :  { %v1944_v33 = vcombine.low %v1925_v26, %v1941_v31  ;;  %v1930_v35 = vadd.f32 %v3786_v49, %v1929_v32  ;;  %v4096_v51 = vpop.f32.mrb[19].mxu0 }
 0xdac   :  { %v1695_v36 = vpop.xlane.xlu1 %1694 }
 0xdad   :  { %v1697_v37 = vmul.f32 0.03125, %v1695_v36  ;;  %v1692_v38 = vpop.xlane.xlu0 %1691 }
 0xdae   :  { %v1696_v39 = vmul.f32 0.03125, %v1692_v38  ;;  %v1942_v38 = vcombine.high %v1930_v35, %v1930_v35 }
 0xdaf   :  { %v4915_v40 = vsub.f32 %v4905_v28, %v1697_v37 }
 0xdb0   :  { %v4918_v1 = vsub.f32 %v4908_v34, %v1696_v39  ;;  %v4284_v39 = vpack.c.bf16 %v1930_v35, %v1944_v33 }
 0xdb1   :  { %v1701_v42 = vmul.f32 %v4915_v40, %v4915_v40 }
 0xdb2   :  { %v1700_v0 = vmul.f32 %v4918_v1, %v4918_v1  ;;  %4294 = vmatpush3.bf16.msk.msra.mxu0 %vm4993_vm2, %v4284_v39 }
 0xdb3   :  { %v1705_v43 = vsel %vm85_vm0, %v1701_v42, 0.0  ;;  %4299 = vmatprep.subr.bf16.mxu0 %v4557_v48 }
 0xdb4   :  { %v1702_v41 = vsel %vm85_vm0, %v1700_v0, 0.0 }
 0xdb5   :  { %1703 = vadd.xlane.f32.xlu0 %v1702_v41 }
 0xdb9   :  { %1706 = vadd.xlane.f32.xlu0 %v1705_v43 }
 0xe42   :  { %v1704_v63 = vpop.xlane.xlu0 %1703 }
 0xe43   :  { %v1708_v3 = vmul.f32 0.032258064, %v1704_v63 }
 0xe45   :  { %4465 = vrsqrt.f32 %v1708_v3  ;;  %vm1712_vm10 = vcmp.eq.f32.partialorder %v1708_v3, inf  ;;  %v1715_v8 = vand.u32 2147483648, %v1708_v3  ;;  %vm1714_vm11 = vcmp.eq.f32.partialorder %v1708_v3, 0.0 }
 0xe46   :  { %v1707_v4 = vpop.xlane.xlu0 %1706 }
 0xe47   :  { %v1709_v5 = vmul.f32 0.032258064, %v1707_v4 }
 0xe49   :  { %4467 = vrsqrt.f32 %v1709_v5  ;;  %vm1719_vm12 = vcmp.eq.f32.partialorder %v1709_v5, inf  ;;  %v1722_v13 = vand.u32 2147483648, %v1709_v5  ;;  %vm1721_vm13 = vcmp.eq.f32.partialorder %v1709_v5, 0.0 }
 0xe4f   :  { %v4466_v6 = vpop.eup %4465 }
 0xe50   :  { %v1711_v7 = vmul.f32 %v4466_v6, %v1708_v3 }
 0xe52   :  { %v1713_v2 = vsel %vm1712_vm10, %v1708_v3, %v1711_v7 }
 0xe53   :  { %v4468_v9 = vpop.eup %4467  ;;  %v1716_v10 = vsel %vm1714_vm11, %v1715_v8, %v1713_v2 }
 0xe54   :  { %v1724_v11 = vadd.f32 1e-06, %v1716_v10  ;;  %v1718_v12 = vmul.f32 %v4468_v9, %v1709_v5 }
 0xe56   :  { %4469 = vrcp.f32 %v1724_v11  ;;  %v1720_v14 = vsel %vm1719_vm12, %v1709_v5, %v1718_v12 }
 0xe57   :  { %v1723_v15 = vsel %vm1721_vm13, %v1722_v13, %v1720_v14 }
 0xe58   :  { %v1725_v16 = vadd.f32 1e-06, %v1723_v15 }
 0xe5a   :  { %4471 = vrcp.f32 %v1725_v16 }
 0xe60   :  { %v4470_v17 = vpop.eup %4469 }
 0xe61   :  { %v1727_v19 = vmul.f32 %v4470_v17, %v4918_v1  ;;  %v1934_v1 = vpop.f32.mrb[20].mxu0 }
 0xe62   :  { %v1935_v0 = vadd.f32 %v3786_v49, %v1934_v1  ;;  %v4099_v41 = vpop.f32.mrb[21].mxu0 }
 0xe63   :  { %v1736_v21 = vmul.f32 %v3781_v18, %v1727_v19 }
 0xe64   :  { %v4472_v22 = vpop.eup %4471  ;;  %v1943_v42 = vcombine.high %v1935_v0, %v1935_v0  ;;  %v2022_v43 = vcombine.low %v1942_v38, %v1935_v0 }
 0xe65   :  { %v1729_v23 = vmul.f32 %v4472_v22, %v4915_v40  ;;  %v1744_v24 = vadd.f32 %v3782_v20, %v1736_v21  ;;  %v4997_v40 = vpack.i.bf16 %v1930_v35, %v1944_v33 }
 0xe66   :  { %v4288_v44 = vpack.c.bf16 %v1943_v42, %v2022_v43  ;;  %v5005_v45 = vpack.i.bf16 %v1943_v42, %v2022_v43 }
 0xe67   :  { %v1737_v25 = vmul.f32 %v3781_v18, %v1729_v23  ;;  %4080 = vmatprep.mubr.msk.f32.mxu1 %vm85_vm0, %v1744_v24 }
 0xe69   :  { %v1745_v27 = vadd.f32 %v3782_v20, %v1737_v25 }
 0xe6b   :  { %4081 = vmatmul.mubr.msk.f32.vlgmr.msra.gmra.mrb[20].mxu1 %vm85_vm0, %v1745_v27 }
 0xe6c   :  { %4104 = vmatprep.mubr.msk.f32.mxu1 %vm4546_vm5, %v4545_v46  ;;  %4286 = vmatpush3.bf16.xpose.msk.msra.mxu1 %vm4989_vm15, %v4284_v39 }
 0xe6d   :  { %4287 = vmatprep.subr.bf16.mxu1 %v4557_v48 }
 0xf3e   :  { %v4082_v50 = vpop.f32.mrb[20].mxu1 }
 0xf3f   :  { %v1829_v52 = vpop.f32.mrb[21].mxu1  ;;  %v5019_v54 = vadd.f32 %v4082_v50, %v3783_v47 }
 0xf40   :  { %v5010_v53 = vadd.f32 %v3783_v47, %v1829_v52 }
 0xf42   :  { %4105 = vmatmul.mubr.msk.f32.vlgmr.msra.gmra.mrb[22].mxu1 %vm244_vm6, %v5010_v53 }
 0xf43   :  { %4290 = vmatpush3.bf16.xpose.msk.msra.mxu1 %vm4989_vm15, %v4288_v44  ;;  %4111 = vmatprep.mubr.msk.f32.mxu1 %vm4546_vm5, %v4545_v46 }
 0xf44   :  { %4295 = vmatprep.subr.bf16.mxu1 %v4557_v48 }
 0xf4a   :  { %4112 = vmatmul.mubr.msk.f32.vlgmr.msra.gmra.mrb[24].mxu1 %vm244_vm6, %v5019_v54 }
 0xf4b   :  { %4298 = vmatpush3.bf16.msk.msra.mxu1 %vm4993_vm2, %v4288_v44  ;;  %4125 = vmatprep.mubr.msk.f32.mxu1 %vm4546_vm5, %v4545_v46 }
 0xf4c   :  { %4303 = vmatprep.subr.bf16.mxu1 %v4557_v48 }
0x1015   :  { %v2018_v55 = vpop.f32.mrb[22].mxu1 }
0x1016   :  { %v2100_v56 = vmul.f32 0.35355338, %v2018_v55  ;;  %v4106_v57 = vpop.f32.mrb[23].mxu1 }
0x1018   :  { %v2103_v58 = vsel %vm2102_vm3, %v2100_v56, -inf }
0x1019   :  { %2104 = vmax.xlane.f32.xlu0 %v2103_v58 }
0x101d   :  { %v2096_v59 = vpop.f32.mrb[24].mxu1 }
0x101e   :  { %v2101_v60 = vmul.f32 0.35355338, %v2096_v59  ;;  %v4113_v61 = vpop.f32.mrb[25].mxu1 }
0x1020   :  { %v2106_v62 = vsel %vm2102_vm3, %v2101_v60, -inf }
0x1021   :  { %2107 = vmax.xlane.f32.xlu1 %v2106_v62 }
0x1032   :  { %4401 = vrot.lane.b32.xlu1 %v5005_v45, %s4549_s3 }
0x1036   :  { %2278 = vrot.lane.b32.xlu1 %v5010_v53, %s4549_s3 }
0x10a6   :  { %v2105_v63 = vpop.xlane.xlu0 %2104 }
0x10a7   :  { %v2109_v3 = vsub.f32 %v2100_v56, %v2105_v63 }
0x10a9   :  { %v2111_v4 = vmul.f32 1.442695, %v2109_v3 }
0x10ab   :  { %4473 = vpow2.f32 %v2111_v4 }
0x10ae   :  { %v2108_v5 = vpop.xlane.xlu1 %2107 }
0x10af   :  { %v2110_v6 = vsub.f32 %v2101_v60, %v2108_v5 }
0x10b1   :  { %v2113_v7 = vmul.f32 1.442695, %v2110_v6 }
0x10b2   :  { %v4402_v11 = vpop.permute.xlu1 %4401 }
0x10b3   :  { %4475 = vpow2.f32 %v2113_v7  ;;  %v4404_v21 = vunpack.i.h.bf16 %v4402_v11  ;;  %v4403_v22 = vunpack.i.l.bf16 %v4402_v11 }
0x10b5   :  { %v4474_v8 = vpop.eup %4473  ;;  %v4304_v25 = vpack.c.bf16 %v4404_v21, %v4403_v22 }
0x10b6   :  { %v2115_v2 = vsel %vm2102_vm3, %v4474_v8, 0.0  ;;  %v2279_v13 = vpop.permute.xlu1 %2278 }
0x10b7   :  { %2116 = vadd.xlane.f32.xlu0 %v2115_v2 }
0x10bd   :  { %v4476_v9 = vpop.eup %4475 }
0x10be   :  { %v2118_v10 = vsel %vm2102_vm3, %v4476_v9, 0.0 }
0x10bf   :  { %2119 = vadd.xlane.f32.xlu1 %v2118_v10 }
0x10cd   :  { %4396 = vrot.lane.b32.xlu0 %v4997_v40, %s4549_s3 }
0x10d0   :  { %2360 = vrot.lane.b32.xlu1 %v5019_v54, %s4549_s3 }
0x1144   :  { %v2117_v12 = vpop.xlane.xlu0 %2116 }
0x1145   :  { %4477 = vrcp.f32 %v2117_v12 }
0x1148   :  { %v4397_v14 = vpop.permute.xlu0 %4396 }
0x1149   :  { %v4399_v16 = vunpack.i.h.bf16 %v4397_v14  ;;  %v4398_v17 = vunpack.i.l.bf16 %v4397_v14 }
0x114b   :  { %v4300_v20 = vpack.c.bf16 %v4399_v16, %v4398_v17 }
0x114c   :  { %v2120_v15 = vpop.xlane.xlu1 %2119 }
0x114d   :  { %4479 = vrcp.f32 %v2120_v15 }
0x114f   :  { %v4478_v18 = vpop.eup %4477 }
0x1150   :  { %v2123_v19 = vmul.f32 %v4478_v18, %v4474_v8  ;;  %v2361_v27 = vpop.permute.xlu1 %2360 }
0x1152   :  { %4119 = vmatmul.mubr.msk.f32.vlgmr.msra.gmra.mrb[22].mxu0 %vm2102_vm3, %v2123_v19 }
0x1153   :  { %4302 = vmatpush3.bf16.xpose.msk.msra.mxu0 %vm4989_vm15, %v4300_v20  ;;  %4132 = vmatprep.mubr.msk.f32.mxu0 %vm4546_vm5, %v4545_v46 }
0x1154   :  { %4307 = vmatprep.subr.bf16.mxu0 %v4557_v48 }
0x1157   :  { %v4480_v23 = vpop.eup %4479 }
0x1158   :  { %v2124_v24 = vmul.f32 %v4480_v23, %v4476_v9 }
0x115a   :  { %4126 = vmatmul.mubr.msk.f32.vlgmr.msra.gmra.mrb[26].mxu1 %vm2102_vm3, %v2124_v24  ;;  %4133 = vmatmul.mubr.msk.f32.vlgmr.msra.gmra.mrb[24].mxu0 %vm244_vm6, %v2279_v13 }
0x115b   :  { %4306 = vmatpush3.bf16.xpose.msk.msra.mxu1 %vm4989_vm15, %v4304_v25  ;;  %4310 = vmatpush3.bf16.msk.msra.mxu0 %vm4993_vm2, %v4300_v20 }
0x115c   :  { %4139 = vmatprep.mubr.msk.f32.mxu1 %vm4546_vm5, %v4545_v46  ;;  %4311 = vmatprep.subr.bf16.mxu1 %v4557_v48 }
0x115d   :  { %4146 = vmatprep.mubr.msk.f32.mxu0 %vm4546_vm5, %v4545_v46  ;;  %4315 = vmatprep.subr.bf16.mxu0 %v4557_v48 }
0x1162   :  { %4140 = vmatmul.mubr.msk.f32.vlgmr.msra.gmra.mrb[28].mxu1 %vm244_vm6, %v2361_v27 }
0x1163   :  { %4314 = vmatpush3.bf16.msk.msra.mxu1 %vm4993_vm2, %v4304_v25  ;;  %4153 = vmatprep.mubr.msk.f32.mxu1 %vm4546_vm5, %v4545_v46 }
0x1164   :  { %4319 = vmatprep.subr.bf16.mxu1 %v4557_v48 }
0x1225   :  { %v5064_v49 = vpop.f32.mrb[22].mxu0 }
0x1226   :  { %v4120_v29 = vpop.f32.mrb[23].mxu0 }
0x122d   :  { %v5066_v26 = vpop.f32.mrb[26].mxu1  ;;  %v2356_v30 = vpop.f32.mrb[24].mxu0 }
0x122e   :  { %v2442_v31 = vmul.f32 0.35355338, %v2356_v30  ;;  %v4127_v32 = vpop.f32.mrb[27].mxu1  ;;  %v4134_v33 = vpop.f32.mrb[25].mxu0 }
0x1230   :  { %v2444_v35 = vsel %vm2102_vm3, %v2442_v31, -inf }
0x1231   :  { %2445 = vmax.xlane.f32.xlu0 %v2444_v35 }
0x1235   :  { %v2438_v51 = vpop.f32.mrb[28].mxu1 }
0x1236   :  { %v2443_v38 = vmul.f32 0.35355338, %v2438_v51  ;;  %v4141_v39 = vpop.f32.mrb[29].mxu1 }
0x1238   :  { %v2447_v1 = vsel %vm2102_vm3, %v2443_v38, -inf }
0x1239   :  { %2448 = vmax.xlane.f32.xlu1 %v2447_v1 }
0x124a   :  { %4411 = vrot.lane.b32.xlu1 %v5005_v45, %s4551_s8 }
0x124e   :  { %2618 = vrot.lane.b32.xlu1 %v5010_v53, %s4551_s8 }
0x1252   :  { %2700 = vrot.lane.b32.xlu1 %v5019_v54, %s4551_s8 }
0x12be   :  { %v2446_v0 = vpop.xlane.xlu0 %2445 }
0x12bf   :  { %v2450_v41 = vsub.f32 %v2442_v31, %v2446_v0 }
0x12c1   :  { %v2452_v42 = vmul.f32 1.442695, %v2450_v41 }
0x12c3   :  { %4481 = vpow2.f32 %v2452_v42 }
0x12c6   :  { %v2449_v43 = vpop.xlane.xlu1 %2448 }
0x12c7   :  { %v2451_v44 = vsub.f32 %v2443_v38, %v2449_v43 }
0x12c9   :  { %v2454_v47 = vmul.f32 1.442695, %v2451_v44 }
0x12ca   :  { %v4412_v3 = vpop.permute.xlu1 %4411 }
0x12cb   :  { %4483 = vpow2.f32 %v2454_v47  ;;  %v4414_v5 = vunpack.i.h.bf16 %v4412_v3  ;;  %v4413_v6 = vunpack.i.l.bf16 %v4412_v3 }
0x12cd   :  { %v4482_v50 = vpop.eup %4481  ;;  %v4320_v2 = vpack.c.bf16 %v4414_v5, %v4413_v6 }
0x12ce   :  { %v2456_v52 = vsel %vm2102_vm3, %v4482_v50, 0.0  ;;  %v2619_v9 = vpop.permute.xlu1 %2618 }
0x12cf   :  { %2457 = vadd.xlane.f32.xlu0 %v2456_v52 }
0x12d2   :  { %v2701_v10 = vpop.permute.xlu1 %2700 }
0x12d5   :  { %v4484_v55 = vpop.eup %4483 }
0x12d6   :  { %v2459_v56 = vsel %vm2102_vm3, %v4484_v55, 0.0 }
0x12d7   :  { %2460 = vadd.xlane.f32.xlu0 %v2459_v56 }
0x12ed   :  { %4406 = vrot.lane.b32.xlu0 %v4997_v40, %s4551_s8 }
0x135c   :  { %v2458_v57 = vpop.xlane.xlu0 %2457 }
0x135d   :  { %4485 = vrcp.f32 %v2458_v57 }
0x1364   :  { %v2461_v58 = vpop.xlane.xlu0 %2460 }
0x1365   :  { %4487 = vrcp.f32 %v2461_v58 }
0x1367   :  { %v4486_v59 = vpop.eup %4485 }
0x1368   :  { %v2464_v60 = vmul.f32 %v4486_v59, %v4482_v50  ;;  %v4407_v61 = vpop.permute.xlu0 %4406 }
0x1369   :  { %v4409_v62 = vunpack.i.h.bf16 %v4407_v61  ;;  %v4408_v63 = vunpack.i.l.bf16 %v4407_v61 }
0x136a   :  { %4147 = vmatmul.mubr.msk.f32.vlgmr.msra.gmra.mrb[26].mxu0 %vm2102_vm3, %v2464_v60 }
0x136b   :  { %v4316_v4 = vpack.c.bf16 %v4409_v62, %v4408_v63  ;;  %4160 = vmatprep.mubr.msk.f32.mxu0 %vm4546_vm5, %v4545_v46 }
0x136d   :  { %4318 = vmatpush3.bf16.xpose.msk.msra.mxu0 %vm4989_vm15, %v4316_v4 }
0x136e   :  { %4323 = vmatprep.subr.bf16.mxu0 %v4557_v48 }
0x136f   :  { %v4488_v7 = vpop.eup %4487 }
0x1370   :  { %v2465_v8 = vmul.f32 %v4488_v7, %v4484_v55 }
0x1372   :  { %4154 = vmatmul.mubr.msk.f32.vlgmr.msra.gmra.mrb[30].mxu1 %vm2102_vm3, %v2465_v8 }
0x1373   :  { %4322 = vmatpush3.bf16.xpose.msk.msra.mxu1 %vm4989_vm15, %v4320_v2  ;;  %4167 = vmatprep.mubr.msk.f32.mxu1 %vm4546_vm5, %v4545_v46 }
0x1374   :  { %4161 = vmatmul.mubr.msk.f32.vlgmr.msra.gmra.mrb[28].mxu0 %vm244_vm6, %v2619_v9  ;;  %4327 = vmatprep.subr.bf16.mxu1 %v4557_v48 }
0x1375   :  { %4326 = vmatpush3.bf16.msk.msra.mxu0 %vm4993_vm2, %v4316_v4  ;;  %4174 = vmatprep.mubr.msk.f32.mxu0 %vm4546_vm5, %v4545_v46 }
0x1376   :  { %4331 = vmatprep.subr.bf16.mxu0 %v4557_v48 }
0x137a   :  { %4168 = vmatmul.mubr.msk.f32.vlgmr.msra.gmra.mrb[32].mxu1 %vm244_vm6, %v2701_v10 }
0x137b   :  { %4330 = vmatpush3.bf16.msk.msra.mxu1 %vm4993_vm2, %v4320_v2  ;;  %4181 = vmatprep.mubr.msk.f32.mxu1 %vm4546_vm5, %v4545_v46 }
0x137c   :  { %4335 = vmatprep.subr.bf16.mxu1 %v4557_v48 }
0x143d   :  { %v5104_v11 = vpop.f32.mrb[26].mxu0 }
0x143e   :  { %v4148_v12 = vpop.f32.mrb[27].mxu0 }
0x1445   :  { %v5106_v13 = vpop.f32.mrb[30].mxu1 }
0x1446   :  { %v4155_v14 = vpop.f32.mrb[31].mxu1 }
0x1447   :  { %v2696_v15 = vpop.f32.mrb[28].mxu0 }
0x1448   :  { %v2782_v16 = vmul.f32 0.35355338, %v2696_v15  ;;  %v4162_v17 = vpop.f32.mrb[29].mxu0 }
0x144a   :  { %v2784_v18 = vsel %vm2102_vm3, %v2782_v16, -inf }
0x144b   :  { %2785 = vmax.xlane.f32.xlu0 %v2784_v18  ;;  %v3328_v18 = vld [vmem:[%s5291_s14] sm:$0xff] }
0x144d   :  { %v2778_v19 = vpop.f32.mrb[32].mxu1 }
0x144e   :  { %v2783_v20 = vmul.f32 0.35355338, %v2778_v19  ;;  %v4169_v21 = vpop.f32.mrb[33].mxu1 }
0x144f   :  { %v3331_v21 = vld [vmem:[%s5291_s14 + $0x18] sm:$0xff] }
0x1450   :  { %v2787_v22 = vsel %vm2102_vm3, %v2783_v20, -inf }
0x1451   :  { %2788 = vmax.xlane.f32.xlu1 %v2787_v22 }
0x1462   :  { %4421 = vrot.lane.b32.xlu1 %v5005_v45, %s4553_s1 }
0x1466   :  { %2958 = vrot.lane.b32.xlu1 %v5010_v53, %s4553_s1 }
0x146a   :  { %3040 = vrot.lane.b32.xlu1 %v5019_v54, %s4553_s1 }
0x14d8   :  { %v2786_v23 = vpop.xlane.xlu0 %2785 }
0x14d9   :  { %v2790_v24 = vsub.f32 %v2782_v16, %v2786_v23 }
0x14db   :  { %v2792_v25 = vmul.f32 1.442695, %v2790_v24 }
0x14dd   :  { %4489 = vpow2.f32 %v2792_v25 }
0x14de   :  { %v2789_v27 = vpop.xlane.xlu1 %2788 }
0x14df   :  { %v2791_v29 = vsub.f32 %v2783_v20, %v2789_v27  ;;  %v3330_v20 = vld [vmem:[%s5291_s14 + $0x10] sm:$0xff] }
0x14e0   :  { %v4351_v22 = vpack.c.bf16 %v3331_v21, %v3330_v20 }
0x14e1   :  { %v2794_v30 = vmul.f32 1.442695, %v2791_v29 }
0x14e2   :  { %v4422_v1 = vpop.permute.xlu1 %4421 }
0x14e3   :  { %4491 = vpow2.f32 %v2794_v30  ;;  %v4424_v42 = vunpack.i.h.bf16 %v4422_v1  ;;  %v4423_v43 = vunpack.i.l.bf16 %v4422_v1 }
0x14e5   :  { %v4336_v47 = vpack.c.bf16 %v4424_v42, %v4423_v43 }
0x14e6   :  { %v2959_v50 = vpop.permute.xlu1 %2958 }
0x14e7   :  { %v4490_v31 = vpop.eup %4489 }
0x14e8   :  { %v2796_v32 = vsel %vm2102_vm3, %v4490_v31, 0.0 }
0x14e9   :  { %2797 = vadd.xlane.f32.xlu0 %v2796_v32 }
0x14ea   :  { %v3041_v52 = vpop.permute.xlu1 %3040 }
0x14ed   :  { %v4492_v33 = vpop.eup %4491 }
0x14ee   :  { %v2799_v45 = vsel %vm2102_vm3, %v4492_v33, 0.0 }
0x14ef   :  { %2800 = vadd.xlane.f32.xlu0 %v2799_v45 }
0x1505   :  { %4416 = vrot.lane.b32.xlu0 %v4997_v40, %s4553_s1 }
0x1576   :  { %v2798_v53 = vpop.xlane.xlu0 %2797 }
0x1577   :  { %4493 = vrcp.f32 %v2798_v53 }
0x157c   :  { %v2801_v54 = vpop.xlane.xlu0 %2800 }
0x157d   :  { %4495 = vrcp.f32 %v2801_v54 }
0x1580   :  { %v4417_v35 = vpop.permute.xlu0 %4416 }
0x1581   :  { %v4494_v51 = vpop.eup %4493  ;;  %v4419_v38 = vunpack.i.h.bf16 %v4417_v35  ;;  %v4418_v39 = vunpack.i.l.bf16 %v4417_v35 }
0x1582   :  { %v2804_v0 = vmul.f32 %v4494_v51, %v4490_v31 }
0x1583   :  { %v4332_v41 = vpack.c.bf16 %v4419_v38, %v4418_v39 }
0x1584   :  { %4175 = vmatmul.mubr.msk.f32.vlgmr.msra.gmra.mrb[30].mxu0 %vm2102_vm3, %v2804_v0 }
0x1585   :  { %4334 = vmatpush3.bf16.xpose.msk.msra.mxu0 %vm4989_vm15, %v4332_v41  ;;  %4188 = vmatprep.mubr.msk.f32.mxu0 %vm4546_vm5, %v4545_v46 }
0x1586   :  { %4339 = vmatprep.subr.bf16.mxu0 %v4557_v48 }
0x1587   :  { %v4496_v40 = vpop.eup %4495 }
0x1588   :  { %v2805_v44 = vmul.f32 %v4496_v40, %v4492_v33 }
0x158a   :  { %4182 = vmatmul.mubr.msk.f32.vlgmr.msra.gmra.mrb[34].mxu1 %vm2102_vm3, %v2805_v44 }
0x158b   :  { %4338 = vmatpush3.bf16.xpose.msk.msra.mxu1 %vm4989_vm15, %v4336_v47  ;;  %4195 = vmatprep.mubr.msk.f32.mxu1 %vm4546_vm5, %v4545_v46 }
0x158c   :  { %4189 = vmatmul.mubr.msk.f32.vlgmr.msra.gmra.mrb[32].mxu0 %vm244_vm6, %v2959_v50  ;;  %4343 = vmatprep.subr.bf16.mxu1 %v4557_v48 }
0x158d   :  { %4342 = vmatpush3.bf16.msk.msra.mxu0 %vm4993_vm2, %v4332_v41  ;;  %4202 = vmatprep.mubr.msk.f32.mxu0 %vm4546_vm5, %v4545_v46 }
0x1592   :  { %4196 = vmatmul.mubr.msk.f32.vlgmr.msra.gmra.mrb[36].mxu1 %vm244_vm6, %v3041_v52 }
0x1593   :  { %4346 = vmatpush3.bf16.msk.msra.mxu1 %vm4993_vm2, %v4336_v47  ;;  %4209 = vmatprep.mubr.msk.f32.mxu1 %vm4546_vm5, %v4545_v46 }
0x1657   :  { %v2878_v36 = vpop.f32.mrb[30].mxu0 }
0x1658   :  { %v4176_v55 = vpop.f32.mrb[31].mxu0 }
0x165d   :  { %v2954_v56 = vpop.f32.mrb[34].mxu1 }
0x165e   :  { %v4183_v57 = vpop.f32.mrb[35].mxu1 }
0x165f   :  { %v3036_v48 = vpop.f32.mrb[32].mxu0 }
0x1660   :  { %v3122_v58 = vmul.f32 0.35355338, %v3036_v48  ;;  %v4190_v59 = vpop.f32.mrb[33].mxu0 }
0x1661   :  { %v3481_v59 = vld [vmem:[%s5295_s18 + $0x8] sm:$0xff] }
0x1662   :  { %v3124_v60 = vsel %vm2102_vm3, %v3122_v58, -inf }
0x1663   :  { %3125 = vmax.xlane.f32.xlu0 %v3124_v60  ;;  %v3482_v60 = vld [vmem:[%s5295_s18 + $0x10] sm:$0xff] }
0x1665   :  { %v3118_v61 = vpop.f32.mrb[36].mxu1 }
0x1666   :  { %v3123_v62 = vmul.f32 0.35355338, %v3118_v61  ;;  %v4197_v63 = vpop.f32.mrb[37].mxu1 }
0x1668   :  { %v3127_v3 = vsel %vm2102_vm3, %v3123_v62, -inf }
0x1669   :  { %3128 = vmax.xlane.f32.xlu1 %v3127_v3  ;;  %v3574_v3 = vld [vmem:[%s5297_s20] sm:$0xff] }
0x167a   :  { %3302 = vrot.lane.b32.xlu1 %v5106_v13, %s4554_s5 }
0x167e   :  { %3308 = vrot.lane.b32.xlu1 %v2878_v36, %s5334_s11 }
0x1682   :  { %3310 = vrot.lane.b32.xlu1 %v2954_v56, %s5334_s11  ;;  %s4559_s11 = smov [#allocation2]  }
0x1683   :  { %s3738_s3 = sshll.u32 %s4559_s11, 4  ;;  %s3739_s3 = int_to_ptr.vmem [resolvable:$true] %s3738_s3 }
0x1684   :  { %s4521_s8 = scalar_lea.vmem %s3739_s3, 256  ;;  %p4526_p1 = scmp.lt.s32.totalorder %s3739_s3, %s3739_s3 }
0x1685   :  { %p4522_p0 = scmp.ne.s32.totalorder %s3739_s3, %s4521_s8  ;;  %p4527_p2 = scmp.lt.s32.totalorder %s4521_s8, %s4521_s8 }
0x1687   :  { %p4528_p3 = por %p4527_p2, %p4526_p1 }
0x1689   :  { %p4529_p4 = pnand %p4528_p3, %p4522_p0 }
0x16f0   :  { %v3126_v46 = vpop.xlane.xlu0 %3125 }
0x16f1   :  { %v3130_v37 = vsub.f32 %v3122_v58, %v3126_v46  ;;  %v3480_v58 = vld [vmem:[%s5295_s18] sm:$0xff]  ;;  %v3575_v46 = vld [vmem:[%s5297_s20 + $0x8] sm:$0xff] }
0x16f2   :  { %v4355_v61 = vpack.c.bf16 %v3481_v59, %v3480_v58 }
0x16f3   :  { %v3132_v4 = vmul.f32 1.442695, %v3130_v37  ;;  %v3576_v37 = vld [vmem:[%s5297_s20 + $0x10] sm:$0xff] }
0x16f4   :  { %4356 = vmatprep.subr.bf16.mxu1 %v4355_v61 }
0x16f5   :  { %4497 = vpow2.f32 %v3132_v4  ;;  %v4363_v4 = vpack.c.bf16 %v3575_v46, %v3574_v3 }
0x16f6   :  { %v3129_v5 = vpop.xlane.xlu1 %3128 }
0x16f7   :  { %v3131_v6 = vsub.f32 %v3123_v62, %v3129_v5  ;;  %v3483_v62 = vld [vmem:[%s5295_s18 + $0x18] sm:$0xff] }
0x16f8   :  { %v4359_v63 = vpack.c.bf16 %v3483_v62, %v3482_v60  ;;  %v3577_v5 = vld [vmem:[%s5297_s20 + $0x18] sm:$0xff] }
0x16f9   :  { %v3134_v7 = vmul.f32 1.442695, %v3131_v6  ;;  %v4367_v6 = vpack.c.bf16 %v3577_v5, %v3576_v37 }
0x16fa   :  { %v3303_v29 = vpop.permute.xlu1 %3302 }
0x16fb   :  { %4499 = vpow2.f32 %v3134_v7  ;;  %v3323_v35 = vsel %vm244_vm6, %v5066_v26, %v3303_v29  ;;  %v3578_v7 = vld [vmem:[%s5297_s20 + $0x20] sm:$0xff] }
0x16fe   :  { %v3309_v31 = vpop.permute.xlu1 %3308 }
0x16ff   :  { %v4498_v8 = vpop.eup %4497 }
0x1700   :  { %v3136_v2 = vsel %vm2102_vm3, %v4498_v8, 0.0 }
0x1701   :  { %3137 = vadd.xlane.f32.xlu0 %v3136_v2 }
0x1702   :  { %v3311_v54 = vpop.permute.xlu1 %3310 }
0x1703   :  { %v3325_v51 = vsel %vm1588_vm9, %v3323_v35, %v3311_v54  ;;  %v3580_v35 = vld [vmem:[%s5297_s20 + $0x30] sm:$0xff] }
0x1705   :  { %v4500_v9 = vpop.eup %4499 }
0x1706   :  { %v3139_v10 = vsel %vm2102_vm3, %v4500_v9, 0.0 }
0x1707   :  { %3140 = vadd.xlane.f32.xlu0 %v3139_v10 }
0x171d   :  { %3300 = vrot.lane.b32.xlu0 %v5104_v11, %s4554_s5  ;;  %v3329_v11 = vld [vmem:[%s5291_s14 + $0x8] sm:$0xff] }
0x171e   :  { %v4347_v19 = vpack.c.bf16 %v3329_v11, %v3328_v18 }
0x1720   :  { %4348 = vmatprep.subr.bf16.mxu0 %v4347_v19 }
0x178e   :  { %v3138_v12 = vpop.xlane.xlu0 %3137 }
0x178f   :  { %4501 = vrcp.f32 %v3138_v12 }
0x1794   :  { %v3141_v13 = vpop.xlane.xlu0 %3140 }
0x1795   :  { %4503 = vrcp.f32 %v3141_v13 }
0x1798   :  { %v3301_v30 = vpop.permute.xlu0 %3300 }
0x1799   :  { %v4502_v14 = vpop.eup %4501  ;;  %v3322_v32 = vsel %vm244_vm6, %v5064_v49, %v3301_v30  ;;  %v3830_v49 = vld [vmem:[%s5292_s15] ss:$0 sm:$0xff] }
0x179a   :  { %v3144_v15 = vmul.f32 %v4502_v14, %v4498_v8  ;;  %v3324_v45 = vsel %vm1588_vm9, %v3322_v32, %v3309_v31  ;;  %v3579_v8 = vld [vmem:[%s5297_s20 + $0x28] sm:$0xff]  ;;  %v3834_v30 = vld [vmem:[%s5294_s17] ss:$0 sm:$0xff] }
0x179b   :  { %v4371_v2 = vpack.c.bf16 %v3579_v8, %v3578_v7 }
0x179c   :  { %4203 = vmatmul.mubr.msk.f32.vlgmr.msra.gmra.mrb[34].mxu0 %vm2102_vm3, %v3144_v15 }
0x179d   :  { %4350 = vmatpush3.bf16.msra.mxu0 %v4347_v19 }
0x179e   :  { %4352 = vmatprep.subr.bf16.mxu0 %v4351_v22 }
0x179f   :  { %v4504_v16 = vpop.eup %4503 }
0x17a0   :  { %v3145_v17 = vmul.f32 %v4504_v16, %v4500_v9 }
0x17a1   :  { %4354 = vmatpush3.bf16.msra.mxu0 %v4351_v22 }
0x17a2   :  { %4210 = vmatmul.mubr.msk.f32.vlgmr.msra.gmra.mrb[38].mxu1 %vm2102_vm3, %v3145_v17  ;;  %4364 = vmatprep.subr.bf16.mxu0 %v4363_v4 }
0x17a3   :  { %4358 = vmatpush3.bf16.msra.mxu1 %v4355_v61 }
0x17a4   :  { %4360 = vmatprep.subr.bf16.mxu1 %v4359_v63 }
0x17a7   :  { %4362 = vmatpush3.bf16.msra.mxu1 %v4359_v63 }
0x186f   :  { %v3218_v23 = vpop.f32.mrb[34].mxu0 }
0x1870   :  { %v4204_v24 = vpop.f32.mrb[35].mxu0  ;;  %3316 = vrot.lane.b32.xlu0 %v3218_v23, %s5335_s10 }
0x1875   :  { %v3294_v25 = vpop.f32.mrb[38].mxu1 }
0x1876   :  { %3318 = vrot.lane.b32.xlu1 %v3294_v25, %s5335_s10  ;;  %v4211_v27 = vpop.f32.mrb[39].mxu1 }
0x1877   :  { %v3833_v27 = vld [vmem:[%s5293_s16] ss:$0 sm:$0xff] }
0x18e2   :  { %v3317_v33 = vpop.permute.xlu0 %3316 }
0x18e3   :  { %v3326_v53 = vsel %vm1591_vm8, %v3324_v45, %v3317_v33 }
0x18e4   :  { %4220 = vmatprep.mubr.msk.f32.mxu0 %vm85_vm0, %v3326_v53 }
0x18e8   :  { %v3319_v38 = vpop.permute.xlu1 %3318 }
0x18e9   :  { %v3327_v39 = vsel %vm1591_vm8, %v3325_v51, %v3319_v38  ;;  %v3581_v51 = vld [vmem:[%s5297_s20 + $0x38] sm:$0xff]  ;;  %vm3589_vm8 = vcmask 523264  }
0x18ea   :  { %4221 = vmatmul.mubr.msk.f32.vlgmr.msra.gmra.mrb[36].mxu0 %vm85_vm0, %v3327_v39  ;;  %v4375_v38 = vpack.c.bf16 %v3581_v51, %v3580_v35  ;;  %v3835_v39 = vld [vmem:[%s5296_s19] ss:$0 sm:$0xff] }
0x18eb   :  { %4366 = vmatpush3.bf16.msra.mxu0 %v4363_v4 }
0x18ec   :  { %4368 = vmatprep.subr.bf16.mxu0 %v4367_v6 }
0x18ef   :  { %4370 = vmatpush3.bf16.msra.mxu0 %v4367_v6 }
0x18f0   :  { %4372 = vmatprep.subr.bf16.mxu0 %v4371_v2 }
0x18f3   :  { %4374 = vmatpush3.bf16.msra.mxu0 %v4371_v2 }
0x18f4   :  { %4376 = vmatprep.subr.bf16.mxu0 %v4375_v38 }
0x18f7   :  { %4378 = vmatpush3.bf16.msra.mxu0 %v4375_v38 }
0x19bd   :  { %v4222_v1 = vpop.f32.mrb[36].mxu0 }
0x19be   :  { %v3417_v0 = vadd.f32 %v4222_v1, %v3830_v49  ;;  %v3411_v41 = vpop.f32.mrb[37].mxu0 }
0x19bf   :  { %v3412_v42 = vadd.f32 %v3830_v49, %v3411_v41 }
0x19c0   :  { %v5182_v43 = vadd.f32 %v3417_v0, %v4905_v28 }
0x19c1   :  { %v5185_v26 = vadd.f32 %v3412_v42, %v4908_v34 }
0x19c2   :  { %v3427_v40 = vsel %vm85_vm0, %v5182_v43, 0.0 }
0x19c3   :  { %3428 = vadd.xlane.f32.xlu1 %v3427_v40  ;;  %v3424_v44 = vsel %vm85_vm0, %v5185_v26, 0.0 }
0x19c4   :  { %3425 = vadd.xlane.f32.xlu0 %v3424_v44  ;;  %v3838_v44 = vld [vmem:[%s5298_s21] ss:$0 sm:$0xff] }
0x1a50   :  { %v3429_v47 = vpop.xlane.xlu1 %3428 }
0x1a51   :  { %v3431_v50 = vmul.f32 0.03125, %v3429_v47  ;;  %v3426_v52 = vpop.xlane.xlu0 %3425 }
0x1a52   :  { %v3430_v36 = vmul.f32 0.03125, %v3426_v52 }
0x1a53   :  { %v5192_v55 = vsub.f32 %v5182_v43, %v3431_v50 }
0x1a54   :  { %v3432_v28 = vsub.f32 %v5185_v26, %v3430_v36 }
0x1a55   :  { %v3435_v57 = vmul.f32 %v5192_v55, %v5192_v55 }
0x1a56   :  { %v3434_v56 = vmul.f32 %v3432_v28, %v3432_v28 }
0x1a57   :  { %v3439_v48 = vsel %vm85_vm0, %v3435_v57, 0.0 }
0x1a58   :  { %v3436_v34 = vsel %vm85_vm0, %v3434_v56, 0.0 }
0x1a59   :  { %3437 = vadd.xlane.f32.xlu0 %v3436_v34 }
0x1a5d   :  { %3440 = vadd.xlane.f32.xlu0 %v3439_v48 }
0x1ae6   :  { %v3438_v9 = vpop.xlane.xlu0 %3437 }
0x1ae7   :  { %v3442_v10 = vmul.f32 0.032258064, %v3438_v9 }
0x1ae9   :  { %4505 = vrsqrt.f32 %v3442_v10  ;;  %vm3446_vm4 = vcmp.eq.f32.partialorder %v3442_v10, inf  ;;  %v3449_v16 = vand.u32 2147483648, %v3442_v10  ;;  %vm3448_vm5 = vcmp.eq.f32.partialorder %v3442_v10, 0.0 }
0x1aea   :  { %v3441_v12 = vpop.xlane.xlu0 %3440 }
0x1aeb   :  { %v3443_v13 = vmul.f32 0.032258064, %v3441_v12 }
0x1aed   :  { %4507 = vrsqrt.f32 %v3443_v13  ;;  %vm3453_vm6 = vcmp.eq.f32.partialorder %v3443_v13, inf  ;;  %v3456_v21 = vand.u32 2147483648, %v3443_v13  ;;  %vm3455_vm7 = vcmp.eq.f32.partialorder %v3443_v13, 0.0 }
0x1af3   :  { %v4506_v14 = vpop.eup %4505 }
0x1af4   :  { %v3445_v15 = vmul.f32 %v4506_v14, %v3442_v10 }
0x1af6   :  { %v3447_v17 = vsel %vm3446_vm4, %v3442_v10, %v3445_v15 }
0x1af7   :  { %v4508_v18 = vpop.eup %4507  ;;  %v3450_v11 = vsel %vm3448_vm5, %v3449_v16, %v3447_v17 }
0x1af8   :  { %v3458_v19 = vadd.f32 1e-06, %v3450_v11  ;;  %v3452_v20 = vmul.f32 %v4508_v18, %v3443_v13  ;;  %v3841_v18 = vld [vmem:[%s5299_s22] ss:$0 sm:$0xff] }
0x1afa   :  { %4509 = vrcp.f32 %v3458_v19  ;;  %v3454_v22 = vsel %vm3453_vm6, %v3443_v13, %v3452_v20  ;;  %v3842_v20 = vld [vmem:[%s5300_s23] ss:$0 sm:$0xff] }
0x1afb   :  { %v3457_v23 = vsel %vm3455_vm7, %v3456_v21, %v3454_v22 }
0x1afc   :  { %v3459_v24 = vadd.f32 1e-06, %v3457_v23 }
0x1afe   :  { %4511 = vrcp.f32 %v3459_v24 }
0x1b04   :  { %v4510_v25 = vpop.eup %4509 }
0x1b05   :  { %v3461_v29 = vmul.f32 %v4510_v25, %v3432_v28 }
0x1b07   :  { %v3470_v31 = vmul.f32 %v3833_v27, %v3461_v29 }
0x1b08   :  { %v4512_v32 = vpop.eup %4511 }
0x1b09   :  { %v3463_v33 = vmul.f32 %v4512_v32, %v5192_v55  ;;  %v3478_v45 = vadd.f32 %v3834_v30, %v3470_v31 }
0x1b0b   :  { %v3471_v53 = vmul.f32 %v3833_v27, %v3463_v33  ;;  %4231 = vmatprep.mubr.msk.f32.mxu1 %vm85_vm0, %v3478_v45 }
0x1b0d   :  { %v3479_v54 = vadd.f32 %v3834_v30, %v3471_v53 }
0x1b0f   :  { %4232 = vmatmul.mubr.msk.f32.vlgmr.msra.gmra.mrb[40].mxu1 %vm85_vm0, %v3479_v54 }
0x1be2   :  { %v4233_v49 = vpop.f32.mrb[40].mxu1 }
0x1be3   :  { %v3569_v1 = vadd.f32 %v4233_v49, %v3835_v39  ;;  %v3563_v0 = vpop.f32.mrb[41].mxu1 }
0x1be4   :  { %v3564_v41 = vadd.f32 %v3835_v39, %v3563_v0 }
0x1be5   :  { %v3573_v40 = vmax.f32 %v3569_v1, 0.0 }
0x1be6   :  { %v3572_v42 = vmax.f32 %v3564_v41, 0.0 }
0x1be8   :  { %4250 = vmatprep.mubr.msk.f32.mxu0 %vm3589_vm8, %v3572_v42 }
0x1be9   :  { %4251 = vmatmul.mubr.msk.f32.vlgmr.msra.gmra.mrb[38].mxu0 %vm3589_vm8, %v3573_v40 }
0x1cbc   :  { %v4252_v47 = vpop.f32.mrb[38].mxu0 }
0x1cbd   :  { %v3668_v50 = vadd.f32 %v4252_v47, %v3838_v44  ;;  %v3662_v52 = vpop.f32.mrb[39].mxu0 }
0x1cbe   :  { %v3663_v36 = vadd.f32 %v3838_v44, %v3662_v52 }
0x1cbf   :  { %v3672_v55 = vadd.f32 %v3668_v50, %v5182_v43 }
0x1cc0   :  { %v3671_v28 = vadd.f32 %v3663_v36, %v5185_v26 }
0x1cc1   :  { %v3678_v56 = vsel %vm85_vm0, %v3672_v55, 0.0 }
0x1cc2   :  { %3679 = vadd.xlane.f32.xlu1 %v3678_v56  ;;  %v3675_v34 = vsel %vm85_vm0, %v3671_v28, 0.0 }
0x1cc3   :  { %3676 = vadd.xlane.f32.xlu0 %v3675_v34 }
0x1d4f   :  { %v3680_v57 = vpop.xlane.xlu1 %3679 }
0x1d50   :  { %v3682_v48 = vmul.f32 0.03125, %v3680_v57  ;;  %v3677_v58 = vpop.xlane.xlu0 %3676 }
0x1d51   :  { %v3681_v59 = vmul.f32 0.03125, %v3677_v58 }
0x1d52   :  { %v3684_v60 = vsub.f32 %v3672_v55, %v3682_v48 }
0x1d53   :  { %v3683_v61 = vsub.f32 %v3671_v28, %v3681_v59 }
0x1d54   :  { %v3686_v62 = vmul.f32 %v3684_v60, %v3684_v60 }
0x1d55   :  { %v3685_v63 = vmul.f32 %v3683_v61, %v3683_v61 }
0x1d56   :  { %v3690_v3 = vsel %vm85_vm0, %v3686_v62, 0.0 }
0x1d57   :  { %3691 = vadd.xlane.f32.xlu1 %v3690_v3  ;;  %v3687_v43 = vsel %vm85_vm0, %v3685_v63, 0.0 }
0x1d58   :  { %3688 = vadd.xlane.f32.xlu0 %v3687_v43 }
0x1de4   :  { %v3692_v26 = vpop.xlane.xlu1 %3691 }
0x1de5   :  { %v3694_v46 = vmul.f32 0.032258064, %v3692_v26  ;;  %v3689_v37 = vpop.xlane.xlu0 %3688 }
0x1de6   :  { %v3693_v4 = vmul.f32 0.032258064, %v3689_v37 }
0x1de7   :  { %4513 = vrsqrt.f32 %v3694_v46  ;;  %vm3704_vm9 = vcmp.eq.f32.partialorder %v3694_v46, inf  ;;  %v3707_v8 = vand.u32 2147483648, %v3694_v46  ;;  %vm3706_vm10 = vcmp.eq.f32.partialorder %v3694_v46, 0.0 }
0x1de8   :  { %4515 = vrsqrt.f32 %v3693_v4  ;;  %vm3697_vm11 = vcmp.eq.f32.partialorder %v3693_v4, inf  ;;  %v3700_v10 = vand.u32 2147483648, %v3693_v4  ;;  %vm3699_vm12 = vcmp.eq.f32.partialorder %v3693_v4, 0.0 }
0x1df1   :  { %v4514_v5 = vpop.eup %4513 }
0x1df2   :  { %v4516_v6 = vpop.eup %4515  ;;  %v3703_v7 = vmul.f32 %v4514_v5, %v3694_v46 }
0x1df3   :  { %v3696_v2 = vmul.f32 %v4516_v6, %v3693_v4 }
0x1df4   :  { %v3705_v9 = vsel %vm3704_vm9, %v3694_v46, %v3703_v7 }
0x1df5   :  { %v3708_v12 = vsel %vm3706_vm10, %v3707_v8, %v3705_v9  ;;  %v3698_v13 = vsel %vm3697_vm11, %v3693_v4, %v3696_v2 }
0x1df6   :  { %v3710_v14 = vadd.f32 1e-06, %v3708_v12  ;;  %v3701_v15 = vsel %vm3699_vm12, %v3700_v10, %v3698_v13 }
0x1df7   :  { %v3709_v16 = vadd.f32 1e-06, %v3701_v15 }
0x1df8   :  { %4517 = vrcp.f32 %v3710_v14 }
0x1df9   :  { %4519 = vrcp.f32 %v3709_v16 }
0x1e02   :  { %v4518_v17 = vpop.eup %4517 }
0x1e03   :  { %v4520_v11 = vpop.eup %4519  ;;  %v3714_v19 = vmul.f32 %v4518_v17, %v3684_v60 }
0x1e04   :  { %v3712_v21 = vmul.f32 %v4520_v11, %v3683_v61 }
0x1e05   :  { %v3722_v22 = vmul.f32 %v3841_v18, %v3714_v19 }
0x1e06   :  { %v3721_v23 = vmul.f32 %v3841_v18, %v3712_v21 }
0x1e07   :  { %v3730_v24 = vadd.f32 %v3842_v20, %v3722_v22 }
0x1e08   :  { %v3729_v25 = vadd.f32 %v3842_v20, %v3721_v23 }
0x1e09   :  { %3732 = vst.msk [vmem:[#allocation2 + $0x8] sm:$0xff] %vm85_vm0, %v3730_v24 }
0x1e0a   :  { %3731 = vst.msk [vmem:[#allocation2] sm:$0xff] %vm85_vm0, %v3729_v25 }
0x1e0b   :  { %4532 = shalt.err (!%p4529_p4)
}
0x1e0c   :  { %s4533_s1 = scalar_lea.hbm %s5301_s24, 256 }
0x1e0d   :  { %p4534_p5 = scmp.ne.s32.totalorder %s5301_s24, %s4533_s1  ;;  %p4537_p6 = scmp.lt.u32.totalorder %s4533_s1, %s5301_s24 }
0x1e0f   :  { %p4539_p7 = pnand %p4537_p6, %p4534_p5 }
0x1e11   :  { %4542 = shalt.err (!%p4539_p7)
}
0x1e12   :  { %s4560_s26 = smov 128  }
0x1e13   :  { %3744 = dma.vmem_to_hbm [thread:$0]  %s3739_s3, 256, %s5301_s24, [#allocation3], %s4560_s26, %s4560_s26, %s4554_s5  }
0x1e14   :  { %4543 = dma.done.wait [#allocation3], 256  }
0x1e15   :  { %4544 = vsyncadd [#allocation3], 4294967040 }
0x1e16   :  { %3748 = vsyncpa [#allocation3], 1 }

</bundles_post_ra>
